<compile_context>
chip_gen: v7x
topology: tpu7x:2x2x1
jax: 0.10.0
libtpu: 0.0.40
codegen_flags: <defaults>
</compile_context>

<pallas_src>
import jax
import jax.numpy as jnp
from jax.experimental import pallas as pl
from jax.experimental.pallas import tpu as pltpu


def _round_up(x: int, m: int) -> int:
    return ((x + m - 1) // m) * m


def _make_mlp_kernel(num_hidden_layers: int, negative_slope: float,
                     lane_dense_out: bool):
    """Fused MLP kernel: L x (MXU matmul + bias + LeakyReLU) then a 1-unit
    projection as VPU multiply + lane reduction."""

    def kernel(*refs):
        # refs layout: x, (w1, b1), ..., (wL, bL), w_out_row, b_out, o
        x_ref = refs[0]
        o_ref = refs[-1]
        p = refs[1:-1]

        h = x_ref[...]                      # compute dtype (bf16 or f32)
        idx = 0
        for _ in range(num_hidden_layers):
            w = p[idx][...]                 # (d_in, d_out) compute dtype
            b = p[idx + 1][...]             # (1, d_out) f32
            idx += 2
            # MXU matmul with f32 accumulation; bias + activation on VPU in f32.
            h = jnp.dot(h.astype(w.dtype), w,
                        preferred_element_type=jnp.float32) + b
            # nn.Dropout: identity at inference.  LeakyReLU(slope) as a single
            # max (valid since 0 < slope < 1): saves a compare+select per elem.
            h = jnp.maximum(h, negative_slope * h)

        w_row = p[idx][...]                 # (1, d_last) f32 (final W as a row)
        b_out = p[idx + 1][...]             # (1, 1) f32
        # Final N=1 projection: VPU multiply + XLU lane reduction (no MXU waste).
        col = jnp.sum(h.astype(jnp.float32) * w_row, axis=-1,
                      keepdims=True)        # (tile, 1)
        if lane_dense_out:
            # Lane-dense (1, tile) store: avoids ~tile/8 masked partial stores
            # and the strided 4-byte-per-row output writeback.
            o_ref[...] = col.reshape(1, -1) + b_out
        else:
            o_ref[...] = col + b_out

    return kernel


def _prepare_params(params, compute_dtype):
    """Host-side param prep: pad hidden widths (and final d_last) to multiples
    of 128 with zeros (numerically exact), cast hidden weights to the MXU
    compute dtype once, reshape the final layer to a (1, d_last) row."""
    num_hidden = len(params) - 1
    prepped = []
    prev_pad = 0
    for li, (w, b) in enumerate(params):
        w = jnp.asarray(w, jnp.float32)
        b = jnp.asarray(b, jnp.float32).reshape(1, -1)
        if prev_pad:                         # match previous layer's padded width
            w = jnp.pad(w, ((0, prev_pad), (0, 0)))
        if li < num_hidden:
            d_out = w.shape[1]
            cpad = _round_up(d_out, 128) - d_out
            if cpad:
                w = jnp.pad(w, ((0, 0), (0, cpad)))
                b = jnp.pad(b, ((0, 0), (0, cpad)))
            prev_pad = cpad
            prepped.append((w.astype(compute_dtype), b))           # hidden layer
        else:
            prepped.append((w.reshape(1, -1).astype(jnp.float32),  # (1, d_last)
                            b.reshape(1, 1)))                      # (1, 1)
    return prepped, num_hidden


def critic_forward(x, params, *, in_dim, packing_size, negative_slope=0.1,
                   tile_m=512, compute_dtype=jnp.bfloat16):
    """Runs the Critic forward pass as a fused, M-tiled Pallas kernel.

    Args:
      x: (batch, in_dim) float32; batch must be divisible by packing_size.
      params: list of (W, b); hidden W: (d_in, d_out), b: (1, d_out);
              final W: (d_last, 1), b: (1, 1).
      tile_m: requested rows per grid step (auto-clamped for VMEM / megacore).
      compute_dtype: dtype fed to the MXU matmuls (f32 accumulation).
    Returns:
      (batch // packing_size, 1) float32 scores.
    """
    assert x.shape[0] % packing_size == 0, (
        "batch size must be divisible by packing size")
    d_in = in_dim * packing_size

    # Packing reshape + ONE host-side cast: x is the dominant byte stream, so
    # streaming it in the compute dtype halves the per-tile HBM->VMEM DMA.
    xp = x.reshape(-1, d_in).astype(compute_dtype)
    m = xp.shape[0]

    prepped, num_hidden = _prepare_params(params, compute_dtype)

    # Resident-weight fast-path guard (weights live in VMEM across the grid).
    weight_bytes = sum(int(w.size) * w.dtype.itemsize +
                       int(b.size) * b.dtype.itemsize for w, b in prepped)
    # TODO(synk): add a K/N-tiled weight-streaming variant for very wide layers.
    assert weight_bytes <= 8 * 1024 * 1024, (
        f"Critic weights ({weight_bytes} B) exceed the resident-in-VMEM fast "
        "path budget; a K/N-tiled variant is required for this config.")

    cbytes = jnp.dtype(compute_dtype).itemsize
    widths = [w.shape[1] for w, _ in prepped[:num_hidden]]
    widths.append(prepped[-1][0].shape[1])          # padded d_last
    max_d = max([d_in] + widths)

    def vmem_need(t):
        return (2 * t * d_in * cbytes        # double-buffered x tiles
                + 2 * weight_bytes           # params (worst case double-buffered)
                + 2 * t * max_d * 4          # f32 activations + cast temporaries
                + 2 * t * 4)                 # output tiles

    # --- Tile selection: lane-dense output wants tile % 128 (or tile == m),
    # bf16 rows pack 2/sublane so 128 also satisfies the 16-row alignment.
    LANE = 128
    budget = 40 * 1024 * 1024                # fits v7x's 64 MiB VMEM w/ headroom
    if m <= LANE:
        tile = m                              # single full block
    else:
        tile = min(_round_up(max(int(tile_m), LANE), LANE), _round_up(m, LANE))
        # Keep >=2 grid steps so both v7x TensorCores get work on the
        # "parallel" M axis (neutral on single-TC v5e/v6e).
        tile = min(tile, _round_up(pl.cdiv(m, 2), LANE))
        while tile > LANE and vmem_need(tile) > budget:
            tile = _round_up(tile // 2, LANE)
    grid = (pl.cdiv(m, tile),)

    vmem_limit = int(min(max(vmem_need(tile) * 3 // 2 + (2 << 20), 16 << 20),
                         96 << 20))

    # Cost hint for the XLA scheduler.
    flops = 0
    for w, _ in prepped[:num_hidden]:
        flops += 2 * m * int(w.shape[0]) * int(w.shape[1])
    flops += 2 * m * int(prepped[-1][0].shape[1])
    bytes_accessed = int(xp.size) * cbytes + weight_bytes + m * 4
    cost = pl.CostEstimate(flops=flops, transcendentals=0,
                           bytes_accessed=bytes_accessed)

    def build_and_run(optimized):
        kernel = _make_mlp_kernel(num_hidden, negative_slope,
                                  lane_dense_out=optimized)
        flat_inputs = [xp]
        in_specs = [pl.BlockSpec((tile, d_in), lambda i: (i, 0))]
        for w_in, b_in in prepped:
            flat_inputs += [w_in, b_in]
            if optimized:
                # Constant-index params are never re-DMA'd; single-buffer them
                # to halve the resident-weight VMEM footprint.
                in_specs += [pl.BlockSpec(w_in.shape, lambda i: (0, 0),
                                          pipeline_mode=pl.Buffered(1)),
                             pl.BlockSpec(b_in.shape, lambda i: (0, 0),
                                          pipeline_mode=pl.Buffered(1))]
            else:
                in_specs += [pl.BlockSpec(w_in.shape, lambda i: (0, 0)),
                             pl.BlockSpec(b_in.shape, lambda i: (0, 0))]

        if optimized:
            out_shape = jax.ShapeDtypeStruct((1, m), jnp.float32)   # lane-dense
            out_spec = pl.BlockSpec((1, tile), lambda i: (0, i))
        else:
            out_shape = jax.ShapeDtypeStruct((m, 1), jnp.float32)
            out_spec = pl.BlockSpec((tile, 1), lambda i: (i, 0))

        fn = pl.pallas_call(
            kernel,
            out_shape=out_shape,
            grid=grid,
            in_specs=in_specs,
            out_specs=out_spec,
            compiler_params=pltpu.CompilerParams(
                dimension_semantics=("parallel",),
                vmem_limit_bytes=vmem_limit),
            cost_estimate=cost,
        )
        out = fn(*flat_inputs)
        return out.reshape(m, 1)

    try:
        return build_and_run(optimized=True)
    except Exception:
        # Conservative fallback (previously-validated spec set) in case the
        # installed Pallas/Mosaic rejects Buffered(1) or the lane-dense store.
        return build_and_run(optimized=False)


def init_critic_params(in_dim, layer_dims, packing_size, seed=0):
    """Deterministic synthetic parameter init matching Critic.__init__ shapes."""
    dims = [in_dim * packing_size] + list(layer_dims) + [1]
    key = jax.random.PRNGKey(seed)
    params = []
    for d_in, d_out in zip(dims[:-1], dims[1:]):
        key, kw, kb = jax.random.split(key, 3)
        bound = 1.0 / (d_in ** 0.5)
        w = jax.random.uniform(kw, (d_in, d_out), jnp.float32, -bound, bound)
        b = jax.random.uniform(kb, (1, d_out), jnp.float32, -bound, bound)
        params.append((w, b))
    return params


def critic_reference(x, params, *, in_dim, packing_size, negative_slope=0.1):
    """Pure-JAX f32 reference for correctness checking."""
    h = x.reshape(-1, in_dim * packing_size).astype(jnp.float32)
    for i, (w, b) in enumerate(params):
        h = h @ w + b
        if i < len(params) - 1:
            h = jnp.where(h > 0, h, negative_slope * h)
    return h


if __name__ == "__main__":
    in_dim = 16
    packing_size = 2
    layer_dims = [32, 16]
    negative_slope = 0.1

    params = init_critic_params(in_dim, layer_dims, packing_size, seed=0)

    # Case 1: default bf16 path, multi-step grid (m=320, tile=256 -> 2 steps,
    # padded tail on the second step), lane-dense output.
    batch = 640
    x = jax.random.normal(jax.random.PRNGKey(0), (batch, in_dim), dtype=jnp.float32)
    out = critic_forward(x, params, in_dim=in_dim, packing_size=packing_size,
                         negative_slope=negative_slope)
    out = jax.block_until_ready(out)
    ref = critic_reference(x, params, in_dim=in_dim, packing_size=packing_size,
                           negative_slope=negative_slope)
    assert out.shape == (batch // packing_size, 1), out.shape
    assert jnp.allclose(out, ref, atol=5e-2, rtol=5e-2), (out, ref)

    # Case 2: f32 path, small tile -> 3-step grid with a partial tail block.
    batch2 = 640  # m = 320, tile_m=128 -> tiles of 128/128/64
    x2 = jax.random.normal(jax.random.PRNGKey(1), (batch2, in_dim), dtype=jnp.float32)
    out2 = critic_forward(x2, params, in_dim=in_dim, packing_size=packing_size,
                          negative_slope=negative_slope,
                          tile_m=128, compute_dtype=jnp.float32)
    out2 = jax.block_until_ready(out2)
    ref2 = critic_reference(x2, params, in_dim=in_dim, packing_size=packing_size,
                            negative_slope=negative_slope)
    assert out2.shape == (batch2 // packing_size, 1), out2.shape
    assert jnp.allclose(out2, ref2, atol=1e-4, rtol=1e-4), (out2, ref2)

    # Case 3: no hidden layers (layer_dims == []) -> just the 1-unit projection.
    params3 = init_critic_params(in_dim, [], packing_size, seed=1)
    out3 = critic_forward(x2, params3, in_dim=in_dim, packing_size=packing_size,
                          negative_slope=negative_slope,
                          tile_m=128, compute_dtype=jnp.float32)
    out3 = jax.block_until_ready(out3)
    ref3 = critic_reference(x2, params3, in_dim=in_dim, packing_size=packing_size,
                            negative_slope=negative_slope)
    assert out3.shape == (batch2 // packing_size, 1), out3.shape
    assert jnp.allclose(out3, ref3, atol=1e-4, rtol=1e-4), (out3, ref3)

    # Case 4: tiny batch, single full-array block (no alignment padding needed).
    batch4 = 64  # m = 32 -> single grid step
    x4 = jax.random.normal(jax.random.PRNGKey(2), (batch4, in_dim), dtype=jnp.float32)
    out4 = critic_forward(x4, params, in_dim=in_dim, packing_size=packing_size,
                          negative_slope=negative_slope,
                          compute_dtype=jnp.float32)
    out4 = jax.block_until_ready(out4)
    ref4 = critic_reference(x4, params, in_dim=in_dim, packing_size=packing_size,
                            negative_slope=negative_slope)
    assert out4.shape == (batch4 // packing_size, 1), out4.shape
    assert jnp.allclose(out4, ref4, atol=1e-4, rtol=1e-4), (out4, ref4)

    print("KERNEL_OK")
</pallas_src>

<mosaic_0001>
module attributes {stable_mosaic.version = 11 : i64} {
  func.func @kernel(%arg0: i32, %arg1: memref<256x32xbf16, #tpu.memory_space<vmem>>, %arg2: memref<32x128xbf16, #tpu.memory_space<vmem>>, %arg3: memref<1x128xf32, #tpu.memory_space<vmem>>, %arg4: memref<128x128xbf16, #tpu.memory_space<vmem>>, %arg5: memref<1x128xf32, #tpu.memory_space<vmem>>, %arg6: memref<1x128xf32, #tpu.memory_space<vmem>>, %arg7: memref<1x1xf32, #tpu.memory_space<vmem>>, %arg8: memref<1x256xf32, #tpu.memory_space<vmem>>) attributes {dimension_semantics = [#tpu.dimension_semantics<parallel>], iteration_bounds = array<i64: 2>, scalar_prefetch = 0 : i64, scratch_operands = 0 : i64, tpu.core_type = #tpu.core_type<tc>, window_params = [{transform_indices = @transform_0, window_bounds = array<i64: 256, 32>}, {pipeline_mode = #tpu.pipeline_mode<synchronous>, transform_indices = @transform_1, window_bounds = array<i64: 32, 128>}, {pipeline_mode = #tpu.pipeline_mode<synchronous>, transform_indices = @transform_2, window_bounds = array<i64: 1, 128>}, {pipeline_mode = #tpu.pipeline_mode<synchronous>, transform_indices = @transform_3, window_bounds = array<i64: 128, 128>}, {pipeline_mode = #tpu.pipeline_mode<synchronous>, transform_indices = @transform_4, window_bounds = array<i64: 1, 128>}, {pipeline_mode = #tpu.pipeline_mode<synchronous>, transform_indices = @transform_5, window_bounds = array<i64: 1, 128>}, {pipeline_mode = #tpu.pipeline_mode<synchronous>, transform_indices = @transform_6, window_bounds = array<i64: 1, 1>}, {transform_indices = @transform_7, window_bounds = array<i64: 1, 256>}]} {
    %c0 = arith.constant 0 : index
    %c0_0 = arith.constant 0 : index
    %0 = vector.load %arg1[%c0, %c0_0] : memref<256x32xbf16, #tpu.memory_space<vmem>>, vector<256x32xbf16>
    %c0_1 = arith.constant 0 : index
    %c0_2 = arith.constant 0 : index
    %1 = vector.load %arg2[%c0_1, %c0_2] : memref<32x128xbf16, #tpu.memory_space<vmem>>, vector<32x128xbf16>
    %c0_3 = arith.constant 0 : index
    %c0_4 = arith.constant 0 : index
    %2 = vector.load %arg3[%c0_3, %c0_4] : memref<1x128xf32, #tpu.memory_space<vmem>>, vector<1x128xf32>
    %cst = arith.constant dense<0.000000e+00> : vector<256x128xf32>
    %3 = tpu.matmul %0, %1, %cst {dimension_numbers = #tpu.dot_dimension_numbers<[1], [0], [0], [1], [0, 0, 1, 1], [], []>} : vector<256x32xbf16>, vector<32x128xbf16>, vector<256x128xf32> -> vector<256x128xf32>
    %4 = vector.broadcast %2 : vector<1x128xf32> to vector<256x128xf32>
    %5 = arith.addf %3, %4 : vector<256x128xf32>
    %cst_5 = arith.constant 1.000000e-01 : f32
    %6 = vector.broadcast %cst_5 : f32 to vector<256x128xf32>
    %7 = arith.mulf %6, %5 : vector<256x128xf32>
    %8 = arith.maximumf %5, %7 : vector<256x128xf32>
    %c0_6 = arith.constant 0 : index
    %c0_7 = arith.constant 0 : index
    %9 = vector.load %arg4[%c0_6, %c0_7] : memref<128x128xbf16, #tpu.memory_space<vmem>>, vector<128x128xbf16>
    %c0_8 = arith.constant 0 : index
    %c0_9 = arith.constant 0 : index
    %10 = vector.load %arg5[%c0_8, %c0_9] : memref<1x128xf32, #tpu.memory_space<vmem>>, vector<1x128xf32>
    %11 = arith.truncf %8 : vector<256x128xf32> to vector<256x128xbf16>
    %cst_10 = arith.constant dense<0.000000e+00> : vector<256x128xf32>
    %12 = tpu.matmul %11, %9, %cst_10 {dimension_numbers = #tpu.dot_dimension_numbers<[1], [0], [0], [1], [0, 0, 1, 1], [], []>} : vector<256x128xbf16>, vector<128x128xbf16>, vector<256x128xf32> -> vector<256x128xf32>
    %13 = vector.broadcast %10 : vector<1x128xf32> to vector<256x128xf32>
    %14 = arith.addf %12, %13 : vector<256x128xf32>
    %cst_11 = arith.constant 1.000000e-01 : f32
    %15 = vector.broadcast %cst_11 : f32 to vector<256x128xf32>
    %16 = arith.mulf %15, %14 : vector<256x128xf32>
    %17 = arith.maximumf %14, %16 : vector<256x128xf32>
    %c0_12 = arith.constant 0 : index
    %c0_13 = arith.constant 0 : index
    %18 = vector.load %arg6[%c0_12, %c0_13] : memref<1x128xf32, #tpu.memory_space<vmem>>, vector<1x128xf32>
    %c0_14 = arith.constant 0 : index
    %c0_15 = arith.constant 0 : index
    %19 = vector.load %arg7[%c0_14, %c0_15] : memref<1x1xf32, #tpu.memory_space<vmem>>, vector<1x1xf32>
    %20 = vector.broadcast %18 : vector<1x128xf32> to vector<256x128xf32>
    %21 = arith.mulf %17, %20 : vector<256x128xf32>
    %cst_16 = arith.constant dense<0.000000e+00> : vector<256xf32>
    %22 = vector.multi_reduction <add>, %21, %cst_16 [1] : vector<256x128xf32> to vector<256xf32>
    %23 = vector.shape_cast %22 : vector<256xf32> to vector<256x1xf32>
    %24 = vector.shape_cast %23 : vector<256x1xf32> to vector<1x256xf32>
    %25 = vector.broadcast %19 : vector<1x1xf32> to vector<1x256xf32>
    %26 = arith.addf %24, %25 : vector<1x256xf32>
    %c0_17 = arith.constant 0 : index
    %c0_18 = arith.constant 0 : index
    %27 = vector.load %arg8[%c0_17, %c0_18] : memref<1x256xf32, #tpu.memory_space<vmem>>, vector<1x256xf32>
    tpu.vector_store %arg8[%c0_17, %c0_18], %26 {strides = array<i32>} : memref<1x256xf32, #tpu.memory_space<vmem>>, vector<1x256xf32>,
    return
  }
  func.func @transform_0(%arg0: i32) -> (i32, i32) {
    %c0_i32 = arith.constant 0 : i32
    %c0_i32_0 = arith.constant 0 : i32
    return %arg0, %c0_i32 : i32, i32
  }
  func.func @transform_1(%arg0: i32) -> (i32, i32) {
    %c0_i32 = arith.constant 0 : i32
    %c0_i32_0 = arith.constant 0 : i32
    %c0_i32_1 = arith.constant 0 : i32
    return %c0_i32, %c0_i32_0 : i32, i32
  }
  func.func @transform_2(%arg0: i32) -> (i32, i32) {
    %c0_i32 = arith.constant 0 : i32
    %c0_i32_0 = arith.constant 0 : i32
    %c0_i32_1 = arith.constant 0 : i32
    return %c0_i32, %c0_i32_0 : i32, i32
  }
  func.func @transform_3(%arg0: i32) -> (i32, i32) {
    %c0_i32 = arith.constant 0 : i32
    %c0_i32_0 = arith.constant 0 : i32
    %c0_i32_1 = arith.constant 0 : i32
    return %c0_i32, %c0_i32_0 : i32, i32
  }
  func.func @transform_4(%arg0: i32) -> (i32, i32) {
    %c0_i32 = arith.constant 0 : i32
    %c0_i32_0 = arith.constant 0 : i32
    %c0_i32_1 = arith.constant 0 : i32
    return %c0_i32, %c0_i32_0 : i32, i32
  }
  func.func @transform_5(%arg0: i32) -> (i32, i32) {
    %c0_i32 = arith.constant 0 : i32
    %c0_i32_0 = arith.constant 0 : i32
    %c0_i32_1 = arith.constant 0 : i32
    return %c0_i32, %c0_i32_0 : i32, i32
  }
  func.func @transform_6(%arg0: i32) -> (i32, i32) {
    %c0_i32 = arith.constant 0 : i32
    %c0_i32_0 = arith.constant 0 : i32
    %c0_i32_1 = arith.constant 0 : i32
    return %c0_i32, %c0_i32_0 : i32, i32
  }
  func.func @transform_7(%arg0: i32) -> (i32, i32) {
    %c0_i32 = arith.constant 0 : i32
    %c0_i32_0 = arith.constant 0 : i32
    return %c0_i32, %arg0 : i32, i32
  }
}

module attributes {stable_mosaic.version = 11 : i64} {
  func.func @kernel(%arg0: i32, %arg1: memref<256x32xbf16, #tpu.memory_space<vmem>>, %arg2: memref<32x128xbf16, #tpu.memory_space<vmem>>, %arg3: memref<1x128xf32, #tpu.memory_space<vmem>>, %arg4: memref<128x128xbf16, #tpu.memory_space<vmem>>, %arg5: memref<1x128xf32, #tpu.memory_space<vmem>>, %arg6: memref<1x128xf32, #tpu.memory_space<vmem>>, %arg7: memref<1x1xf32, #tpu.memory_space<vmem>>, %arg8: memref<256x1xf32, #tpu.memory_space<vmem>>) attributes {dimension_semantics = [#tpu.dimension_semantics<parallel>], iteration_bounds = array<i64: 2>, scalar_prefetch = 0 : i64, scratch_operands = 0 : i64, tpu.core_type = #tpu.core_type<tc>, window_params = [{transform_indices = @transform_0, window_bounds = array<i64: 256, 32>}, {pipeline_mode = #tpu.pipeline_mode<synchronous>, transform_indices = @transform_1, window_bounds = array<i64: 32, 128>}, {pipeline_mode = #tpu.pipeline_mode<synchronous>, transform_indices = @transform_2, window_bounds = array<i64: 1, 128>}, {pipeline_mode = #tpu.pipeline_mode<synchronous>, transform_indices = @transform_3, window_bounds = array<i64: 128, 128>}, {pipeline_mode = #tpu.pipeline_mode<synchronous>, transform_indices = @transform_4, window_bounds = array<i64: 1, 128>}, {pipeline_mode = #tpu.pipeline_mode<synchronous>, transform_indices = @transform_5, window_bounds = array<i64: 1, 128>}, {pipeline_mode = #tpu.pipeline_mode<synchronous>, transform_indices = @transform_6, window_bounds = array<i64: 1, 1>}, {transform_indices = @transform_7, window_bounds = array<i64: 256, 1>}]} {
    %c0 = arith.constant 0 : index
    %c0_0 = arith.constant 0 : index
    %0 = vector.load %arg1[%c0, %c0_0] : memref<256x32xbf16, #tpu.memory_space<vmem>>, vector<256x32xbf16>
    %c0_1 = arith.constant 0 : index
    %c0_2 = arith.constant 0 : index
    %1 = vector.load %arg2[%c0_1, %c0_2] : memref<32x128xbf16, #tpu.memory_space<vmem>>, vector<32x128xbf16>
    %c0_3 = arith.constant 0 : index
    %c0_4 = arith.constant 0 : index
    %2 = vector.load %arg3[%c0_3, %c0_4] : memref<1x128xf32, #tpu.memory_space<vmem>>, vector<1x128xf32>
    %cst = arith.constant dense<0.000000e+00> : vector<256x128xf32>
    %3 = tpu.matmul %0, %1, %cst {dimension_numbers = #tpu.dot_dimension_numbers<[1], [0], [0], [1], [0, 0, 1, 1], [], []>} : vector<256x32xbf16>, vector<32x128xbf16>, vector<256x128xf32> -> vector<256x128xf32>
    %4 = vector.broadcast %2 : vector<1x128xf32> to vector<256x128xf32>
    %5 = arith.addf %3, %4 : vector<256x128xf32>
    %cst_5 = arith.constant 1.000000e-01 : f32
    %6 = vector.broadcast %cst_5 : f32 to vector<256x128xf32>
    %7 = arith.mulf %6, %5 : vector<256x128xf32>
    %8 = arith.maximumf %5, %7 : vector<256x128xf32>
    %c0_6 = arith.constant 0 : index
    %c0_7 = arith.constant 0 : index
    %9 = vector.load %arg4[%c0_6, %c0_7] : memref<128x128xbf16, #tpu.memory_space<vmem>>, vector<128x128xbf16>
    %c0_8 = arith.constant 0 : index
    %c0_9 = arith.constant 0 : index
    %10 = vector.load %arg5[%c0_8, %c0_9] : memref<1x128xf32, #tpu.memory_space<vmem>>, vector<1x128xf32>
    %11 = arith.truncf %8 : vector<256x128xf32> to vector<256x128xbf16>
    %cst_10 = arith.constant dense<0.000000e+00> : vector<256x128xf32>
    %12 = tpu.matmul %11, %9, %cst_10 {dimension_numbers = #tpu.dot_dimension_numbers<[1], [0], [0], [1], [0, 0, 1, 1], [], []>} : vector<256x128xbf16>, vector<128x128xbf16>, vector<256x128xf32> -> vector<256x128xf32>
    %13 = vector.broadcast %10 : vector<1x128xf32> to vector<256x128xf32>
    %14 = arith.addf %12, %13 : vector<256x128xf32>
    %cst_11 = arith.constant 1.000000e-01 : f32
    %15 = vector.broadcast %cst_11 : f32 to vector<256x128xf32>
    %16 = arith.mulf %15, %14 : vector<256x128xf32>
    %17 = arith.maximumf %14, %16 : vector<256x128xf32>
    %c0_12 = arith.constant 0 : index
    %c0_13 = arith.constant 0 : index
    %18 = vector.load %arg6[%c0_12, %c0_13] : memref<1x128xf32, #tpu.memory_space<vmem>>, vector<1x128xf32>
    %c0_14 = arith.constant 0 : index
    %c0_15 = arith.constant 0 : index
    %19 = vector.load %arg7[%c0_14, %c0_15] : memref<1x1xf32, #tpu.memory_space<vmem>>, vector<1x1xf32>
    %20 = vector.broadcast %18 : vector<1x128xf32> to vector<256x128xf32>
    %21 = arith.mulf %17, %20 : vector<256x128xf32>
    %cst_16 = arith.constant dense<0.000000e+00> : vector<256xf32>
    %22 = vector.multi_reduction <add>, %21, %cst_16 [1] : vector<256x128xf32> to vector<256xf32>
    %23 = vector.shape_cast %22 : vector<256xf32> to vector<256x1xf32>
    %24 = vector.broadcast %19 : vector<1x1xf32> to vector<256x1xf32>
    %25 = arith.addf %23, %24 : vector<256x1xf32>
    %c0_17 = arith.constant 0 : index
    %c0_18 = arith.constant 0 : index
    %26 = vector.load %arg8[%c0_17, %c0_18] : memref<256x1xf32, #tpu.memory_space<vmem>>, vector<256x1xf32>
    tpu.vector_store %arg8[%c0_17, %c0_18], %25 {strides = array<i32>} : memref<256x1xf32, #tpu.memory_space<vmem>>, vector<256x1xf32>,
    return
  }
  func.func @transform_0(%arg0: i32) -> (i32, i32) {
    %c0_i32 = arith.constant 0 : i32
    %c0_i32_0 = arith.constant 0 : i32
    return %arg0, %c0_i32 : i32, i32
  }
  func.func @transform_1(%arg0: i32) -> (i32, i32) {
    %c0_i32 = arith.constant 0 : i32
    %c0_i32_0 = arith.constant 0 : i32
    %c0_i32_1 = arith.constant 0 : i32
    return %c0_i32, %c0_i32_0 : i32, i32
  }
  func.func @transform_2(%arg0: i32) -> (i32, i32) {
    %c0_i32 = arith.constant 0 : i32
    %c0_i32_0 = arith.constant 0 : i32
    %c0_i32_1 = arith.constant 0 : i32
    return %c0_i32, %c0_i32_0 : i32, i32
  }
  func.func @transform_3(%arg0: i32) -> (i32, i32) {
    %c0_i32 = arith.constant 0 : i32
    %c0_i32_0 = arith.constant 0 : i32
    %c0_i32_1 = arith.constant 0 : i32
    return %c0_i32, %c0_i32_0 : i32, i32
  }
  func.func @transform_4(%arg0: i32) -> (i32, i32) {
    %c0_i32 = arith.constant 0 : i32
    %c0_i32_0 = arith.constant 0 : i32
    %c0_i32_1 = arith.constant 0 : i32
    return %c0_i32, %c0_i32_0 : i32, i32
  }
  func.func @transform_5(%arg0: i32) -> (i32, i32) {
    %c0_i32 = arith.constant 0 : i32
    %c0_i32_0 = arith.constant 0 : i32
    %c0_i32_1 = arith.constant 0 : i32
    return %c0_i32, %c0_i32_0 : i32, i32
  }
  func.func @transform_6(%arg0: i32) -> (i32, i32) {
    %c0_i32 = arith.constant 0 : i32
    %c0_i32_0 = arith.constant 0 : i32
    %c0_i32_1 = arith.constant 0 : i32
    return %c0_i32, %c0_i32_0 : i32, i32
  }
  func.func @transform_7(%arg0: i32) -> (i32, i32) {
    %c0_i32 = arith.constant 0 : i32
    %c0_i32_0 = arith.constant 0 : i32
    return %arg0, %c0_i32 : i32, i32
  }
}

</mosaic_0001>

<bundles_post_ra>
// kernel: tpu_custom_call.1
= control target key start
LH: loop header
LB: loop body
LE: loop exit
PB: predicated region body
PF: predicated region fallthrough
CT: control target
= control target key end

     0   :  { %s5755_s0 = inlined_call_operand.vmem [shape: bf16[320,32], index: 0, kind: input, shape index: {}]   ;;  %s5756_s1 = inlined_call_operand.vmem [shape: bf16[32,128], index: 1, kind: input, shape index: {}]   ;;  %s5757_s2 = inlined_call_operand.vmem [shape: f32[1,128], index: 2, kind: input, shape index: {}]   ;;  %s5758_s3 = inlined_call_operand.vmem [shape: bf16[128,128], index: 3, kind: input, shape index: {}]   ;;  %s5759_s4 = inlined_call_operand.vmem [shape: f32[1,128], index: 4, kind: input, shape index: {}]   ;;  %s5760_s5 = inlined_call_operand.vmem [shape: f32[1,128], index: 5, kind: input, shape index: {}]   ;;  %s5761_s6 = inlined_call_operand.<no memory space> [shape: f32[1,1], index: 6, kind: input, shape index: {}]   ;;  %s5762_s7 = inlined_call_operand.hbm [shape: f32[1,320], index: 7, kind: output, shape index: {}]  }
   0x1   :  { %v12_v0 = vstv %s5761_s6 }
   0x2   :  { %13 = vst [vmem:[#allocation2] sm:$0x1] %v12_v0 }
   0x3   :  { %14 = vsyncpa [#allocation4], 0 }
   0x4   :  { %16 = vsyncpa [#allocation4 + $0x1], 0  ;;  %s4563_s26 = smov 0   ;;  %s4565_s27 = smov 0  }
   0x5   :  { %s4567_s28 = smov 0   ;;  %s4569_s29 = smov 0  }
   0x6 LB: > { %s4584_s6 = sadd.s32 4294967295, %s4515_s29   ;;  %s4183_s30 = sadd.s32 4294967294, %s4515_s29   ;;  %s4515_s29 = sphi %s4569_s29, %s5768_s29   ;;  %s4511_s28 = sphi %s4567_s28, %s5767_s28   ;;  %s4507_s27 = sphi %s4565_s27, %s5766_s27   ;;  %s4503_s26 = sphi %s4563_s26, %s5765_s26  }
   0x7   : > { %s4588_s8 = sadd.s32 1, %s4515_s29   ;;  %s181_s9 = sadd.s32 1, %s4511_s28 }
   0x8   : > { %s178_s10 = ssub.s32 %s4515_s29, %s4588_s8  ;;  %p191_p0 = scmp.ne.s32.totalorder %s4511_s28, %s4507_s27 }
   0x9   : > { %p179_p1 = scmp.eq.s32.totalorder %s178_s10, 0  ;;  %p192_p2 = scmp.eq.s32.totalorder %s4584_s6, 1 }
   0xa   : > { %p197_p3 = scmp.ne.s32.totalorder %s4507_s27, %s4503_s26  ;;  %p198_p4 = scmp.eq.s32.totalorder %s4183_s30, 1 }
   0xb   : > { %s4599_s11 = scalar_select %p179_p1, %s4511_s28, %s181_s9  }
   0xc   : > { %p4601_p5 = por %p192_p2, %p191_p0  ;;  %p4605_p6 = por %p198_p4, %p197_p3 }
   0xd   : > { %p4186_p7 = scmp.ge.s32.totalorder %s4515_s29, 1  ;;  %p251_p8 = scmp.lt.s32.totalorder %s4515_s29, 3 }
   0xf   : > { %p252_p9 = pnand %p4186_p7, %p251_p8 }
  0x10   : > { %v4427_v1 = vld [vmem:[%s5756_s1] sm:$0xff] (!%p252_p9)   ;;  %s4615_s16 = sshll.u32 (!%p252_p9), %s4584_s6, 5  ;;  %v4428_v2 = vld [vmem:[%s5756_s1 + $0x8] sm:$0xff] (!%p252_p9)   ;;  %vm442_vm0 = vcmask (!%p252_p9), 261120   ;;  %v4447_v5 = vld [vmem:[%s5758_s3 + $0x10] sm:$0xff] (!%p252_p9)   ;;  %v4517_v28 = vmov (!%p252_p9), 0  }
  0x11   : > { %255 = sbr.rel (%p252_p9) target bundleno = 966 (0x3c6), region = 48  ;;  %p292_p10 = scmp.lt.s32.totalorder (!%p252_p9), %s4615_s16, 39  ;;  %4285 = vmatprep.subr.bf16.mxu0 (!%p252_p9), %v4427_v1  ;;  %v4445_v3 = vld [vmem:[%s5758_s3] sm:$0xff] (!%p252_p9)   ;;  %v4446_v4 = vld [vmem:[%s5758_s3 + $0x8] sm:$0xff] (!%p252_p9)   ;;  %v4448_v9 = vld [vmem:[%s5758_s3 + $0x18] sm:$0xff] (!%p252_p9)   ;;  %4425 = vset.pattern.permute.xlu1 (!%p252_p9), %v4517_v28  ;;  %vm3904_vm1 = vcmask (!%p252_p9), 130112  }
  0x12   : > { %4286 = vmatpush3.bf16.msra.mxu0 (!%p252_p9), %v4427_v1  ;;  %4369 = vmatprep.subr.bf16.mxu1 (!%p252_p9), %v4445_v3  ;;  %v4449_v12 = vld [vmem:[%s5758_s3 + $0x20] sm:$0xff] (!%p252_p9)   ;;  %v4450_v15 = vld [vmem:[%s5758_s3 + $0x28] sm:$0xff] (!%p252_p9)   ;;  %v4451_v16 = vld [vmem:[%s5758_s3 + $0x30] sm:$0xff] (!%p252_p9)   ;;  %s284_s18 = sand.u32 (!%p252_p9), 1, %s4507_s27   ;;  %vm3911_vm2 = vcmask (!%p252_p9), 195712   ;;  %vm3918_vm3 = vcmask (!%p252_p9), 261312  }
  0x13   : > { %4287 = vmatprep.subr.bf16.mxu0 (!%p252_p9), %v4428_v2  ;;  %4377 = vmatpush3.bf16.msra.mxu1 (!%p252_p9), %v4445_v3  ;;  %v4452_v26 = vld [vmem:[%s5758_s3 + $0x38] sm:$0xff] (!%p252_p9)   ;;  %v1029_v27 = vld [vmem:[#allocation2] sm:$0x1] (!%p252_p9)  ;;  %vm3925_vm4 = vcmask (!%p252_p9), 326912   ;;  %vm3932_vm5 = vcmask (!%p252_p9), 392512   ;;  %vm3939_vm6 = vcmask (!%p252_p9), 458112  }
  0x14   : > { %4370 = vmatprep.subr.bf16.mxu1 (!%p252_p9), %v4446_v4  ;;  %4426 = vset.pattern.permute.xlu0 (!%p252_p9), %v4517_v28  ;;  %v4686_v29 = vld [vmem:[%s5757_s2] ss:$0 sm:$0xff] (!%p252_p9)  ;;  %vm3946_vm7 = vcmask (!%p252_p9), 523712   ;;  %vm3953_vm8 = vcmask (!%p252_p9), 589312   ;;  %vm3960_vm9 = vcmask (!%p252_p9), 654912   ;;  %vm3967_vm10 = vcmask (!%p252_p9), 720512  }
  0x15   : > { %1134 = vperm.xlu1 (!%p252_p9), %4425, %v1029_v27   ;;  %vm3974_vm11 = vcmask (!%p252_p9), 786112   ;;  %vm3981_vm12 = vcmask (!%p252_p9), 851712   ;;  %vm3988_vm13 = vcmask (!%p252_p9), 917312   ;;  %vm3995_vm14 = vcmask (!%p252_p9), 982912   ;;  %s4187_s19 = sshll.u32 (!%p252_p9), %s284_s18, 1 }
  0x16   : > { %4288 = vmatpush3.bf16.msra.mxu0 (!%p252_p9), %v4428_v2  ;;  %vm4002_vm15 = vcmask (!%p252_p9), 1048512   ;;  %s286_s20 = scalar_lea.vmem (!%p252_p9), [#allocation3], %s4187_s19 }
  0x17   : > { %4321 = vmatprep.subr.bf16.mxu0 (!%p252_p9), %v4445_v3  ;;  %4378 = vmatpush3.bf16.msra.mxu1 (!%p252_p9), %v4446_v4 }
  0x18   : > { %s293_s21 = scalar_select %p292_p10, %s4615_s16, 39  ;;  %4371 = vmatprep.subr.bf16.mxu1 %v4447_v5 }
  0x19   : > { %s4236_s22 = sshll.u32 (%p4601_p5), %s4584_s6, 1 }
  0x1a   : > { %s4189_s24 = sshll.u32 %s293_s21, 2  ;;  %s5701_s21 = scalar_lea.sflag [#allocation4], %s284_s18 }
  0x1b   : > { %s4631_s9 = scalar_lea.vmem %s5755_s0, %s4189_s24  ;;  %4379 = vmatpush3.bf16.msra.mxu1 %v4447_v5  ;;  %s4113_s23 = ssub.s32 (%p4601_p5), 3, %s4236_s22 }
  0x1c   : > { %v4429_v6 = vld [vmem:[%s4631_s9] sm:$0xff]   ;;  %v4430_v7 = vld [vmem:[%s4631_s9 + $0x8] sm:$0xff]   ;;  %v4431_v8 = vld [vmem:[%s4631_s9 + $0x10] sm:$0xff]   ;;  %4372 = vmatprep.subr.bf16.mxu1 %v4448_v9  ;;  %p4114_p11 = scmp.lt.s32.totalorder (%p4601_p5), %s4113_s23, 2 }
  0x1d   : > { %4289 = vmatprep.mubr.msk.bf16.mxu0 %vm442_vm0, %v4429_v6  ;;  %v4432_v10 = vld [vmem:[%s4631_s9 + $0x18] sm:$0xff]   ;;  %v4433_v11 = vld [vmem:[%s4631_s9 + $0x20] sm:$0xff]   ;;  %v4434_v13 = vld [vmem:[%s4631_s9 + $0x28] sm:$0xff]  }
  0x1e   : > { %4290 = vmatmul.mubr.msk.bf16.vlgmr.msra.gmra.mrb[0].mxu0 %vm442_vm0, %v4430_v7  ;;  %v4435_v14 = vld [vmem:[%s4631_s9 + $0x30] sm:$0xff]   ;;  %v4436_v17 = vld [vmem:[%s4631_s9 + $0x38] sm:$0xff]   ;;  %v4437_v18 = vld [vmem:[%s4631_s9 + $0x40] sm:$0xff]  }
  0x1f   : > { %4293 = vmatprep.mubr.msk.bf16.mxu0 %vm442_vm0, %v4431_v8  ;;  %4322 = vmatpush3.bf16.msra.mxu0 %v4445_v3  ;;  %v4438_v19 = vld [vmem:[%s4631_s9 + $0x48] sm:$0xff]   ;;  %v4439_v20 = vld [vmem:[%s4631_s9 + $0x50] sm:$0xff]   ;;  %v4440_v21 = vld [vmem:[%s4631_s9 + $0x58] sm:$0xff]  }
  0x20   : > { %4323 = vmatprep.subr.bf16.mxu0 %v4446_v4  ;;  %4380 = vmatpush3.bf16.msra.mxu1 %v4448_v9  ;;  %v4441_v22 = vld [vmem:[%s4631_s9 + $0x60] sm:$0xff]   ;;  %v4442_v23 = vld [vmem:[%s4631_s9 + $0x68] sm:$0xff]   ;;  %v4443_v24 = vld [vmem:[%s4631_s9 + $0x70] sm:$0xff]  }
  0x21   : > { %4373 = vmatprep.subr.bf16.mxu1 %v4449_v12  ;;  %v4444_v25 = vld [vmem:[%s4631_s9 + $0x78] sm:$0xff]  }
  0x23   : > { %4324 = vmatpush3.bf16.msra.mxu0 %v4446_v4 }
  0x24   : > { %4325 = vmatprep.subr.bf16.mxu0 %v4447_v5  ;;  %4381 = vmatpush3.bf16.msra.mxu1 %v4449_v12 }
  0x25   : > { %4374 = vmatprep.subr.bf16.mxu1 %v4450_v15 }
  0x26   : > { %4294 = vmatmul.mubr.msk.bf16.gmra.mrb[4].mxu0 %vm442_vm0, %v4432_v10 }
  0x27   : > { %4297 = vmatprep.mubr.msk.bf16.mxu0 %vm442_vm0, %v4433_v11  ;;  %4326 = vmatpush3.bf16.msra.mxu0 %v4447_v5 }
  0x28   : > { %4327 = vmatprep.subr.bf16.mxu0 %v4448_v9  ;;  %4382 = vmatpush3.bf16.msra.mxu1 %v4450_v15 }
  0x29   : > { %4375 = vmatprep.subr.bf16.mxu1 %v4451_v16 }
  0x2b   : > { %4328 = vmatpush3.bf16.msra.mxu0 %v4448_v9 }
  0x2c   : > { %4329 = vmatprep.subr.bf16.mxu0 %v4449_v12  ;;  %4383 = vmatpush3.bf16.msra.mxu1 %v4451_v16 }
  0x2d   : > { %4376 = vmatprep.subr.bf16.mxu1 %v4452_v26 }
  0x2e   : > { %4298 = vmatmul.mubr.msk.bf16.gmra.mrb[8].mxu0 %vm442_vm0, %v4434_v13 }
  0x2f   : > { %4301 = vmatprep.mubr.msk.bf16.mxu0 %vm442_vm0, %v4435_v14  ;;  %4330 = vmatpush3.bf16.msra.mxu0 %v4449_v12 }
  0x30   : > { %4331 = vmatprep.subr.bf16.mxu0 %v4450_v15  ;;  %4384 = vmatpush3.bf16.msra.mxu1 %v4452_v26 }
  0x33   : > { %4332 = vmatpush3.bf16.msra.mxu0 %v4450_v15 }
  0x34   : > { %4333 = vmatprep.subr.bf16.mxu0 %v4451_v16 }
  0x36   : > { %4302 = vmatmul.mubr.msk.bf16.gmra.mrb[12].mxu0 %vm442_vm0, %v4436_v17 }
  0x37   : > { %4305 = vmatprep.mubr.msk.bf16.mxu0 %vm442_vm0, %v4437_v18  ;;  %4334 = vmatpush3.bf16.msra.mxu0 %v4451_v16 }
  0x38   : > { %4335 = vmatprep.subr.bf16.mxu0 %v4452_v26 }
  0x3b   : > { %4336 = vmatpush3.bf16.msra.mxu0 %v4452_v26 }
  0x3e   : > { %4306 = vmatmul.mubr.msk.bf16.gmra.mrb[16].mxu0 %vm442_vm0, %v4438_v19 }
  0x3f   : > { %4309 = vmatprep.mubr.msk.bf16.mxu0 %vm442_vm0, %v4439_v20 }
  0x46   : > { %4310 = vmatmul.mubr.msk.bf16.gmra.mrb[20].mxu0 %vm442_vm0, %v4440_v21 }
  0x47   : > { %4313 = vmatprep.mubr.msk.bf16.mxu0 %vm442_vm0, %v4441_v22 }
  0x4e   : > { %4314 = vmatmul.mubr.msk.bf16.gmra.mrb[24].mxu0 %vm442_vm0, %v4442_v23 }
  0x4f   : > { %4317 = vmatprep.mubr.msk.bf16.mxu0 %vm442_vm0, %v4443_v24 }
  0x56   : > { %4318 = vmatmul.mubr.msk.bf16.gmra.mrb[28].mxu0 %vm442_vm0, %v4444_v25 }
  0xf1   : > { %v4291_v30 = vpop.f32.mrb[0].mxu0 }
  0xf2   : > { %v534_v31 = vadd.f32 %v4291_v30, %v4686_v29  ;;  %v525_v32 = vpop.f32.mrb[1].mxu0 }
  0xf3   : > { %v526_v33 = vadd.f32 %v4686_v29, %v525_v32  ;;  %v4292_v34 = vpop.f32.mrb[2].mxu0 }
  0xf4   : > { %v654_v35 = vmul.f32 0.1, %v534_v31  ;;  %v537_v36 = vadd.f32 %v4292_v34, %v4686_v29  ;;  %v528_v37 = vpop.f32.mrb[3].mxu0 }
  0xf5   : > { %v652_v38 = vmul.f32 0.1, %v526_v33  ;;  %v529_v39 = vadd.f32 %v4686_v29, %v528_v37 }
  0xf6   : > { %v655_v40 = vmul.f32 0.1, %v537_v36  ;;  %v686_v42 = vmax.f32 %v534_v31, %v654_v35 }
  0xf7   : > { %v653_v41 = vmul.f32 0.1, %v529_v39  ;;  %v684_v44 = vmax.f32 %v526_v33, %v652_v38 }
  0xf8   : > { %v687_v43 = vmax.f32 %v537_v36, %v655_v40 }
  0xf9   : > { %v685_v45 = vmax.f32 %v529_v39, %v653_v41  ;;  %v4295_v46 = vpop.f32.mrb[4].mxu0 }
  0xfa   : > { %v734_v47 = vpack.c.bf16 %v687_v43, %v686_v42  ;;  %v550_v48 = vadd.f32 %v4295_v46, %v4686_v29  ;;  %v541_v49 = vpop.f32.mrb[5].mxu0 }
  0xfb   : > { %v542_v50 = vadd.f32 %v4686_v29, %v541_v49  ;;  %v4296_v51 = vpop.f32.mrb[6].mxu0  ;;  %v733_v52 = vpack.c.bf16 %v685_v45, %v684_v44 }
  0xfc   : > { %v658_v53 = vmul.f32 0.1, %v550_v48  ;;  %v553_v54 = vadd.f32 %v4296_v51, %v4686_v29  ;;  %v544_v55 = vpop.f32.mrb[7].mxu0 }
  0xfd   : > { %v656_v56 = vmul.f32 0.1, %v542_v50  ;;  %v545_v57 = vadd.f32 %v4686_v29, %v544_v55  ;;  %4337 = vmatprep.mubr.bf16.mxu0 %v733_v52 }
  0xfe   : > { %v659_v58 = vmul.f32 0.1, %v553_v54  ;;  %4338 = vmatmul.mubr.bf16.vlgmr.msra.gmra.mrb[32].mxu0 %v734_v47  ;;  %v690_v60 = vmax.f32 %v550_v48, %v658_v53 }
  0xff   : > { %v657_v59 = vmul.f32 0.1, %v545_v57  ;;  %v688_v63 = vmax.f32 %v542_v50, %v656_v56 }
 0x100   : > { %v691_v61 = vmax.f32 %v553_v54, %v659_v58 }
 0x101   : > { %v4299_v62 = vpop.f32.mrb[8].mxu0  ;;  %v689_v0 = vmax.f32 %v545_v57, %v657_v59 }
 0x102   : > { %v566_v1 = vadd.f32 %v4299_v62, %v4686_v29  ;;  %v557_v2 = vpop.f32.mrb[9].mxu0  ;;  %v736_v3 = vpack.c.bf16 %v691_v61, %v690_v60 }
 0x103   : > { %v558_v4 = vadd.f32 %v4686_v29, %v557_v2  ;;  %v4300_v5 = vpop.f32.mrb[10].mxu0  ;;  %v735_v6 = vpack.c.bf16 %v689_v0, %v688_v63 }
 0x104   : > { %v662_v7 = vmul.f32 0.1, %v566_v1  ;;  %v569_v8 = vadd.f32 %v4300_v5, %v4686_v29  ;;  %v560_v9 = vpop.f32.mrb[11].mxu0 }
 0x105   : > { %v660_v10 = vmul.f32 0.1, %v558_v4  ;;  %v561_v11 = vadd.f32 %v4686_v29, %v560_v9  ;;  %4341 = vmatprep.mubr.bf16.mxu1 %v735_v6 }
 0x106   : > { %v663_v12 = vmul.f32 0.1, %v569_v8  ;;  %4342 = vmatmul.mubr.bf16.vlgmr.msra.gmra.mrb[0].mxu1 %v736_v3  ;;  %v694_v14 = vmax.f32 %v566_v1, %v662_v7 }
 0x107   : > { %v661_v13 = vmul.f32 0.1, %v561_v11  ;;  %v692_v16 = vmax.f32 %v558_v4, %v660_v10 }
 0x108   : > { %v695_v15 = vmax.f32 %v569_v8, %v663_v12 }
 0x109   : > { %v693_v17 = vmax.f32 %v561_v11, %v661_v13  ;;  %v4303_v18 = vpop.f32.mrb[12].mxu0 }
 0x10a   : > { %v582_v19 = vadd.f32 %v4303_v18, %v4686_v29  ;;  %v573_v20 = vpop.f32.mrb[13].mxu0  ;;  %v738_v21 = vpack.c.bf16 %v695_v15, %v694_v14 }
 0x10b   : > { %v574_v22 = vadd.f32 %v4686_v29, %v573_v20  ;;  %v4304_v23 = vpop.f32.mrb[14].mxu0  ;;  %v737_v24 = vpack.c.bf16 %v693_v17, %v692_v16 }
 0x10c   : > { %v666_v25 = vmul.f32 0.1, %v582_v19  ;;  %v585_v26 = vadd.f32 %v4304_v23, %v4686_v29  ;;  %v576_v27 = vpop.f32.mrb[15].mxu0 }
 0x10d   : > { %v664_v28 = vmul.f32 0.1, %v574_v22  ;;  %v577_v30 = vadd.f32 %v4686_v29, %v576_v27  ;;  %4345 = vmatprep.mubr.bf16.mxu1 %v737_v24 }
 0x10e   : > { %v667_v31 = vmul.f32 0.1, %v585_v26  ;;  %4346 = vmatmul.mubr.bf16.gmra.mrb[4].mxu1 %v738_v21  ;;  %v698_v33 = vmax.f32 %v582_v19, %v666_v25 }
 0x10f   : > { %v665_v32 = vmul.f32 0.1, %v577_v30  ;;  %v696_v35 = vmax.f32 %v574_v22, %v664_v28 }
 0x110   : > { %v699_v34 = vmax.f32 %v585_v26, %v667_v31 }
 0x111   : > { %v697_v36 = vmax.f32 %v577_v30, %v665_v32  ;;  %v4307_v37 = vpop.f32.mrb[16].mxu0 }
 0x112   : > { %v598_v38 = vadd.f32 %v4307_v37, %v4686_v29  ;;  %v589_v39 = vpop.f32.mrb[17].mxu0  ;;  %v740_v40 = vpack.c.bf16 %v699_v34, %v698_v33 }
 0x113   : > { %v590_v41 = vadd.f32 %v4686_v29, %v589_v39  ;;  %v4308_v42 = vpop.f32.mrb[18].mxu0  ;;  %v739_v43 = vpack.c.bf16 %v697_v36, %v696_v35 }
 0x114   : > { %v670_v44 = vmul.f32 0.1, %v598_v38  ;;  %v601_v45 = vadd.f32 %v4308_v42, %v4686_v29  ;;  %v592_v46 = vpop.f32.mrb[19].mxu0 }
 0x115   : > { %v668_v47 = vmul.f32 0.1, %v590_v41  ;;  %v593_v48 = vadd.f32 %v4686_v29, %v592_v46  ;;  %4349 = vmatprep.mubr.bf16.mxu1 %v739_v43 }
 0x116   : > { %v671_v49 = vmul.f32 0.1, %v601_v45  ;;  %4350 = vmatmul.mubr.bf16.gmra.mrb[8].mxu1 %v740_v40  ;;  %v702_v51 = vmax.f32 %v598_v38, %v670_v44 }
 0x117   : > { %v669_v50 = vmul.f32 0.1, %v593_v48  ;;  %v700_v53 = vmax.f32 %v590_v41, %v668_v47 }
 0x118   : > { %v703_v52 = vmax.f32 %v601_v45, %v671_v49 }
 0x119   : > { %v701_v54 = vmax.f32 %v593_v48, %v669_v50  ;;  %v4311_v55 = vpop.f32.mrb[20].mxu0  ;;  %v4723_v48 = vld [vmem:[%s5759_s4] ss:$0 sm:$0xff] }
 0x11a   : > { %v614_v56 = vadd.f32 %v4311_v55, %v4686_v29  ;;  %v605_v57 = vpop.f32.mrb[21].mxu0  ;;  %v742_v58 = vpack.c.bf16 %v703_v52, %v702_v51 }
 0x11b   : > { %v606_v59 = vadd.f32 %v4686_v29, %v605_v57  ;;  %v4312_v60 = vpop.f32.mrb[22].mxu0  ;;  %v741_v61 = vpack.c.bf16 %v701_v54, %v700_v53 }
 0x11c   : > { %v674_v62 = vmul.f32 0.1, %v614_v56  ;;  %v617_v63 = vadd.f32 %v4312_v60, %v4686_v29  ;;  %v608_v0 = vpop.f32.mrb[23].mxu0 }
 0x11d   : > { %v672_v1 = vmul.f32 0.1, %v606_v59  ;;  %v609_v2 = vadd.f32 %v4686_v29, %v608_v0  ;;  %4353 = vmatprep.mubr.bf16.mxu1 %v741_v61 }
 0x11e   : > { %v675_v3 = vmul.f32 0.1, %v617_v63  ;;  %4354 = vmatmul.mubr.bf16.gmra.mrb[12].mxu1 %v742_v58  ;;  %v706_v5 = vmax.f32 %v614_v56, %v674_v62  ;;  %v4732_v58 = vld [vmem:[%s5760_s5] ss:$0 sm:$0xff] }
 0x11f   : > { %v673_v4 = vmul.f32 0.1, %v609_v2  ;;  %v704_v7 = vmax.f32 %v606_v59, %v672_v1 }
 0x120   : > { %v707_v6 = vmax.f32 %v617_v63, %v675_v3 }
 0x121   : > { %v705_v8 = vmax.f32 %v609_v2, %v673_v4  ;;  %v4315_v9 = vpop.f32.mrb[24].mxu0 }
 0x122   : > { %v630_v10 = vadd.f32 %v4315_v9, %v4686_v29  ;;  %v621_v11 = vpop.f32.mrb[25].mxu0  ;;  %v744_v12 = vpack.c.bf16 %v707_v6, %v706_v5 }
 0x123   : > { %v622_v13 = vadd.f32 %v4686_v29, %v621_v11  ;;  %v4316_v14 = vpop.f32.mrb[26].mxu0  ;;  %v743_v15 = vpack.c.bf16 %v705_v8, %v704_v7 }
 0x124   : > { %v678_v16 = vmul.f32 0.1, %v630_v10  ;;  %v633_v17 = vadd.f32 %v4316_v14, %v4686_v29  ;;  %v624_v18 = vpop.f32.mrb[27].mxu0 }
 0x125   : > { %v676_v19 = vmul.f32 0.1, %v622_v13  ;;  %v625_v20 = vadd.f32 %v4686_v29, %v624_v18  ;;  %4357 = vmatprep.mubr.bf16.mxu1 %v743_v15 }
 0x126   : > { %v710_v21 = vmax.f32 %v630_v10, %v678_v16  ;;  %v679_v22 = vmul.f32 0.1, %v633_v17  ;;  %4358 = vmatmul.mubr.bf16.gmra.mrb[16].mxu1 %v744_v12 }
 0x127   : > { %v708_v23 = vmax.f32 %v622_v13, %v676_v19  ;;  %v677_v24 = vmul.f32 0.1, %v625_v20 }
 0x128   : > { %v711_v25 = vmax.f32 %v633_v17, %v679_v22 }
 0x129   : > { %v709_v26 = vmax.f32 %v625_v20, %v677_v24  ;;  %v4319_v27 = vpop.f32.mrb[28].mxu0 }
 0x12a   : > { %v746_v28 = vpack.c.bf16 %v711_v25, %v710_v21  ;;  %v646_v30 = vadd.f32 %v4319_v27, %v4686_v29  ;;  %v637_v31 = vpop.f32.mrb[29].mxu0 }
 0x12b   : > { %v745_v32 = vpack.c.bf16 %v709_v26, %v708_v23  ;;  %v638_v33 = vadd.f32 %v4686_v29, %v637_v31  ;;  %v4320_v34 = vpop.f32.mrb[30].mxu0 }
 0x12c   : > { %v682_v35 = vmul.f32 0.1, %v646_v30  ;;  %v649_v36 = vadd.f32 %v4320_v34, %v4686_v29  ;;  %v640_v37 = vpop.f32.mrb[31].mxu0 }
 0x12d   : > { %4361 = vmatprep.mubr.bf16.mxu1 %v745_v32  ;;  %v680_v38 = vmul.f32 0.1, %v638_v33  ;;  %v641_v39 = vadd.f32 %v4686_v29, %v640_v37 }
 0x12e   : > { %4362 = vmatmul.mubr.bf16.gmra.mrb[20].mxu1 %v746_v28  ;;  %v714_v40 = vmax.f32 %v646_v30, %v682_v35  ;;  %v683_v41 = vmul.f32 0.1, %v649_v36 }
 0x12f   : > { %v712_v42 = vmax.f32 %v638_v33, %v680_v38  ;;  %v681_v43 = vmul.f32 0.1, %v641_v39 }
 0x130   : > { %v715_v44 = vmax.f32 %v649_v36, %v683_v41 }
 0x131   : > { %v713_v45 = vmax.f32 %v641_v39, %v681_v43 }
 0x132   : > { %v748_v46 = vpack.c.bf16 %v715_v44, %v714_v40 }
 0x133   : > { %v747_v47 = vpack.c.bf16 %v713_v45, %v712_v42 }
 0x135   : > { %4365 = vmatprep.mubr.bf16.mxu1 %v747_v47 }
 0x136   : > { %4366 = vmatmul.mubr.bf16.gmra.mrb[24].mxu1 %v748_v46 }
 0x1d1   : > { %v4339_v49 = vpop.f32.mrb[32].mxu0 }
 0x1d2   : > { %v846_v50 = vadd.f32 %v4339_v49, %v4723_v48  ;;  %v837_v29 = vpop.f32.mrb[33].mxu0 }
 0x1d3   : > { %v838_v51 = vadd.f32 %v4723_v48, %v837_v29  ;;  %v4340_v52 = vpop.f32.mrb[34].mxu0 }
 0x1d4   : > { %v966_v53 = vmul.f32 0.1, %v846_v50  ;;  %v849_v54 = vadd.f32 %v4340_v52, %v4723_v48  ;;  %v840_v55 = vpop.f32.mrb[35].mxu0 }
 0x1d5   : > { %v964_v56 = vmul.f32 0.1, %v838_v51  ;;  %v841_v57 = vadd.f32 %v4723_v48, %v840_v55 }
 0x1d6   : > { %v998_v59 = vmax.f32 %v846_v50, %v966_v53  ;;  %v967_v60 = vmul.f32 0.1, %v849_v54 }
 0x1d7   : > { %v965_v61 = vmul.f32 0.1, %v841_v57  ;;  %v996_v62 = vmax.f32 %v838_v51, %v964_v56 }
 0x1d8   : > { %v999_v63 = vmax.f32 %v849_v54, %v967_v60  ;;  %v1038_v0 = vmul.f32 %v4732_v58, %v998_v59 }
 0x1d9   : > { %v997_v1 = vmax.f32 %v841_v57, %v965_v61  ;;  %v4343_v2 = vpop.f32.mrb[0].mxu1  ;;  %v1036_v3 = vmul.f32 %v4732_v58, %v996_v62 }
 0x1da   : > { %v862_v4 = vadd.f32 %v4343_v2, %v4723_v48  ;;  %v853_v5 = vpop.f32.mrb[1].mxu1  ;;  %1072 = vadd.xlane.f32.xlu1 %v1038_v0  ;;  %v1039_v11 = vmul.f32 %v4732_v58, %v999_v63 }
 0x1db   : > { %v854_v6 = vadd.f32 %v4723_v48, %v853_v5  ;;  %v4344_v7 = vpop.f32.mrb[2].mxu1  ;;  %1068 = vadd.xlane.f32.xlu0 %v1036_v3  ;;  %v1037_v14 = vmul.f32 %v4732_v58, %v997_v1 }
 0x1dc   : > { %v970_v8 = vmul.f32 0.1, %v862_v4  ;;  %v865_v9 = vadd.f32 %v4344_v7, %v4723_v48  ;;  %v856_v10 = vpop.f32.mrb[3].mxu1 }
 0x1dd   : > { %v968_v12 = vmul.f32 0.1, %v854_v6  ;;  %v857_v13 = vadd.f32 %v4723_v48, %v856_v10 }
 0x1de   : > { %v1002_v15 = vmax.f32 %v862_v4, %v970_v8  ;;  %v971_v16 = vmul.f32 0.1, %v865_v9  ;;  %1074 = vadd.xlane.f32.xlu1 %v1039_v11 }
 0x1df   : > { %v969_v17 = vmul.f32 0.1, %v857_v13  ;;  %1070 = vadd.xlane.f32.xlu0 %v1037_v14  ;;  %v1000_v20 = vmax.f32 %v854_v6, %v968_v12 }
 0x1e0   : > { %v1003_v18 = vmax.f32 %v865_v9, %v971_v16  ;;  %v1042_v19 = vmul.f32 %v4732_v58, %v1002_v15 }
 0x1e1   : > { %v4347_v21 = vpop.f32.mrb[4].mxu1  ;;  %v1001_v22 = vmax.f32 %v857_v13, %v969_v17  ;;  %v1040_v34 = vmul.f32 %v4732_v58, %v1000_v20 }
 0x1e2   : > { %v878_v23 = vadd.f32 %v4347_v21, %v4723_v48  ;;  %v869_v24 = vpop.f32.mrb[5].mxu1  ;;  %v1043_v25 = vmul.f32 %v4732_v58, %v1003_v18 }
 0x1e3   : > { %v870_v26 = vadd.f32 %v4723_v48, %v869_v24  ;;  %v4348_v27 = vpop.f32.mrb[6].mxu1  ;;  %1080 = vadd.xlane.f32.xlu0 %v1042_v19  ;;  %v1041_v37 = vmul.f32 %v4732_v58, %v1001_v22 }
 0x1e4   : > { %v974_v28 = vmul.f32 0.1, %v878_v23  ;;  %v881_v30 = vadd.f32 %v4348_v27, %v4723_v48  ;;  %v872_v31 = vpop.f32.mrb[7].mxu1  ;;  %1082 = vadd.xlane.f32.xlu1 %v1043_v25 }
 0x1e5   : > { %v972_v32 = vmul.f32 0.1, %v870_v26  ;;  %v873_v33 = vadd.f32 %v4723_v48, %v872_v31 }
 0x1e6   : > { %v1006_v35 = vmax.f32 %v878_v23, %v974_v28  ;;  %v975_v36 = vmul.f32 0.1, %v881_v30 }
 0x1e7   : > { %v973_v38 = vmul.f32 0.1, %v873_v33  ;;  %1076 = vadd.xlane.f32.xlu0 %v1040_v34  ;;  %v1004_v41 = vmax.f32 %v870_v26, %v972_v32 }
 0x1e8   : > { %v1007_v39 = vmax.f32 %v881_v30, %v975_v36  ;;  %1078 = vadd.xlane.f32.xlu1 %v1041_v37  ;;  %v1046_v40 = vmul.f32 %v4732_v58, %v1006_v35 }
 0x1e9   : > { %v4351_v42 = vpop.f32.mrb[8].mxu1  ;;  %v1005_v43 = vmax.f32 %v873_v33, %v973_v38  ;;  %v1044_v54 = vmul.f32 %v4732_v58, %v1004_v41 }
 0x1ea   : > { %v894_v44 = vadd.f32 %v4351_v42, %v4723_v48  ;;  %v885_v45 = vpop.f32.mrb[9].mxu1  ;;  %v1047_v46 = vmul.f32 %v4732_v58, %v1007_v39 }
 0x1eb   : > { %v886_v47 = vadd.f32 %v4723_v48, %v885_v45  ;;  %v4352_v49 = vpop.f32.mrb[10].mxu1  ;;  %1088 = vadd.xlane.f32.xlu0 %v1046_v40  ;;  %v1045_v57 = vmul.f32 %v4732_v58, %v1005_v43 }
 0x1ec   : > { %v978_v50 = vmul.f32 0.1, %v894_v44  ;;  %v897_v29 = vadd.f32 %v4352_v49, %v4723_v48  ;;  %v888_v51 = vpop.f32.mrb[11].mxu1  ;;  %1090 = vadd.xlane.f32.xlu1 %v1047_v46 }
 0x1ed   : > { %v976_v52 = vmul.f32 0.1, %v886_v47  ;;  %v889_v53 = vadd.f32 %v4723_v48, %v888_v51 }
 0x1ee   : > { %v1010_v55 = vmax.f32 %v894_v44, %v978_v50  ;;  %v979_v56 = vmul.f32 0.1, %v897_v29 }
 0x1ef   : > { %v977_v59 = vmul.f32 0.1, %v889_v53  ;;  %1084 = vadd.xlane.f32.xlu0 %v1044_v54  ;;  %v1008_v62 = vmax.f32 %v886_v47, %v976_v52 }
 0x1f0   : > { %v1011_v60 = vmax.f32 %v897_v29, %v979_v56  ;;  %1086 = vadd.xlane.f32.xlu1 %v1045_v57  ;;  %v1050_v61 = vmul.f32 %v4732_v58, %v1010_v55 }
 0x1f1   : > { %v4355_v63 = vpop.f32.mrb[12].mxu1  ;;  %v1009_v0 = vmax.f32 %v889_v53, %v977_v59  ;;  %v1048_v11 = vmul.f32 %v4732_v58, %v1008_v62 }
 0x1f2   : > { %v910_v1 = vadd.f32 %v4355_v63, %v4723_v48  ;;  %v901_v2 = vpop.f32.mrb[13].mxu1  ;;  %v1051_v3 = vmul.f32 %v4732_v58, %v1011_v60 }
 0x1f3   : > { %v902_v4 = vadd.f32 %v4723_v48, %v901_v2  ;;  %v4356_v5 = vpop.f32.mrb[14].mxu1  ;;  %1096 = vadd.xlane.f32.xlu0 %v1050_v61  ;;  %v1049_v14 = vmul.f32 %v4732_v58, %v1009_v0 }
 0x1f4   : > { %v982_v6 = vmul.f32 0.1, %v910_v1  ;;  %v913_v7 = vadd.f32 %v4356_v5, %v4723_v48  ;;  %v904_v8 = vpop.f32.mrb[15].mxu1  ;;  %1098 = vadd.xlane.f32.xlu1 %v1051_v3 }
 0x1f5   : > { %v980_v9 = vmul.f32 0.1, %v902_v4  ;;  %v905_v10 = vadd.f32 %v4723_v48, %v904_v8 }
 0x1f6   : > { %v1014_v12 = vmax.f32 %v910_v1, %v982_v6  ;;  %v983_v13 = vmul.f32 0.1, %v913_v7 }
 0x1f7   : > { %v981_v15 = vmul.f32 0.1, %v905_v10  ;;  %1092 = vadd.xlane.f32.xlu0 %v1048_v11  ;;  %v1012_v18 = vmax.f32 %v902_v4, %v980_v9 }
 0x1f8   : > { %v1015_v16 = vmax.f32 %v913_v7, %v983_v13  ;;  %1094 = vadd.xlane.f32.xlu1 %v1049_v14  ;;  %v1054_v17 = vmul.f32 %v4732_v58, %v1014_v12 }
 0x1f9   : > { %v4359_v19 = vpop.f32.mrb[16].mxu1  ;;  %v1013_v20 = vmax.f32 %v905_v10, %v981_v15  ;;  %v1052_v32 = vmul.f32 %v4732_v58, %v1012_v18 }
 0x1fa   : > { %v926_v21 = vadd.f32 %v4359_v19, %v4723_v48  ;;  %v917_v22 = vpop.f32.mrb[17].mxu1  ;;  %v1055_v23 = vmul.f32 %v4732_v58, %v1015_v16 }
 0x1fb   : > { %v918_v24 = vadd.f32 %v4723_v48, %v917_v22  ;;  %v4360_v25 = vpop.f32.mrb[18].mxu1  ;;  %1104 = vadd.xlane.f32.xlu0 %v1054_v17  ;;  %v1053_v34 = vmul.f32 %v4732_v58, %v1013_v20  ;;  %v1137_v20 = vlaneseq  ;;  %v4518_v22 = vmov 1966171168  }
 0x1fc   : > { %v986_v26 = vmul.f32 0.1, %v926_v21  ;;  %v920_v27 = vpop.f32.mrb[19].mxu1  ;;  %1106 = vadd.xlane.f32.xlu1 %v1055_v23  ;;  %v929_v30 = vadd.f32 %v4360_v25, %v4723_v48  ;;  %v2234_v23 = vunpack.c.l.s4 %v4518_v22  ;;  %v1135_v25 = vpop.permute.xlu1 %1134 }
 0x1fd   : > { %v984_v28 = vmul.f32 0.1, %v918_v24  ;;  %v921_v31 = vadd.f32 %v4723_v48, %v920_v27  ;;  %vm4101_vm0 = vcmp.lt.s32.totalorder %v1137_v20, 256 }
 0x1fe   : > { %v1018_v33 = vmax.f32 %v926_v21, %v986_v26  ;;  %v987_v38 = vmul.f32 0.1, %v929_v30  ;;  %v4795_v21 = vshrl.u32 %v1137_v20, 7  ;;  %v2235_v26 = vunpack.c.0.s8 %v2234_v23 }
 0x1ff   : > { %v985_v35 = vmul.f32 0.1, %v921_v31  ;;  %1100 = vadd.xlane.f32.xlu0 %v1052_v32  ;;  %v1016_v37 = vmax.f32 %v918_v24, %v984_v28 }
 0x200   : > { %1102 = vadd.xlane.f32.xlu1 %v1053_v34  ;;  %v1058_v36 = vmul.f32 %v4732_v58, %v1018_v33  ;;  %v1019_v49 = vmax.f32 %v929_v30, %v987_v38  ;;  %v4798_v24 = vsub.s32 0, %v4795_v21  ;;  %v4807_v28 = vsub.s32 2, %v4795_v21 }
 0x201   : > { %v1017_v39 = vmax.f32 %v921_v31, %v985_v35  ;;  %v4363_v40 = vpop.f32.mrb[20].mxu1  ;;  %v1056_v29 = vmul.f32 %v4732_v58, %v1016_v37  ;;  %v4810_v30 = vsub.s32 3, %v4795_v21  ;;  %v4813_v32 = vsub.s32 4, %v4795_v21 }
 0x202   : > { %v942_v41 = vadd.f32 %v4363_v40, %v4723_v48  ;;  %v933_v42 = vpop.f32.mrb[21].mxu1  ;;  %v1059_v56 = vmul.f32 %v4732_v58, %v1019_v49  ;;  %v4801_v27 = vrot.slane %v1135_v25, %v4798_v24  ;;  %v4816_v33 = vsub.s32 5, %v4795_v21 }
 0x203   : > { %v4364_v43 = vpop.f32.mrb[22].mxu1  ;;  %1112 = vadd.xlane.f32.xlu0 %v1058_v36  ;;  %v1057_v44 = vmul.f32 %v4732_v58, %v1017_v39  ;;  %v934_v45 = vadd.f32 %v4723_v48, %v933_v42  ;;  %v4819_v34 = vsub.s32 6, %v4795_v21  ;;  %v4822_v35 = vsub.s32 7, %v4795_v21 }
 0x204   : > { %v945_v46 = vadd.f32 %v4364_v43, %v4723_v48  ;;  %v936_v47 = vpop.f32.mrb[23].mxu1  ;;  %v990_v50 = vmul.f32 0.1, %v942_v41  ;;  %v4827_v39 = vsub.s32 %v2235_v26, %v4795_v21 }
 0x205   : > { %1110 = vadd.xlane.f32.xlu1 %v1057_v44  ;;  %v988_v52 = vmul.f32 0.1, %v934_v45  ;;  %v937_v55 = vadd.f32 %v4723_v48, %v936_v47 }
 0x206   : > { %v991_v51 = vmul.f32 0.1, %v945_v46  ;;  %v1022_v54 = vmax.f32 %v942_v41, %v990_v50 }
 0x207   : > { %1108 = vadd.xlane.f32.xlu0 %v1056_v29  ;;  %v1020_v0 = vmax.f32 %v934_v45, %v988_v52  ;;  %v989_v4 = vmul.f32 0.1, %v937_v55 }
 0x208   : > { %v1023_v53 = vmax.f32 %v945_v46, %v991_v51  ;;  %v1062_v5 = vmul.f32 %v4732_v58, %v1022_v54 }
 0x209   : > { %v4367_v57 = vpop.f32.mrb[24].mxu1  ;;  %v1021_v14 = vmax.f32 %v937_v55, %v989_v4  ;;  %v1060_v16 = vmul.f32 %v4732_v58, %v1020_v0 }
 0x20a   : > { %v1063_v59 = vmul.f32 %v4732_v58, %v1023_v53  ;;  %v958_v60 = vadd.f32 %v4367_v57, %v4723_v48  ;;  %v949_v61 = vpop.f32.mrb[25].mxu1 }
 0x20b   : > { %1114 = vadd.xlane.f32.xlu0 %v1059_v56  ;;  %v950_v62 = vadd.f32 %v4723_v48, %v949_v61  ;;  %v4368_v63 = vpop.f32.mrb[26].mxu1 }
 0x20c   : > { %1122 = vadd.xlane.f32.xlu1 %v1063_v59  ;;  %v994_v1 = vmul.f32 0.1, %v958_v60  ;;  %v961_v2 = vadd.f32 %v4368_v63, %v4723_v48  ;;  %v952_v3 = vpop.f32.mrb[27].mxu1 }
 0x20d   : > { %v992_v6 = vmul.f32 0.1, %v950_v62  ;;  %v953_v7 = vadd.f32 %v4723_v48, %v952_v3  ;;  %v1061_v48 = vmul.f32 %v4732_v58, %v1021_v14 }
 0x20e   : > { %v1026_v8 = vmax.f32 %v958_v60, %v994_v1  ;;  %v995_v9 = vmul.f32 0.1, %v961_v2 }
 0x20f   : > { %1120 = vadd.xlane.f32.xlu0 %v1062_v5  ;;  %v1024_v10 = vmax.f32 %v950_v62, %v992_v6  ;;  %v993_v11 = vmul.f32 0.1, %v953_v7 }
 0x210   : > { %v1027_v12 = vmax.f32 %v961_v2, %v995_v9  ;;  %v1066_v13 = vmul.f32 %v4732_v58, %v1026_v8 }
 0x211   : > { %v1025_v15 = vmax.f32 %v953_v7, %v993_v11  ;;  %v1064_v17 = vmul.f32 %v4732_v58, %v1024_v10 }
 0x212   : > { %v1067_v18 = vmul.f32 %v4732_v58, %v1027_v12 }
 0x213   : > { %1116 = vadd.xlane.f32.xlu0 %v1060_v16  ;;  %v1065_v19 = vmul.f32 %v4732_v58, %v1025_v15  ;;  %v4804_v58 = vsub.s32 1, %v4795_v21 }
 0x217   : > { %1118 = vadd.xlane.f32.xlu0 %v1061_v48 }
 0x21b   : > { %1128 = vadd.xlane.f32.xlu0 %v1066_v13 }
 0x21f   : > { %1124 = vadd.xlane.f32.xlu0 %v1064_v17 }
 0x223   : > { %1126 = vadd.xlane.f32.xlu0 %v1065_v19 }
 0x227   : > { %1130 = vadd.xlane.f32.xlu0 %v1067_v18 }
 0x267   : > { %v1073_v31 = vpop.xlane.xlu1 %1072 }
 0x268   : > { %v1143_v36 = vadd.f32 %v4801_v27, %v1073_v31  ;;  %v1069_v37 = vpop.xlane.xlu0 %1068 }
 0x269   : > { %v1141_v38 = vadd.f32 %v4801_v27, %v1069_v37 }
 0x26a   : > { %v1272_v40 = vrot.slane %v1143_v36, %v4798_v24  ;;  %v1276_v41 = vrot.slane %v1143_v36, %v4804_v58  ;;  %v1280_v42 = vrot.slane %v1143_v36, %v4807_v28  ;;  %v1284_v43 = vrot.slane %v1143_v36, %v4810_v30 }
 0x26b   : > { %v1075_v44 = vpop.xlane.xlu1 %1074  ;;  %v1288_v45 = vrot.slane %v1143_v36, %v4813_v32  ;;  %v1292_v46 = vrot.slane %v1143_v36, %v4816_v33  ;;  %v1296_v47 = vrot.slane %v1143_v36, %v4819_v34  ;;  %v1300_v49 = vrot.slane %v1143_v36, %v4822_v35 }
 0x26c   : > { %v1144_v50 = vadd.f32 %v4801_v27, %v1075_v44  ;;  %v1071_v29 = vpop.xlane.xlu0 %1070  ;;  %v2327_v51 = vcombine.low %v1272_v40, %v1276_v41  ;;  %v2328_v52 = vcombine.low %v1280_v42, %v1284_v43  ;;  %v1208_v53 = vrot.slane %v1141_v38, %v4798_v24 }
 0x26d   : > { %v4840_v54 = vadd.f32 %v4801_v27, %v1071_v29  ;;  %v2329_v55 = vcombine.low %v1288_v45, %v1292_v46  ;;  %v2330_v56 = vcombine.low %v1296_v47, %v1300_v49  ;;  %v1212_v57 = vrot.slane %v1141_v38, %v4804_v58 }
 0x26e   : > { %v2337_v59 = vrot.slane %v2327_v51, %v4827_v39  ;;  %v2344_v60 = vrot.slane %v2328_v52, %v4827_v39  ;;  %v1216_v61 = vrot.slane %v1141_v38, %v4807_v28  ;;  %v1220_v62 = vrot.slane %v1141_v38, %v4810_v30 }
 0x26f   : > { %v2351_v63 = vrot.slane %v2329_v55, %v4827_v39  ;;  %v2358_v0 = vrot.slane %v2330_v56, %v4827_v39  ;;  %v1224_v1 = vrot.slane %v1141_v38, %v4813_v32  ;;  %v1228_v2 = vrot.slane %v1141_v38, %v4816_v33 }
 0x270   : > { %v1081_v3 = vpop.xlane.xlu0 %1080  ;;  %v2359_v4 = vcombine.low %v2337_v59, %v2344_v60  ;;  %v1232_v5 = vrot.slane %v1141_v38, %v4819_v34  ;;  %v1236_v6 = vrot.slane %v1141_v38, %v4822_v35  ;;  %v2229_v7 = vcombine.low %v1208_v53, %v1212_v57 }
 0x271   : > { %v4854_v8 = vadd.f32 %v4801_v27, %v1081_v3  ;;  %v1083_v9 = vpop.xlane.xlu1 %1082  ;;  %v2360_v10 = vcombine.low %v2351_v63, %v2358_v0  ;;  %v2230_v11 = vcombine.low %v1216_v61, %v1220_v62  ;;  %v2231_v12 = vcombine.low %v1224_v1, %v1228_v2 }
 0x272   : > { %v4857_v13 = vadd.f32 %v4801_v27, %v1083_v9  ;;  %v2367_v14 = vrot.slane %v2359_v4, %v4827_v39  ;;  %v2232_v15 = vcombine.low %v1232_v5, %v1236_v6  ;;  %v2239_v16 = vrot.slane %v2229_v7, %v4827_v39 }
 0x273   : > { %v2374_v17 = vrot.slane %v2360_v10, %v4827_v39  ;;  %v2246_v18 = vrot.slane %v2230_v11, %v4827_v39  ;;  %v2253_v19 = vrot.slane %v2231_v12, %v4827_v39  ;;  %v1304_v48 = vrot.slane %v1144_v50, %v4798_v24 }
 0x274   : > { %v1077_v22 = vpop.xlane.xlu0 %1076  ;;  %v2260_v23 = vrot.slane %v2232_v15, %v4827_v39  ;;  %v1308_v25 = vrot.slane %v1144_v50, %v4804_v58  ;;  %v1312_v26 = vrot.slane %v1144_v50, %v4807_v28  ;;  %v1316_v31 = vrot.slane %v1144_v50, %v4810_v30 }
 0x275   : > { %v4870_v36 = vadd.f32 %v4801_v27, %v1077_v22  ;;  %v1079_v37 = vpop.xlane.xlu1 %1078  ;;  %v2375_v38 = vcombine.low %v2367_v14, %v2374_v17  ;;  %v2261_v40 = vcombine.low %v2239_v16, %v2246_v18  ;;  %v1320_v41 = vrot.slane %v1144_v50, %v4813_v32 }
 0x276   : > { %v4874_v42 = vadd.f32 %v4801_v27, %v1079_v37  ;;  %v2262_v43 = vcombine.low %v2253_v19, %v2260_v23  ;;  %v1324_v44 = vrot.slane %v1144_v50, %v4816_v33  ;;  %v1328_v45 = vrot.slane %v1144_v50, %v4819_v34 }
 0x277   : > { %3804 = vperm.xlu1 %4425, %v2375_v38   ;;  %v2269_v46 = vrot.slane %v2261_v40, %v4827_v39  ;;  %v1332_v47 = vrot.slane %v1144_v50, %v4822_v35  ;;  %v2376_v49 = vcombine.low %v1304_v48, %v1308_v25  ;;  %v2377_v29 = vcombine.low %v1312_v26, %v1316_v31 }
 0x278   : > { %v2276_v51 = vrot.slane %v2262_v43, %v4827_v39  ;;  %v1089_v52 = vpop.xlane.xlu0 %1088  ;;  %v2378_v53 = vcombine.low %v1320_v41, %v1324_v44  ;;  %v1240_v55 = vrot.slane %v4840_v54, %v4798_v24  ;;  %v1244_v56 = vrot.slane %v4840_v54, %v4804_v58 }
 0x279   : > { %v4886_v57 = vadd.f32 %v4801_v27, %v1089_v52  ;;  %v1091_v59 = vpop.xlane.xlu1 %1090  ;;  %v2379_v60 = vcombine.low %v1328_v45, %v1332_v47  ;;  %v2386_v61 = vrot.slane %v2376_v49, %v4827_v39  ;;  %v2393_v50 = vrot.slane %v2377_v29, %v4827_v39 }
 0x27a   : > { %v2277_v62 = vcombine.low %v2269_v46, %v2276_v51  ;;  %v4891_v63 = vadd.f32 %v4801_v27, %v1091_v59  ;;  %v2400_v0 = vrot.slane %v2378_v53, %v4827_v39  ;;  %v1248_v1 = vrot.slane %v4840_v54, %v4807_v28 }
 0x27b   : > { %v2407_v2 = vrot.slane %v2379_v60, %v4827_v39  ;;  %v2408_v3 = vcombine.low %v2386_v61, %v2393_v50  ;;  %v1252_v4 = vrot.slane %v4840_v54, %v4810_v30  ;;  %v1256_v5 = vrot.slane %v4840_v54, %v4813_v32 }
 0x27c   : > { %3798 = vperm.xlu0 %4426, %v2277_v62   ;;  %v1085_v6 = vpop.xlane.xlu0 %1084  ;;  %v1260_v7 = vrot.slane %v4840_v54, %v4816_v33  ;;  %v1264_v9 = vrot.slane %v4840_v54, %v4819_v34  ;;  %v1268_v10 = vrot.slane %v4840_v54, %v4822_v35  ;;  %v2278_v11 = vcombine.low %v1240_v55, %v1244_v56 }
 0x27d   : > { %v2409_v12 = vcombine.low %v2400_v0, %v2407_v2  ;;  %v2416_v14 = vrot.slane %v2408_v3, %v4827_v39  ;;  %v4909_v15 = vadd.f32 %v4801_v27, %v1085_v6  ;;  %v1087_v16 = vpop.xlane.xlu1 %1086  ;;  %v2279_v17 = vcombine.low %v1248_v1, %v1252_v4 }
 0x27e   : > { %v4912_v18 = vadd.f32 %v4801_v27, %v1087_v16  ;;  %v2280_v19 = vcombine.low %v1256_v5, %v1260_v7  ;;  %v2281_v48 = vcombine.low %v1264_v9, %v1268_v10  ;;  %v2288_v22 = vrot.slane %v2278_v11, %v4827_v39 }
 0x27f   : > { %v2423_v23 = vrot.slane %v2409_v12, %v4827_v39  ;;  %v2295_v54 = vrot.slane %v2279_v17, %v4827_v39  ;;  %v1400_v25 = vrot.slane %v4854_v8, %v4798_v24  ;;  %v1404_v26 = vrot.slane %v4854_v8, %v4804_v58 }
 0x280   : > { %v2302_v31 = vrot.slane %v2280_v19, %v4827_v39  ;;  %v2309_v37 = vrot.slane %v2281_v48, %v4827_v39  ;;  %v1097_v38 = vpop.xlane.xlu0 %1096  ;;  %v1408_v40 = vrot.slane %v4854_v8, %v4807_v28  ;;  %v1412_v41 = vrot.slane %v4854_v8, %v4810_v30 }
 0x281   : > { %v2424_v43 = vcombine.low %v2416_v14, %v2423_v23  ;;  %v2310_v44 = vcombine.low %v2288_v22, %v2295_v54  ;;  %v4928_v45 = vadd.f32 %v4801_v27, %v1097_v38  ;;  %v1099_v46 = vpop.xlane.xlu1 %1098  ;;  %v1416_v47 = vrot.slane %v4854_v8, %v4813_v32 }
 0x282   : > { %v2311_v49 = vcombine.low %v2302_v31, %v2309_v37  ;;  %v4933_v29 = vadd.f32 %v4801_v27, %v1099_v46  ;;  %v1420_v51 = vrot.slane %v4854_v8, %v4816_v33  ;;  %v1424_v52 = vrot.slane %v4854_v8, %v4819_v34 }
 0x283   : > { %3807 = vperm.xlu1 %4425, %v2424_v43   ;;  %v2318_v53 = vrot.slane %v2310_v44, %v4827_v39  ;;  %v1428_v55 = vrot.slane %v4854_v8, %v4822_v35  ;;  %v2523_v56 = vcombine.low %v1400_v25, %v1404_v26  ;;  %v2524_v59 = vcombine.low %v1408_v40, %v1412_v41 }
 0x284   : > { %v2325_v60 = vrot.slane %v2311_v49, %v4827_v39  ;;  %v2525_v61 = vcombine.low %v1416_v47, %v1420_v51  ;;  %v1093_v50 = vpop.xlane.xlu0 %1092  ;;  %v1336_v62 = vrot.slane %v4870_v36, %v4798_v24  ;;  %v1340_v0 = vrot.slane %v4870_v36, %v4804_v58 }
 0x285   : > { %v2526_v1 = vcombine.low %v1424_v52, %v1428_v55  ;;  %v2533_v2 = vrot.slane %v2523_v56, %v4827_v39  ;;  %v2540_v3 = vrot.slane %v2524_v59, %v4827_v39  ;;  %v4950_v4 = vadd.f32 %v4801_v27, %v1093_v50  ;;  %v1095_v8 = vpop.xlane.xlu1 %1094 }
 0x286   : > { %v2326_v5 = vcombine.low %v2318_v53, %v2325_v60  ;;  %v2547_v6 = vrot.slane %v2525_v61, %v4827_v39  ;;  %v4954_v7 = vadd.f32 %v4801_v27, %v1095_v8  ;;  %v1344_v9 = vrot.slane %v4870_v36, %v4807_v28 }
 0x287   : > { %v2554_v10 = vrot.slane %v2526_v1, %v4827_v39  ;;  %v2555_v11 = vcombine.low %v2533_v2, %v2540_v3  ;;  %v1348_v12 = vrot.slane %v4870_v36, %v4810_v30  ;;  %v1352_v14 = vrot.slane %v4870_v36, %v4813_v32 }
 0x288   : > { %3801 = vperm.xlu1 %4425, %v2326_v5   ;;  %v1356_v16 = vrot.slane %v4870_v36, %v4816_v33  ;;  %v1360_v17 = vrot.slane %v4870_v36, %v4819_v34  ;;  %v1364_v19 = vrot.slane %v4870_v36, %v4822_v35  ;;  %v2425_v48 = vcombine.low %v1336_v62, %v1340_v0  ;;  %v1105_v22 = vpop.xlane.xlu0 %1104 }
 0x289   : > { %v2556_v23 = vcombine.low %v2547_v6, %v2554_v10  ;;  %v2563_v54 = vrot.slane %v2555_v11, %v4827_v39  ;;  %v2426_v25 = vcombine.low %v1344_v9, %v1348_v12  ;;  %v4971_v26 = vadd.f32 %v4801_v27, %v1105_v22  ;;  %v1107_v31 = vpop.xlane.xlu1 %1106 }
 0x28a   : > { %v2427_v37 = vcombine.low %v1352_v14, %v1356_v16  ;;  %v2428_v38 = vcombine.low %v1360_v17, %v1364_v19  ;;  %v2435_v40 = vrot.slane %v2425_v48, %v4827_v39  ;;  %v4975_v41 = vadd.f32 %v4801_v27, %v1107_v31 }
 0x28b   : > { %v2570_v43 = vrot.slane %v2556_v23, %v4827_v39  ;;  %v2442_v36 = vrot.slane %v2426_v25, %v4827_v39  ;;  %v1432_v44 = vrot.slane %v4857_v13, %v4798_v24  ;;  %v1436_v46 = vrot.slane %v4857_v13, %v4804_v58 }
 0x28c   : > { %v2449_v47 = vrot.slane %v2427_v37, %v4827_v39  ;;  %v2456_v49 = vrot.slane %v2428_v38, %v4827_v39  ;;  %v1440_v51 = vrot.slane %v4857_v13, %v4807_v28  ;;  %v1444_v52 = vrot.slane %v4857_v13, %v4810_v30  ;;  %v1101_v53 = vpop.xlane.xlu0 %1100 }
 0x28d   : > { %v2571_v55 = vcombine.low %v2563_v54, %v2570_v43  ;;  %v2457_v56 = vcombine.low %v2435_v40, %v2442_v36  ;;  %v1448_v59 = vrot.slane %v4857_v13, %v4813_v32  ;;  %v1452_v60 = vrot.slane %v4857_v13, %v4816_v33  ;;  %v1103_v61 = vpop.xlane.xlu1 %1102 }
 0x28e   : > { %v2458_v50 = vcombine.low %v2449_v47, %v2456_v49  ;;  %v1456_v62 = vrot.slane %v4857_v13, %v4819_v34  ;;  %v1460_v0 = vrot.slane %v4857_v13, %v4822_v35  ;;  %v2572_v1 = vcombine.low %v1432_v44, %v1436_v46 }
 0x28f   : > { %3816 = vperm.xlu1 %4425, %v2571_v55   ;;  %v2465_v2 = vrot.slane %v2457_v56, %v4827_v39  ;;  %v2573_v3 = vcombine.low %v1440_v51, %v1444_v52  ;;  %v2574_v8 = vcombine.low %v1448_v59, %v1452_v60  ;;  %v4999_v5 = vadd.f32 %v4801_v27, %v1101_v53 }
 0x290   : > { %v2472_v6 = vrot.slane %v2458_v50, %v4827_v39  ;;  %v2575_v9 = vcombine.low %v1456_v62, %v1460_v0  ;;  %v2582_v10 = vrot.slane %v2572_v1, %v4827_v39  ;;  %v5004_v11 = vadd.f32 %v4801_v27, %v1103_v61  ;;  %v1113_v23 = vpop.xlane.xlu0 %1112 }
 0x291   : > { %v2589_v12 = vrot.slane %v2573_v3, %v4827_v39  ;;  %v2596_v13 = vrot.slane %v2574_v8, %v4827_v39  ;;  %v1368_v14 = vrot.slane %v4874_v42, %v4798_v24  ;;  %v1372_v16 = vrot.slane %v4874_v42, %v4804_v58 }
 0x292   : > { %v2473_v17 = vcombine.low %v2465_v2, %v2472_v6  ;;  %v2603_v19 = vrot.slane %v2575_v9, %v4827_v39  ;;  %v1376_v48 = vrot.slane %v4874_v42, %v4807_v28  ;;  %v1380_v22 = vrot.slane %v4874_v42, %v4810_v30  ;;  %v1111_v54 = vpop.xlane.xlu1 %1110 }
 0x293   : > { %v2604_v25 = vcombine.low %v2582_v10, %v2589_v12  ;;  %v1384_v31 = vrot.slane %v4874_v42, %v4813_v32  ;;  %v1388_v37 = vrot.slane %v4874_v42, %v4816_v33  ;;  %v1392_v38 = vrot.slane %v4874_v42, %v4819_v34 }
 0x294   : > { %3810 = vperm.xlu1 %4425, %v2473_v17   ;;  %v2605_v40 = vcombine.low %v2596_v13, %v2603_v19  ;;  %v1396_v43 = vrot.slane %v4874_v42, %v4822_v35  ;;  %v2474_v36 = vcombine.low %v1368_v14, %v1372_v16  ;;  %v2475_v44 = vcombine.low %v1376_v48, %v1380_v22  ;;  %v1109_v2 = vpop.xlane.xlu0 %1108 }
 0x295   : > { %v2612_v46 = vrot.slane %v2604_v25, %v4827_v39  ;;  %v2476_v47 = vcombine.low %v1384_v31, %v1388_v37  ;;  %v5027_v49 = vadd.f32 %v4801_v27, %v1113_v23  ;;  %v5030_v51 = vadd.f32 %v4801_v27, %v1111_v54 }
 0x296   : > { %v2619_v52 = vrot.slane %v2605_v40, %v4827_v39  ;;  %v2477_v53 = vcombine.low %v1392_v38, %v1396_v43  ;;  %v2484_v55 = vrot.slane %v2474_v36, %v4827_v39  ;;  %v2491_v56 = vrot.slane %v2475_v44, %v4827_v39 }
 0x297   : > { %v2498_v42 = vrot.slane %v2476_v47, %v4827_v39  ;;  %v1528_v59 = vrot.slane %v4886_v57, %v4798_v24  ;;  %v1532_v60 = vrot.slane %v4886_v57, %v4804_v58  ;;  %v1536_v61 = vrot.slane %v4886_v57, %v4807_v28 }
 0x298   : > { %v2620_v50 = vcombine.low %v2612_v46, %v2619_v52  ;;  %v2505_v62 = vrot.slane %v2477_v53, %v4827_v39  ;;  %v2506_v0 = vcombine.low %v2484_v55, %v2491_v56  ;;  %v1540_v1 = vrot.slane %v4886_v57, %v4810_v30 }
 0x299   : > { %v1544_v3 = vrot.slane %v4886_v57, %v4813_v32  ;;  %v1548_v8 = vrot.slane %v4886_v57, %v4816_v33  ;;  %v1552_v6 = vrot.slane %v4886_v57, %v4819_v34  ;;  %v1556_v9 = vrot.slane %v4886_v57, %v4822_v35 }
 0x29a   : > { %3819 = vperm.xlu1 %4425, %v2620_v50   ;;  %v2507_v10 = vcombine.low %v2498_v42, %v2505_v62  ;;  %v2514_v12 = vrot.slane %v2506_v0, %v4827_v39  ;;  %v2719_v13 = vcombine.low %v1528_v59, %v1532_v60  ;;  %v2720_v14 = vcombine.low %v1536_v61, %v1540_v1 }
 0x29b   : > { %v2721_v16 = vcombine.low %v1544_v3, %v1548_v8  ;;  %v2722_v17 = vcombine.low %v1552_v6, %v1556_v9  ;;  %v5055_v19 = vadd.f32 %v4801_v27, %v1109_v2  ;;  %v1464_v48 = vrot.slane %v4909_v15, %v4798_v24  ;;  %v1115_v3 = vpop.xlane.xlu0 %1114 }
 0x29c   : > { %v2521_v22 = vrot.slane %v2507_v10, %v4827_v39  ;;  %v2729_v23 = vrot.slane %v2719_v13, %v4827_v39  ;;  %v2736_v57 = vrot.slane %v2720_v14, %v4827_v39  ;;  %v1468_v54 = vrot.slane %v4909_v15, %v4804_v58 }
 0x29d   : > { %v2743_v25 = vrot.slane %v2721_v16, %v4827_v39  ;;  %v2750_v31 = vrot.slane %v2722_v17, %v4827_v39  ;;  %v1472_v37 = vrot.slane %v4909_v15, %v4807_v28  ;;  %v1476_v38 = vrot.slane %v4909_v15, %v4810_v30 }
 0x29e   : > { %v2522_v40 = vcombine.low %v2514_v12, %v2521_v22  ;;  %v2751_v43 = vcombine.low %v2729_v23, %v2736_v57  ;;  %v1480_v36 = vrot.slane %v4909_v15, %v4813_v32  ;;  %v1484_v44 = vrot.slane %v4909_v15, %v4816_v33  ;;  %v1123_v12 = vpop.xlane.xlu1 %1122 }
 0x29f   : > { %v2752_v46 = vcombine.low %v2743_v25, %v2750_v31  ;;  %v1488_v47 = vrot.slane %v4909_v15, %v4819_v34  ;;  %v1492_v52 = vrot.slane %v4909_v15, %v4822_v35  ;;  %v2621_v53 = vcombine.low %v1464_v48, %v1468_v54 }
 0x2a0   : > { %3813 = vperm.xlu1 %4425, %v2522_v40   ;;  %v2759_v55 = vrot.slane %v2751_v43, %v4827_v39  ;;  %v2622_v56 = vcombine.low %v1472_v37, %v1476_v38  ;;  %v2623_v42 = vcombine.low %v1480_v36, %v1484_v44  ;;  %v1784_v59 = vrot.slane %v4971_v26, %v4798_v24 }
 0x2a1   : > { %v2766_v60 = vrot.slane %v2752_v46, %v4827_v39  ;;  %v2624_v61 = vcombine.low %v1488_v47, %v1492_v52  ;;  %v2631_v50 = vrot.slane %v2621_v53, %v4827_v39  ;;  %v1788_v62 = vrot.slane %v4971_v26, %v4804_v58 }
 0x2a2   : > { %v2638_v0 = vrot.slane %v2622_v56, %v4827_v39  ;;  %v2645_v15 = vrot.slane %v2623_v42, %v4827_v39  ;;  %v1792_v1 = vrot.slane %v4971_v26, %v4807_v28  ;;  %v1796_v2 = vrot.slane %v4971_v26, %v4810_v30 }
 0x2a3   : > { %v2767_v8 = vcombine.low %v2759_v55, %v2766_v60  ;;  %v2652_v6 = vrot.slane %v2624_v61, %v4827_v39  ;;  %v1800_v9 = vrot.slane %v4971_v26, %v4813_v32  ;;  %v1804_v10 = vrot.slane %v4971_v26, %v4816_v33 }
 0x2a4   : > { %v2653_v13 = vcombine.low %v2631_v50, %v2638_v0  ;;  %v1808_v14 = vrot.slane %v4971_v26, %v4819_v34  ;;  %v1812_v16 = vrot.slane %v4971_v26, %v4822_v35  ;;  %v3111_v17 = vcombine.low %v1784_v59, %v1788_v62 }
 0x2a5   : > { %3828 = vperm.xlu1 %4425, %v2767_v8   ;;  %v2654_v48 = vcombine.low %v2645_v15, %v2652_v6  ;;  %v3112_v22 = vcombine.low %v1792_v1, %v1796_v2  ;;  %v3113_v23 = vcombine.low %v1800_v9, %v1804_v10  ;;  %v5101_v57 = vadd.f32 %v4801_v27, %v1115_v3 }
 0x2a6   : > { %v2661_v54 = vrot.slane %v2653_v13, %v4827_v39  ;;  %v3114_v25 = vcombine.low %v1808_v14, %v1812_v16  ;;  %v3121_v31 = vrot.slane %v3111_v17, %v4827_v39  ;;  %v5106_v37 = vadd.f32 %v4801_v27, %v1123_v12  ;;  %v1121_v12 = vpop.xlane.xlu0 %1120 }
 0x2a7   : > { %v2668_v38 = vrot.slane %v2654_v48, %v4827_v39  ;;  %v3128_v26 = vrot.slane %v3112_v22, %v4827_v39  ;;  %v3135_v40 = vrot.slane %v3113_v23, %v4827_v39  ;;  %v1560_v43 = vrot.slane %v4891_v63, %v4798_v24 }
 0x2a8   : > { %v3142_v36 = vrot.slane %v3114_v25, %v4827_v39  ;;  %v1564_v44 = vrot.slane %v4891_v63, %v4804_v58  ;;  %v1568_v46 = vrot.slane %v4891_v63, %v4807_v28  ;;  %v1572_v47 = vrot.slane %v4891_v63, %v4810_v30 }
 0x2a9   : > { %v2669_v52 = vcombine.low %v2661_v54, %v2668_v38  ;;  %v3143_v53 = vcombine.low %v3121_v31, %v3128_v26  ;;  %v1576_v55 = vrot.slane %v4891_v63, %v4813_v32  ;;  %v1580_v56 = vrot.slane %v4891_v63, %v4816_v33 }
 0x2aa   : > { %v3144_v42 = vcombine.low %v3135_v40, %v3142_v36  ;;  %v1584_v59 = vrot.slane %v4891_v63, %v4819_v34  ;;  %v1588_v60 = vrot.slane %v4891_v63, %v4822_v35  ;;  %v2768_v61 = vcombine.low %v1560_v43, %v1564_v44 }
 0x2ab   : > { %3822 = vperm.xlu1 %4425, %v2669_v52   ;;  %v3151_v50 = vrot.slane %v3143_v53, %v4827_v39  ;;  %v2769_v62 = vcombine.low %v1568_v46, %v1572_v47  ;;  %v2770_v0 = vcombine.low %v1576_v55, %v1580_v56  ;;  %v1816_v15 = vrot.slane %v4975_v41, %v4798_v24 }
 0x2ac   : > { %v3158_v1 = vrot.slane %v3144_v42, %v4827_v39  ;;  %v2771_v2 = vcombine.low %v1584_v59, %v1588_v60  ;;  %v2778_v3 = vrot.slane %v2768_v61, %v4827_v39  ;;  %v1820_v8 = vrot.slane %v4975_v41, %v4804_v58 }
 0x2ad   : > { %v2785_v6 = vrot.slane %v2769_v62, %v4827_v39  ;;  %v2792_v63 = vrot.slane %v2770_v0, %v4827_v39  ;;  %v1824_v9 = vrot.slane %v4975_v41, %v4807_v28  ;;  %v1828_v10 = vrot.slane %v4975_v41, %v4810_v30 }
 0x2ae   : > { %v3159_v13 = vcombine.low %v3151_v50, %v3158_v1  ;;  %v2799_v14 = vrot.slane %v2771_v2, %v4827_v39  ;;  %v1832_v16 = vrot.slane %v4975_v41, %v4813_v32  ;;  %v1836_v17 = vrot.slane %v4975_v41, %v4816_v33 }
 0x2af   : > { %v2800_v48 = vcombine.low %v2778_v3, %v2785_v6  ;;  %v1840_v22 = vrot.slane %v4975_v41, %v4819_v34  ;;  %v1844_v23 = vrot.slane %v4975_v41, %v4822_v35  ;;  %v3160_v54 = vcombine.low %v1816_v15, %v1820_v8 }
 0x2b0   : > { %3852 = vperm.xlu0 %4426, %v3159_v13   ;;  %v2801_v25 = vcombine.low %v2792_v63, %v2799_v14  ;;  %v3161_v31 = vcombine.low %v1824_v9, %v1828_v10  ;;  %v3162_v38 = vcombine.low %v1832_v16, %v1836_v17  ;;  %v5151_v26 = vadd.f32 %v4801_v27, %v1121_v12  ;;  %v1117_v17 = vpop.xlane.xlu0 %1116 }
 0x2b1   : > { %v2808_v40 = vrot.slane %v2800_v48, %v4827_v39  ;;  %v3163_v43 = vcombine.low %v1840_v22, %v1844_v23  ;;  %v3170_v36 = vrot.slane %v3160_v54, %v4827_v39  ;;  %v1496_v44 = vrot.slane %v4912_v18, %v4798_v24 }
 0x2b2   : > { %v2815_v46 = vrot.slane %v2801_v25, %v4827_v39  ;;  %v3177_v41 = vrot.slane %v3161_v31, %v4827_v39  ;;  %v3184_v47 = vrot.slane %v3162_v38, %v4827_v39  ;;  %v1500_v52 = vrot.slane %v4912_v18, %v4804_v58 }
 0x2b3   : > { %v3191_v53 = vrot.slane %v3163_v43, %v4827_v39  ;;  %v1504_v55 = vrot.slane %v4912_v18, %v4807_v28  ;;  %v1508_v56 = vrot.slane %v4912_v18, %v4810_v30  ;;  %v1512_v42 = vrot.slane %v4912_v18, %v4813_v32 }
 0x2b4   : > { %v2816_v59 = vcombine.low %v2808_v40, %v2815_v46  ;;  %v3192_v60 = vcombine.low %v3170_v36, %v3177_v41  ;;  %v1516_v61 = vrot.slane %v4912_v18, %v4816_v33  ;;  %v1520_v50 = vrot.slane %v4912_v18, %v4819_v34 }
 0x2b5   : > { %v3193_v62 = vcombine.low %v3184_v47, %v3191_v53  ;;  %v1524_v0 = vrot.slane %v4912_v18, %v4822_v35  ;;  %v2670_v15 = vcombine.low %v1496_v44, %v1500_v52  ;;  %v2671_v1 = vcombine.low %v1504_v55, %v1508_v56 }
 0x2b6   : > { %3831 = vperm.xlu1 %4425, %v2816_v59   ;;  %v3200_v2 = vrot.slane %v3192_v60, %v4827_v39  ;;  %v2672_v3 = vcombine.low %v1512_v42, %v1516_v61  ;;  %v1912_v8 = vrot.slane %v5027_v49, %v4798_v24  ;;  %v1916_v6 = vrot.slane %v5027_v49, %v4804_v58 }
 0x2b7   : > { %v3207_v63 = vrot.slane %v3193_v62, %v4827_v39  ;;  %v2673_v9 = vcombine.low %v1520_v50, %v1524_v0  ;;  %v2680_v10 = vrot.slane %v2670_v15, %v4827_v39  ;;  %v2687_v12 = vrot.slane %v2671_v1, %v4827_v39 }
 0x2b8   : > { %v2694_v18 = vrot.slane %v2672_v3, %v4827_v39  ;;  %v1920_v13 = vrot.slane %v5027_v49, %v4807_v28  ;;  %v1924_v14 = vrot.slane %v5027_v49, %v4810_v30  ;;  %v1928_v16 = vrot.slane %v5027_v49, %v4813_v32 }
 0x2b9   : > { %v3208_v48 = vcombine.low %v3200_v2, %v3207_v63  ;;  %v2701_v22 = vrot.slane %v2673_v9, %v4827_v39  ;;  %v2702_v23 = vcombine.low %v2680_v10, %v2687_v12  ;;  %v1932_v54 = vrot.slane %v5027_v49, %v4816_v33 }
 0x2ba   : > { %v1936_v25 = vrot.slane %v5027_v49, %v4819_v34  ;;  %v1940_v31 = vrot.slane %v5027_v49, %v4822_v35  ;;  %v3307_v38 = vcombine.low %v1912_v8, %v1916_v6  ;;  %v3308_v40 = vcombine.low %v1920_v13, %v1924_v14 }
 0x2bb   : > { %3855 = vperm.xlu0 %4426, %v3208_v48   ;;  %v2703_v43 = vcombine.low %v2694_v18, %v2701_v22  ;;  %v2710_v36 = vrot.slane %v2702_v23, %v4827_v39  ;;  %v3309_v44 = vcombine.low %v1928_v16, %v1932_v54  ;;  %v5199_v46 = vadd.f32 %v4801_v27, %v1117_v17  ;;  %v1119_v23 = vpop.xlane.xlu0 %1118 }
 0x2bc   : > { %v3310_v41 = vcombine.low %v1936_v25, %v1940_v31  ;;  %v3317_v47 = vrot.slane %v3307_v38, %v4827_v39  ;;  %v3324_v52 = vrot.slane %v3308_v40, %v4827_v39  ;;  %v1720_v53 = vrot.slane %v4999_v5, %v4798_v24 }
 0x2bd   : > { %v2717_v49 = vrot.slane %v2703_v43, %v4827_v39  ;;  %v3331_v55 = vrot.slane %v3309_v44, %v4827_v39  ;;  %v1724_v56 = vrot.slane %v4999_v5, %v4804_v58  ;;  %v1728_v42 = vrot.slane %v4999_v5, %v4807_v28 }
 0x2be   : > { %v3338_v59 = vrot.slane %v3310_v41, %v4827_v39  ;;  %v3339_v60 = vcombine.low %v3317_v47, %v3324_v52  ;;  %v1732_v61 = vrot.slane %v4999_v5, %v4810_v30  ;;  %v1736_v50 = vrot.slane %v4999_v5, %v4813_v32 }
 0x2bf   : > { %v2718_v62 = vcombine.low %v2710_v36, %v2717_v49  ;;  %v1740_v0 = vrot.slane %v4999_v5, %v4816_v33  ;;  %v1744_v15 = vrot.slane %v4999_v5, %v4819_v34  ;;  %v1748_v1 = vrot.slane %v4999_v5, %v4822_v35 }
 0x2c0   : > { %v3340_v2 = vcombine.low %v3331_v55, %v3338_v59  ;;  %v3347_v3 = vrot.slane %v3339_v60, %v4827_v39  ;;  %v3013_v8 = vcombine.low %v1720_v53, %v1724_v56  ;;  %v3014_v6 = vcombine.low %v1728_v42, %v1732_v61 }
 0x2c1   : > { %3825 = vperm.xlu1 %4425, %v2718_v62   ;;  %v3015_v63 = vcombine.low %v1736_v50, %v1740_v0  ;;  %v3016_v9 = vcombine.low %v1744_v15, %v1748_v1  ;;  %v1848_v10 = vrot.slane %v5055_v19, %v4798_v24  ;;  %v1852_v12 = vrot.slane %v5055_v19, %v4804_v58 }
 0x2c2   : > { %v3354_v18 = vrot.slane %v3340_v2, %v4827_v39  ;;  %v3023_v13 = vrot.slane %v3013_v8, %v4827_v39  ;;  %v3030_v5 = vrot.slane %v3014_v6, %v4827_v39  ;;  %v1856_v14 = vrot.slane %v5055_v19, %v4807_v28 }
 0x2c3   : > { %v3037_v16 = vrot.slane %v3015_v63, %v4827_v39  ;;  %v3044_v17 = vrot.slane %v3016_v9, %v4827_v39  ;;  %v1860_v48 = vrot.slane %v5055_v19, %v4810_v30  ;;  %v1864_v22 = vrot.slane %v5055_v19, %v4813_v32 }
 0x2c4   : > { %v3355_v54 = vcombine.low %v3347_v3, %v3354_v18  ;;  %v3045_v25 = vcombine.low %v3023_v13, %v3030_v5  ;;  %v1868_v31 = vrot.slane %v5055_v19, %v4816_v33  ;;  %v1872_v38 = vrot.slane %v5055_v19, %v4819_v34 }
 0x2c5   : > { %v3046_v40 = vcombine.low %v3037_v16, %v3044_v17  ;;  %v1876_v43 = vrot.slane %v5055_v19, %v4822_v35  ;;  %v3209_v36 = vcombine.low %v1848_v10, %v1852_v12  ;;  %v3210_v44 = vcombine.low %v1856_v14, %v1860_v48 }
 0x2c6   : > { %3864 = vperm.xlu0 %4426, %v3355_v54   ;;  %v3053_v41 = vrot.slane %v3045_v25, %v4827_v39  ;;  %v3211_v47 = vcombine.low %v1864_v22, %v1868_v31  ;;  %v5246_v52 = vadd.f32 %v4801_v27, %v1119_v23  ;;  %v1752_v53 = vrot.slane %v5004_v11, %v4798_v24  ;;  %v1129_v25 = vpop.xlane.xlu0 %1128 }
 0x2c7   : > { %v3060_v49 = vrot.slane %v3046_v40, %v4827_v39  ;;  %v3212_v55 = vcombine.low %v1872_v38, %v1876_v43  ;;  %v3219_v56 = vrot.slane %v3209_v36, %v4827_v39  ;;  %v3226_v42 = vrot.slane %v3210_v44, %v4827_v39 }
 0x2c8   : > { %v3233_v19 = vrot.slane %v3211_v47, %v4827_v39  ;;  %v1756_v59 = vrot.slane %v5004_v11, %v4804_v58  ;;  %v1760_v60 = vrot.slane %v5004_v11, %v4807_v28  ;;  %v1764_v61 = vrot.slane %v5004_v11, %v4810_v30 }
 0x2c9   : > { %v3061_v50 = vcombine.low %v3053_v41, %v3060_v49  ;;  %v3240_v62 = vrot.slane %v3212_v55, %v4827_v39  ;;  %v3241_v0 = vcombine.low %v3219_v56, %v3226_v42  ;;  %v1768_v15 = vrot.slane %v5004_v11, %v4813_v32 }
 0x2ca   : > { %v1772_v1 = vrot.slane %v5004_v11, %v4816_v33  ;;  %v1776_v2 = vrot.slane %v5004_v11, %v4819_v34  ;;  %v1780_v3 = vrot.slane %v5004_v11, %v4822_v35  ;;  %v3062_v8 = vcombine.low %v1752_v53, %v1756_v59 }
 0x2cb   : > { %3846 = vperm.xlu1 %4425, %v3061_v50   ;;  %v3242_v6 = vcombine.low %v3233_v19, %v3240_v62  ;;  %v3249_v63 = vrot.slane %v3241_v0, %v4827_v39  ;;  %v3063_v9 = vcombine.low %v1760_v60, %v1764_v61  ;;  %v1944_v10 = vrot.slane %v5101_v57, %v4798_v24 }
 0x2cc   : > { %v3064_v12 = vcombine.low %v1768_v15, %v1772_v1  ;;  %v3065_v18 = vcombine.low %v1776_v2, %v1780_v3  ;;  %v3072_v13 = vrot.slane %v3062_v8, %v4827_v39  ;;  %v1948_v5 = vrot.slane %v5101_v57, %v4804_v58 }
 0x2cd   : > { %v3256_v14 = vrot.slane %v3242_v6, %v4827_v39  ;;  %v3079_v11 = vrot.slane %v3063_v9, %v4827_v39  ;;  %v1952_v16 = vrot.slane %v5101_v57, %v4807_v28  ;;  %v1956_v17 = vrot.slane %v5101_v57, %v4810_v30 }
 0x2ce   : > { %v3086_v48 = vrot.slane %v3064_v12, %v4827_v39  ;;  %v3093_v22 = vrot.slane %v3065_v18, %v4827_v39  ;;  %v1960_v23 = vrot.slane %v5101_v57, %v4813_v32  ;;  %v1964_v54 = vrot.slane %v5101_v57, %v4816_v33 }
 0x2cf   : > { %v3257_v31 = vcombine.low %v3249_v63, %v3256_v14  ;;  %v3094_v38 = vcombine.low %v3072_v13, %v3079_v11  ;;  %v1968_v40 = vrot.slane %v5101_v57, %v4819_v34  ;;  %v1972_v43 = vrot.slane %v5101_v57, %v4822_v35 }
 0x2d0   : > { %v3095_v36 = vcombine.low %v3086_v48, %v3093_v22  ;;  %v3356_v44 = vcombine.low %v1944_v10, %v1948_v5  ;;  %v3357_v41 = vcombine.low %v1952_v16, %v1956_v17  ;;  %v3358_v47 = vcombine.low %v1960_v23, %v1964_v54  ;;  %v1125_v22 = vpop.xlane.xlu0 %1124 }
 0x2d1   : > { %3858 = vperm.xlu0 %4426, %v3257_v31   ;;  %v3102_v53 = vrot.slane %v3094_v38, %v4827_v39  ;;  %v3359_v49 = vcombine.low %v1968_v40, %v1972_v43  ;;  %v5293_v55 = vadd.f32 %v4801_v27, %v1129_v25  ;;  %v1592_v56 = vrot.slane %v4950_v4, %v4798_v24 }
 0x2d2   : > { %v3109_v42 = vrot.slane %v3095_v36, %v4827_v39  ;;  %v3366_v19 = vrot.slane %v3356_v44, %v4827_v39  ;;  %v3373_v57 = vrot.slane %v3357_v41, %v4827_v39  ;;  %v3380_v59 = vrot.slane %v3358_v47, %v4827_v39 }
 0x2d3   : > { %v3387_v60 = vrot.slane %v3359_v49, %v4827_v39  ;;  %v1596_v61 = vrot.slane %v4950_v4, %v4804_v58  ;;  %v1600_v50 = vrot.slane %v4950_v4, %v4807_v28  ;;  %v1604_v62 = vrot.slane %v4950_v4, %v4810_v30 }
 0x2d4   : > { %v3110_v0 = vcombine.low %v3102_v53, %v3109_v42  ;;  %v3388_v15 = vcombine.low %v3366_v19, %v3373_v57  ;;  %v1608_v1 = vrot.slane %v4950_v4, %v4813_v32  ;;  %v1612_v2 = vrot.slane %v4950_v4, %v4816_v33 }
 0x2d5   : > { %v3389_v3 = vcombine.low %v3380_v59, %v3387_v60  ;;  %v1616_v8 = vrot.slane %v4950_v4, %v4819_v34  ;;  %v1620_v6 = vrot.slane %v4950_v4, %v4822_v35  ;;  %v2817_v63 = vcombine.low %v1592_v56, %v1596_v61 }
 0x2d6   : > { %3849 = vperm.xlu1 %4425, %v3110_v0   ;;  %v3396_v9 = vrot.slane %v3388_v15, %v4827_v39  ;;  %v2818_v10 = vcombine.low %v1600_v50, %v1604_v62  ;;  %v2819_v12 = vcombine.low %v1608_v1, %v1612_v2  ;;  %v1880_v18 = vrot.slane %v5030_v51, %v4798_v24 }
 0x2d7   : > { %v3403_v13 = vrot.slane %v3389_v3, %v4827_v39  ;;  %v2820_v5 = vcombine.low %v1616_v8, %v1620_v6  ;;  %v2827_v14 = vrot.slane %v2817_v63, %v4827_v39  ;;  %v1884_v11 = vrot.slane %v5030_v51, %v4804_v58 }
 0x2d8   : > { %v2834_v16 = vrot.slane %v2818_v10, %v4827_v39  ;;  %v2841_v4 = vrot.slane %v2819_v12, %v4827_v39  ;;  %v1888_v17 = vrot.slane %v5030_v51, %v4807_v28  ;;  %v1892_v48 = vrot.slane %v5030_v51, %v4810_v30 }
 0x2d9   : > { %v3404_v23 = vcombine.low %v3396_v9, %v3403_v13  ;;  %v2848_v54 = vrot.slane %v2820_v5, %v4827_v39  ;;  %v1896_v25 = vrot.slane %v5030_v51, %v4813_v32  ;;  %v1900_v31 = vrot.slane %v5030_v51, %v4816_v33 }
 0x2da   : > { %v2849_v38 = vcombine.low %v2827_v14, %v2834_v16  ;;  %v1904_v40 = vrot.slane %v5030_v51, %v4819_v34  ;;  %v1908_v43 = vrot.slane %v5030_v51, %v4822_v35  ;;  %v3258_v36 = vcombine.low %v1880_v18, %v1884_v11 }
 0x2db   : > { %3867 = vperm.xlu0 %4426, %v3404_v23   ;;  %v2850_v44 = vcombine.low %v2841_v4, %v2848_v54  ;;  %v3259_v41 = vcombine.low %v1888_v17, %v1892_v48  ;;  %v3260_v47 = vcombine.low %v1896_v25, %v1900_v31  ;;  %v5339_v53 = vadd.f32 %v4801_v27, %v1125_v22  ;;  %v1127_v22 = vpop.xlane.xlu0 %1126 }
 0x2dc   : > { %v2857_v49 = vrot.slane %v2849_v38, %v4827_v39  ;;  %v3261_v56 = vcombine.low %v1904_v40, %v1908_v43  ;;  %v3268_v42 = vrot.slane %v3258_v36, %v4827_v39  ;;  %v1624_v19 = vrot.slane %v4954_v7, %v4798_v24 }
 0x2dd   : > { %v2864_v57 = vrot.slane %v2850_v44, %v4827_v39  ;;  %v3275_v51 = vrot.slane %v3259_v41, %v4827_v39  ;;  %v3282_v59 = vrot.slane %v3260_v47, %v4827_v39  ;;  %v1628_v60 = vrot.slane %v4954_v7, %v4804_v58 }
 0x2de   : > { %v3289_v61 = vrot.slane %v3261_v56, %v4827_v39  ;;  %v1632_v50 = vrot.slane %v4954_v7, %v4807_v28  ;;  %v1636_v62 = vrot.slane %v4954_v7, %v4810_v30  ;;  %v1640_v0 = vrot.slane %v4954_v7, %v4813_v32 }
 0x2df   : > { %v2865_v15 = vcombine.low %v2857_v49, %v2864_v57  ;;  %v3290_v1 = vcombine.low %v3268_v42, %v3275_v51  ;;  %v1644_v2 = vrot.slane %v4954_v7, %v4816_v33  ;;  %v1648_v3 = vrot.slane %v4954_v7, %v4819_v34 }
 0x2e0   : > { %v3291_v8 = vcombine.low %v3282_v59, %v3289_v61  ;;  %v1652_v6 = vrot.slane %v4954_v7, %v4822_v35  ;;  %v2866_v63 = vcombine.low %v1624_v19, %v1628_v60  ;;  %v2867_v9 = vcombine.low %v1632_v50, %v1636_v62 }
 0x2e1   : > { %3834 = vperm.xlu1 %4425, %v2865_v15   ;;  %v3298_v10 = vrot.slane %v3290_v1, %v4827_v39  ;;  %v2868_v12 = vcombine.low %v1640_v0, %v1644_v2  ;;  %v2040_v18 = vrot.slane %v5151_v26, %v4798_v24  ;;  %v2044_v13 = vrot.slane %v5151_v26, %v4804_v58 }
 0x2e2   : > { %v3305_v5 = vrot.slane %v3291_v8, %v4827_v39  ;;  %v2869_v14 = vcombine.low %v1648_v3, %v1652_v6  ;;  %v2876_v11 = vrot.slane %v2866_v63, %v4827_v39  ;;  %v2883_v16 = vrot.slane %v2867_v9, %v4827_v39 }
 0x2e3   : > { %v2890_v7 = vrot.slane %v2868_v12, %v4827_v39  ;;  %v2048_v4 = vrot.slane %v5151_v26, %v4807_v28  ;;  %v2052_v17 = vrot.slane %v5151_v26, %v4810_v30  ;;  %v2056_v48 = vrot.slane %v5151_v26, %v4813_v32 }
 0x2e4   : > { %v3306_v23 = vcombine.low %v3298_v10, %v3305_v5  ;;  %v2897_v54 = vrot.slane %v2869_v14, %v4827_v39  ;;  %v2898_v25 = vcombine.low %v2876_v11, %v2883_v16  ;;  %v2060_v31 = vrot.slane %v5151_v26, %v4816_v33 }
 0x2e5   : > { %v2064_v38 = vrot.slane %v5151_v26, %v4819_v34  ;;  %v2068_v40 = vrot.slane %v5151_v26, %v4822_v35  ;;  %v3503_v43 = vcombine.low %v2040_v18, %v2044_v13  ;;  %v3504_v36 = vcombine.low %v2048_v4, %v2052_v17 }
 0x2e6   : > { %3861 = vperm.xlu0 %4426, %v3306_v23   ;;  %v2899_v44 = vcombine.low %v2890_v7, %v2897_v54  ;;  %v2906_v41 = vrot.slane %v2898_v25, %v4827_v39  ;;  %v3505_v47 = vcombine.low %v2056_v48, %v2060_v31  ;;  %v5387_v49 = vadd.f32 %v4801_v27, %v1127_v22  ;;  %v1131_v48 = vpop.xlane.xlu0 %1130 }
 0x2e7   : > { %v3506_v56 = vcombine.low %v2064_v38, %v2068_v40  ;;  %v3513_v42 = vrot.slane %v3503_v43, %v4827_v39  ;;  %v3520_v19 = vrot.slane %v3504_v36, %v4827_v39  ;;  %v1656_v57 = vrot.slane %v4928_v45, %v4798_v24 }
 0x2e8   : > { %v2913_v26 = vrot.slane %v2899_v44, %v4827_v39  ;;  %v3527_v51 = vrot.slane %v3505_v47, %v4827_v39  ;;  %v1660_v59 = vrot.slane %v4928_v45, %v4804_v58  ;;  %v1664_v60 = vrot.slane %v4928_v45, %v4807_v28 }
 0x2e9   : > { %v3534_v61 = vrot.slane %v3506_v56, %v4827_v39  ;;  %v3535_v50 = vcombine.low %v3513_v42, %v3520_v19  ;;  %v1668_v62 = vrot.slane %v4928_v45, %v4810_v30  ;;  %v1672_v0 = vrot.slane %v4928_v45, %v4813_v32 }
 0x2ea   : > { %v2914_v15 = vcombine.low %v2906_v41, %v2913_v26  ;;  %v1676_v1 = vrot.slane %v4928_v45, %v4816_v33  ;;  %v1680_v2 = vrot.slane %v4928_v45, %v4819_v34  ;;  %v1684_v3 = vrot.slane %v4928_v45, %v4822_v35 }
 0x2eb   : > { %v3536_v8 = vcombine.low %v3527_v51, %v3534_v61  ;;  %v3543_v6 = vrot.slane %v3535_v50, %v4827_v39  ;;  %v2915_v63 = vcombine.low %v1656_v57, %v1660_v59  ;;  %v2916_v9 = vcombine.low %v1664_v60, %v1668_v62 }
 0x2ec   : > { %3837 = vperm.xlu1 %4425, %v2914_v15   ;;  %v2917_v10 = vcombine.low %v1672_v0, %v1676_v1  ;;  %v2918_v12 = vcombine.low %v1680_v2, %v1684_v3  ;;  %v1976_v18 = vrot.slane %v5199_v46, %v4798_v24  ;;  %v1980_v13 = vrot.slane %v5199_v46, %v4804_v58 }
 0x2ed   : > { %v3550_v5 = vrot.slane %v3536_v8, %v4827_v39  ;;  %v2925_v14 = vrot.slane %v2915_v63, %v4827_v39  ;;  %v2932_v45 = vrot.slane %v2916_v9, %v4827_v39  ;;  %v1984_v11 = vrot.slane %v5199_v46, %v4807_v28 }
 0x2ee   : > { %v2939_v16 = vrot.slane %v2917_v10, %v4827_v39  ;;  %v2946_v7 = vrot.slane %v2918_v12, %v4827_v39  ;;  %v1988_v4 = vrot.slane %v5199_v46, %v4810_v30  ;;  %v1992_v17 = vrot.slane %v5199_v46, %v4813_v32 }
 0x2ef   : > { %v3551_v22 = vcombine.low %v3543_v6, %v3550_v5  ;;  %v2947_v23 = vcombine.low %v2925_v14, %v2932_v45  ;;  %v1996_v54 = vrot.slane %v5199_v46, %v4816_v33  ;;  %v2000_v25 = vrot.slane %v5199_v46, %v4819_v34 }
 0x2f0   : > { %v2948_v31 = vcombine.low %v2939_v16, %v2946_v7  ;;  %v2004_v38 = vrot.slane %v5199_v46, %v4822_v35  ;;  %v3405_v40 = vcombine.low %v1976_v18, %v1980_v13  ;;  %v3406_v43 = vcombine.low %v1984_v11, %v1988_v4 }
 0x2f1   : > { %3876 = vperm.xlu0 %4426, %v3551_v22   ;;  %v2955_v36 = vrot.slane %v2947_v23, %v4827_v39  ;;  %v3407_v44 = vcombine.low %v1992_v17, %v1996_v54  ;;  %v5434_v41 = vadd.f32 %v4801_v27, %v1131_v48  ;;  %v1688_v47 = vrot.slane %v4933_v29, %v4798_v24 }
 0x2f2   : > { %v2962_v56 = vrot.slane %v2948_v31, %v4827_v39  ;;  %v3408_v42 = vcombine.low %v2000_v25, %v2004_v38  ;;  %v3415_v19 = vrot.slane %v3405_v40, %v4827_v39  ;;  %v3422_v57 = vrot.slane %v3406_v43, %v4827_v39 }
 0x2f3   : > { %v3429_v46 = vrot.slane %v3407_v44, %v4827_v39  ;;  %v1692_v26 = vrot.slane %v4933_v29, %v4804_v58  ;;  %v1696_v51 = vrot.slane %v4933_v29, %v4807_v28  ;;  %v1700_v27 = vrot.slane %v4933_v29, %v4810_v30 }
 0x2f4   : > { %v2963_v59 = vcombine.low %v2955_v36, %v2962_v56  ;;  %v3436_v60 = vrot.slane %v3408_v42, %v4827_v39  ;;  %v3437_v61 = vcombine.low %v3415_v19, %v3422_v57  ;;  %v1704_v50 = vrot.slane %v4933_v29, %v4813_v32 }
 0x2f5   : > { %v1708_v62 = vrot.slane %v4933_v29, %v4816_v33  ;;  %v1712_v0 = vrot.slane %v4933_v29, %v4819_v34  ;;  %v1716_v15 = vrot.slane %v4933_v29, %v4822_v35  ;;  %v2964_v1 = vcombine.low %v1688_v47, %v1692_v26 }
 0x2f6   : > { %3840 = vperm.xlu1 %4425, %v2963_v59   ;;  %v3438_v2 = vcombine.low %v3429_v46, %v3436_v60  ;;  %v3445_v3 = vrot.slane %v3437_v61, %v4827_v39  ;;  %v2965_v8 = vcombine.low %v1696_v51, %v1700_v27  ;;  %v2072_v6 = vrot.slane %v5106_v37, %v4798_v24 }
 0x2f7   : > { %v2966_v63 = vcombine.low %v1704_v50, %v1708_v62  ;;  %v2967_v9 = vcombine.low %v1712_v0, %v1716_v15  ;;  %v2974_v10 = vrot.slane %v2964_v1, %v4827_v39  ;;  %v2076_v12 = vrot.slane %v5106_v37, %v4804_v58 }
 0x2f8   : > { %v3452_v18 = vrot.slane %v3438_v2, %v4827_v39  ;;  %v2981_v29 = vrot.slane %v2965_v8, %v4827_v39  ;;  %v2080_v13 = vrot.slane %v5106_v37, %v4807_v28  ;;  %v2084_v5 = vrot.slane %v5106_v37, %v4810_v30 }
 0x2f9   : > { %v2988_v14 = vrot.slane %v2966_v63, %v4827_v39  ;;  %v2995_v45 = vrot.slane %v2967_v9, %v4827_v39  ;;  %v2088_v11 = vrot.slane %v5106_v37, %v4813_v32  ;;  %v2092_v16 = vrot.slane %v5106_v37, %v4816_v33 }
 0x2fa   : > { %v3453_v7 = vcombine.low %v3445_v3, %v3452_v18  ;;  %v2996_v4 = vcombine.low %v2974_v10, %v2981_v29  ;;  %v2096_v17 = vrot.slane %v5106_v37, %v4819_v34  ;;  %v2100_v48 = vrot.slane %v5106_v37, %v4822_v35 }
 0x2fb   : > { %v2997_v22 = vcombine.low %v2988_v14, %v2995_v45  ;;  %v3552_v23 = vcombine.low %v2072_v6, %v2076_v12  ;;  %v3553_v54 = vcombine.low %v2080_v13, %v2084_v5  ;;  %v3554_v25 = vcombine.low %v2088_v11, %v2092_v16 }
 0x2fc   : > { %3870 = vperm.xlu0 %4426, %v3453_v7   ;;  %v3004_v31 = vrot.slane %v2996_v4, %v4827_v39  ;;  %v3555_v38 = vcombine.low %v2096_v17, %v2100_v48  ;;  %v2008_v40 = vrot.slane %v5246_v52, %v4798_v24  ;;  %v2012_v43 = vrot.slane %v5246_v52, %v4804_v58 }
 0x2fd   : > { %v3011_v36 = vrot.slane %v2997_v22, %v4827_v39  ;;  %v3562_v44 = vrot.slane %v3552_v23, %v4827_v39  ;;  %v3569_v37 = vrot.slane %v3553_v54, %v4827_v39  ;;  %v3576_v47 = vrot.slane %v3554_v25, %v4827_v39 }
 0x2fe   : > { %v3583_v56 = vrot.slane %v3555_v38, %v4827_v39  ;;  %v2016_v42 = vrot.slane %v5246_v52, %v4807_v28  ;;  %v2020_v19 = vrot.slane %v5246_v52, %v4810_v30  ;;  %v2024_v57 = vrot.slane %v5246_v52, %v4813_v32 }
 0x2ff   : > { %v3012_v46 = vcombine.low %v3004_v31, %v3011_v36  ;;  %v3584_v26 = vcombine.low %v3562_v44, %v3569_v37  ;;  %v2028_v51 = vrot.slane %v5246_v52, %v4816_v33  ;;  %v2032_v27 = vrot.slane %v5246_v52, %v4819_v34 }
 0x300   : > { %v3585_v59 = vcombine.low %v3576_v47, %v3583_v56  ;;  %v2036_v60 = vrot.slane %v5246_v52, %v4822_v35  ;;  %v3454_v61 = vcombine.low %v2008_v40, %v2012_v43  ;;  %v3455_v50 = vcombine.low %v2016_v42, %v2020_v19 }
 0x301   : > { %3843 = vperm.xlu1 %4425, %v3012_v46   ;;  %v3592_v62 = vrot.slane %v3584_v26, %v4827_v39  ;;  %v3456_v0 = vcombine.low %v2024_v57, %v2028_v51  ;;  %v2168_v15 = vrot.slane %v5293_v55, %v4798_v24  ;;  %v2172_v1 = vrot.slane %v5293_v55, %v4804_v58 }
 0x302   : > { %v3599_v2 = vrot.slane %v3585_v59, %v4827_v39  ;;  %v3457_v3 = vcombine.low %v2032_v27, %v2036_v60  ;;  %v3464_v8 = vrot.slane %v3454_v61, %v4827_v39  ;;  %v3471_v6 = vrot.slane %v3455_v50, %v4827_v39 }
 0x303   : > { %v3478_v52 = vrot.slane %v3456_v0, %v4827_v39  ;;  %v2176_v63 = vrot.slane %v5293_v55, %v4807_v28  ;;  %v2180_v9 = vrot.slane %v5293_v55, %v4810_v30  ;;  %v2184_v10 = vrot.slane %v5293_v55, %v4813_v32 }
 0x304   : > { %v3600_v12 = vcombine.low %v3592_v62, %v3599_v2  ;;  %v3485_v18 = vrot.slane %v3457_v3, %v4827_v39  ;;  %v3486_v29 = vcombine.low %v3464_v8, %v3471_v6  ;;  %v2188_v13 = vrot.slane %v5293_v55, %v4816_v33 }
 0x305   : > { %v2192_v5 = vrot.slane %v5293_v55, %v4819_v34  ;;  %v2196_v14 = vrot.slane %v5293_v55, %v4822_v35  ;;  %v3699_v45 = vcombine.low %v2168_v15, %v2172_v1  ;;  %v3700_v11 = vcombine.low %v2176_v63, %v2180_v9 }
 0x306   : > { %3879 = vperm.xlu0 %4426, %v3600_v12   ;;  %v3487_v16 = vcombine.low %v3478_v52, %v3485_v18  ;;  %v3494_v7 = vrot.slane %v3486_v29, %v4827_v39  ;;  %v3701_v4 = vcombine.low %v2184_v10, %v2188_v13  ;;  %v2104_v17 = vrot.slane %v5339_v53, %v4798_v24 }
 0x307   : > { %v3702_v48 = vcombine.low %v2192_v5, %v2196_v14  ;;  %v3709_v22 = vrot.slane %v3699_v45, %v4827_v39  ;;  %v3716_v23 = vrot.slane %v3700_v11, %v4827_v39  ;;  %v2108_v54 = vrot.slane %v5339_v53, %v4804_v58 }
 0x308   : > { %v3501_v55 = vrot.slane %v3487_v16, %v4827_v39  ;;  %v3723_v25 = vrot.slane %v3701_v4, %v4827_v39  ;;  %v2112_v31 = vrot.slane %v5339_v53, %v4807_v28  ;;  %v2116_v38 = vrot.slane %v5339_v53, %v4810_v30 }
 0x309   : > { %v3730_v40 = vrot.slane %v3702_v48, %v4827_v39  ;;  %v3731_v43 = vcombine.low %v3709_v22, %v3716_v23  ;;  %v2120_v36 = vrot.slane %v5339_v53, %v4813_v32  ;;  %v2124_v44 = vrot.slane %v5339_v53, %v4816_v33 }
 0x30a   : > { %v3502_v37 = vcombine.low %v3494_v7, %v3501_v55  ;;  %v2128_v47 = vrot.slane %v5339_v53, %v4819_v34  ;;  %v2132_v56 = vrot.slane %v5339_v53, %v4822_v35  ;;  %v3601_v42 = vcombine.low %v2104_v17, %v2108_v54 }
 0x30b   : > { %v3732_v19 = vcombine.low %v3723_v25, %v3730_v40  ;;  %v3739_v57 = vrot.slane %v3731_v43, %v4827_v39  ;;  %v3602_v46 = vcombine.low %v2112_v31, %v2116_v38  ;;  %v3603_v26 = vcombine.low %v2120_v36, %v2124_v44 }
 0x30c   : > { %3873 = vperm.xlu0 %4426, %v3502_v37   ;;  %v3604_v51 = vcombine.low %v2128_v47, %v2132_v56  ;;  %v3611_v27 = vrot.slane %v3601_v42, %v4827_v39  ;;  %v2136_v59 = vrot.slane %v5387_v49, %v4798_v24  ;;  %v2140_v60 = vrot.slane %v5387_v49, %v4804_v58  ;;  %v3805_v47 = vpop.permute.xlu1 %3804 }
 0x30d   : > { %v3746_v61 = vrot.slane %v3732_v19, %v4827_v39  ;;  %v3618_v53 = vrot.slane %v3602_v46, %v4827_v39  ;;  %v3625_v50 = vrot.slane %v3603_v26, %v4827_v39  ;;  %v2144_v62 = vrot.slane %v5387_v49, %v4807_v28  ;;  %v3799_v46 = vpop.permute.xlu0 %3798 }
 0x30e   : > { %v3632_v0 = vrot.slane %v3604_v51, %v4827_v39  ;;  %v2148_v15 = vrot.slane %v5387_v49, %v4810_v30  ;;  %v2152_v1 = vrot.slane %v5387_v49, %v4813_v32  ;;  %v2156_v2 = vrot.slane %v5387_v49, %v4816_v33 }
 0x30f   : > { %v3747_v3 = vcombine.low %v3739_v57, %v3746_v61  ;;  %v3633_v8 = vcombine.low %v3611_v27, %v3618_v53  ;;  %v2160_v6 = vrot.slane %v5387_v49, %v4819_v34  ;;  %v2164_v52 = vrot.slane %v5387_v49, %v4822_v35 }
 0x310   : > { %v3634_v63 = vcombine.low %v3625_v50, %v3632_v0  ;;  %v3650_v9 = vcombine.low %v2136_v59, %v2140_v60  ;;  %v3651_v10 = vcombine.low %v2144_v62, %v2148_v15  ;;  %v3652_v12 = vcombine.low %v2152_v1, %v2156_v2  ;;  %v5598_v56 = vpop.permute.xlu1 %3807 }
 0x311   : > { %3888 = vperm.xlu0 %4426, %v3747_v3   ;;  %v3641_v18 = vrot.slane %v3633_v8, %v4827_v39  ;;  %v3653_v29 = vcombine.low %v2160_v6, %v2164_v52  ;;  %v2200_v13 = vrot.slane %v5434_v41, %v4798_v24  ;;  %v2204_v5 = vrot.slane %v5434_v41, %v4804_v58 }
 0x312   : > { %v3648_v14 = vrot.slane %v3634_v63, %v4827_v39  ;;  %v3660_v45 = vrot.slane %v3650_v9, %v4827_v39  ;;  %v3667_v49 = vrot.slane %v3651_v10, %v4827_v39  ;;  %v3674_v11 = vrot.slane %v3652_v12, %v4827_v39 }
 0x313   : > { %v3681_v16 = vrot.slane %v3653_v29, %v4827_v39  ;;  %v2208_v7 = vrot.slane %v5434_v41, %v4807_v28  ;;  %v2212_v4 = vrot.slane %v5434_v41, %v4810_v30  ;;  %v2216_v24 = vrot.slane %v5434_v41, %v4813_v32 }
 0x314   : > { %v3649_v58 = vcombine.low %v3641_v18, %v3648_v14  ;;  %v3682_v17 = vcombine.low %v3660_v45, %v3667_v49  ;;  %v2220_v48 = vrot.slane %v5434_v41, %v4816_v33  ;;  %v2224_v22 = vrot.slane %v5434_v41, %v4819_v34  ;;  %v3802_v42 = vpop.permute.xlu1 %3801 }
 0x315   : > { %v3683_v23 = vcombine.low %v3674_v11, %v3681_v16  ;;  %v2228_v54 = vrot.slane %v5434_v41, %v4822_v35  ;;  %v3748_v55 = vcombine.low %v2200_v13, %v2204_v5  ;;  %v3749_v28 = vcombine.low %v2208_v7, %v2212_v4 }
 0x316   : > { %3882 = vperm.xlu0 %4426, %v3649_v58   ;;  %v3690_v30 = vrot.slane %v3682_v17, %v4827_v39  ;;  %v3750_v25 = vcombine.low %v2216_v24, %v2220_v48  ;;  %v5621_v3 = vand.u32 127, %v1137_v20 }
 0x317   : > { %v3697_v32 = vrot.slane %v3683_v23, %v4827_v39  ;;  %v3751_v31 = vcombine.low %v2224_v22, %v2228_v54  ;;  %v3758_v38 = vrot.slane %v3748_v55, %v4827_v39  ;;  %v3765_v33 = vrot.slane %v3749_v28, %v4827_v39 }
 0x318   : > { %v3772_v34 = vrot.slane %v3750_v25, %v4827_v39  ;;  %v5600_v19 = vpop.permute.xlu1 %3816  ;;  %v3899_v8 = vadd.s32 4294967288, %v5621_v3  ;;  %v3906_v9 = vadd.s32 4294967280, %v5621_v3  ;;  %v3897_v10 = vsub.s32 %v5621_v3, %v4795_v21 }
 0x319   : > { %v3698_v40 = vcombine.low %v3690_v30, %v3697_v32  ;;  %v3779_v43 = vrot.slane %v3751_v31, %v4827_v39  ;;  %v3780_v35 = vcombine.low %v3758_v38, %v3765_v33  ;;  %v3913_v29 = vadd.s32 4294967272, %v5621_v3 }
 0x31a   : > { %v3902_v63 = vsub.s32 %v3899_v8, %v4795_v21  ;;  %v3909_v5 = vsub.s32 %v3906_v9, %v4795_v21  ;;  %v3920_v45 = vadd.s32 4294967264, %v5621_v3  ;;  %v3927_v7 = vadd.s32 4294967256, %v5621_v3 }
 0x31b   : > { %3885 = vperm.xlu0 %4426, %v3698_v40   ;;  %v3781_v41 = vcombine.low %v3772_v34, %v3779_v43  ;;  %v3788_v36 = vrot.slane %v3780_v35, %v4827_v39  ;;  %v3916_v11 = vsub.s32 %v3913_v29, %v4795_v21  ;;  %v3898_v58 = vrot.slane %v3799_v46, %v3897_v10 }
 0x31c   : > { %v5602_v57 = vpop.permute.xlu1 %3810  ;;  %v3903_v16 = vrot.slane %v3802_v42, %v3902_v63  ;;  %v3923_v48 = vsub.s32 %v3920_v45, %v4795_v21  ;;  %v3930_v23 = vsub.s32 %v3927_v7, %v4795_v21  ;;  %v3910_v55 = vrot.slane %v3805_v47, %v3909_v5 }
 0x31d   : > { %v3795_v44 = vrot.slane %v3781_v41, %v4827_v39  ;;  %v3934_v28 = vadd.s32 4294967248, %v5621_v3  ;;  %v3941_v32 = vadd.s32 4294967240, %v5621_v3  ;;  %v3948_v40 = vadd.s32 4294967232, %v5621_v3 }
 0x31e   : > { %v3905_v22 = vsel %vm3904_vm1, %v3903_v16, %v3898_v58  ;;  %v3924_v34 = vrot.slane %v5602_v57, %v3923_v48  ;;  %v3917_v35 = vrot.slane %v5598_v56, %v3916_v11  ;;  %v3976_v29 = vadd.s32 4294967200, %v5621_v3 }
 0x31f   : > { %v3796_v37 = vcombine.low %v3788_v36, %v3795_v44  ;;  %v3912_v33 = vsel %vm3911_vm2, %v3910_v55, %v3905_v22  ;;  %v3955_v36 = vadd.s32 4294967224, %v5621_v3  ;;  %v3937_v44 = vsub.s32 %v3934_v28, %v4795_v21 }
 0x320   : > { %v5604_v26 = vpop.permute.xlu1 %3819  ;;  %v3944_v47 = vsub.s32 %v3941_v32, %v4795_v21  ;;  %v3951_v46 = vsub.s32 %v3948_v40, %v4795_v21  ;;  %v3979_v7 = vsub.s32 %v3976_v29, %v4795_v21 }
 0x321   : > { %3891 = vperm.xlu0 %4426, %v3796_v37   ;;  %v3919_v37 = vsel %vm3918_vm3, %v3917_v35, %v3912_v33 }
 0x322   : > { %v3926_v57 = vsel %vm3925_vm4, %v3924_v34, %v3919_v37 }
 0x324   : > { %v5606_v27 = vpop.permute.xlu1 %3813 }
 0x325   : > { %v3931_v41 = vrot.slane %v5606_v27, %v3930_v23 }
 0x327   : > { %v3933_v27 = vsel %vm3932_vm5, %v3931_v41, %v3926_v57 }
 0x328   : > { %v5608_v60 = vpop.permute.xlu1 %3828 }
 0x32c   : > { %v5612_v53 = vpop.permute.xlu1 %3822 }
 0x32f   : > { %v3853_v51 = vpop.permute.xlu0 %3852 }
 0x330   : > { %v4016_v49 = vrot.slane %v3853_v51, %v3909_v5  ;;  %v3983_v5 = vadd.s32 4294967192, %v5621_v3 }
 0x335   : > { %v5614_v62 = vpop.permute.xlu1 %3831 }
 0x33a   : > { %v3856_v59 = vpop.permute.xlu0 %3855 }
 0x33b   : > { %v4021_v17 = vrot.slane %v3856_v59, %v3916_v11  ;;  %v3997_v11 = vadd.s32 4294967176, %v5621_v3 }
 0x33d   : > { %v4000_v28 = vsub.s32 %v3997_v11, %v4795_v21 }
 0x340   : > { %v5618_v15 = vpop.permute.xlu1 %3825 }
 0x345   : > { %v5610_v61 = vpop.permute.xlu0 %3864 }
 0x346   : > { %v4036_v51 = vrot.slane %v5610_v61, %v3937_v44 }
 0x34a   : > { %v3847_v2 = vpop.permute.xlu1 %3846 }
 0x34b   : > { %v4007_v13 = vrot.slane %v3847_v2, %v3897_v10  ;;  %v3962_v2 = vadd.s32 4294967216, %v5621_v3 }
 0x350   : > { %v3859_v50 = vpop.permute.xlu0 %3858 }
 0x351   : > { %v4026_v30 = vrot.slane %v3859_v50, %v3923_v48  ;;  %v3958_v50 = vsub.s32 %v3955_v36, %v4795_v21  ;;  %v3986_v48 = vsub.s32 %v3983_v5, %v4795_v21 }
 0x355   : > { %v3850_v52 = vpop.permute.xlu1 %3849 }
 0x356   : > { %v4011_v12 = vrot.slane %v3850_v52, %v3902_v63  ;;  %v3945_v63 = vrot.slane %v5604_v26, %v3944_v47  ;;  %v3965_v26 = vsub.s32 %v3962_v2, %v4795_v21 }
 0x358   : > { %v4012_v14 = vsel %vm3904_vm1, %v4011_v12, %v4007_v13  ;;  %v3952_v12 = vrot.slane %v5612_v53, %v3951_v46  ;;  %v3969_v13 = vadd.s32 4294967208, %v5621_v3  ;;  %v3966_v22 = vrot.slane %v5608_v60, %v3965_v26 }
 0x359   : > { %v4017_v24 = vsel %vm3911_vm2, %v4016_v49, %v4012_v14 }
 0x35a   : > { %v5616_v0 = vpop.permute.xlu0 %3867  ;;  %v4022_v54 = vsel %vm3918_vm3, %v4021_v17, %v4017_v24  ;;  %v3972_v58 = vsub.s32 %v3969_v13, %v4795_v21 }
 0x35b   : > { %v4027_v43 = vsel %vm3925_vm4, %v4026_v30, %v4022_v54  ;;  %v4041_v61 = vrot.slane %v5616_v0, %v3944_v47  ;;  %v3990_v0 = vadd.s32 4294967184, %v5621_v3 }
 0x35c   : > { %v3973_v33 = vrot.slane %v5614_v62, %v3972_v58 }
 0x360   : > { %v5644_v25 = vpop.permute.xlu1 %3834 }
 0x365   : > { %v3862_v1 = vpop.permute.xlu0 %3861 }
 0x366   : > { %v4031_v31 = vrot.slane %v3862_v1, %v3930_v23  ;;  %v3938_v1 = vrot.slane %v5600_v19, %v3937_v44  ;;  %v3959_v19 = vrot.slane %v5618_v15, %v3958_v50  ;;  %v3993_v23 = vsub.s32 %v3990_v0, %v4795_v21 }
 0x368   : > { %v4032_v42 = vsel %vm3932_vm5, %v4031_v31, %v4027_v43  ;;  %v3940_v10 = vsel %vm3939_vm6, %v3938_v1, %v3933_v27 }
 0x369   : > { %v4037_v8 = vsel %vm3939_vm6, %v4036_v51, %v4032_v42  ;;  %v3947_v53 = vsel %vm3946_vm7, %v3945_v63, %v3940_v10 }
 0x36a   : > { %v3954_v15 = vsel %vm3953_vm8, %v3952_v12, %v3947_v53 }
 0x36b   : > { %v5660_v59 = vpop.permute.xlu1 %3837  ;;  %v3961_v17 = vsel %vm3960_vm9, %v3959_v19, %v3954_v15 }
 0x36c   : > { %v3968_v31 = vsel %vm3967_vm10, %v3966_v22, %v3961_v17  ;;  %v3987_v60 = vrot.slane %v5660_v59, %v3986_v48 }
 0x36d   : > { %v3975_v35 = vsel %vm3974_vm11, %v3973_v33, %v3968_v31 }
 0x370   : > { %v5624_v6 = vpop.permute.xlu0 %3876 }
 0x371   : > { %v4056_v24 = vrot.slane %v5624_v6, %v3965_v26  ;;  %v3980_v6 = vrot.slane %v5644_v25, %v3979_v7 }
 0x373   : > { %v3982_v41 = vsel %vm3981_vm12, %v3980_v6, %v3975_v35 }
 0x374   : > { %v3989_v44 = vsel %vm3988_vm13, %v3987_v60, %v3982_v41 }
 0x375   : > { %v3841_v45 = vpop.permute.xlu1 %3840 }
 0x376   : > { %v3994_v40 = vrot.slane %v3841_v45, %v3993_v23 }
 0x378   : > { %v3996_v37 = vsel %vm3995_vm14, %v3994_v40, %v3989_v44 }
 0x37b   : > { %v5630_v18 = vpop.permute.xlu0 %3870 }
 0x37c   : > { %v4046_v52 = vrot.slane %v5630_v18, %v3951_v46  ;;  %v4042_v18 = vsel %vm3946_vm7, %v4041_v61, %v4037_v8 }
 0x37e   : > { %v4047_v49 = vsel %vm3953_vm8, %v4046_v52, %v4042_v18 }
 0x385   : > { %v5637_v4 = vpop.permute.xlu0 %3879 }
 0x386   : > { %v4061_v30 = vrot.slane %v5637_v4, %v3972_v58 }
 0x38b   : > { %v3874_v38 = vpop.permute.xlu0 %3873 }
 0x38c   : > { %v4051_v9 = vrot.slane %v3874_v38, %v3958_v50  ;;  %v3844_v38 = vpop.permute.xlu1 %3843 }
 0x38d   : > { %v4001_v21 = vrot.slane %v3844_v38, %v4000_v28 }
 0x38e   : > { %v4052_v16 = vsel %vm3960_vm9, %v4051_v9, %v4047_v49 }
 0x38f   : > { %v4057_v54 = vsel %vm3967_vm10, %v4056_v24, %v4052_v16  ;;  %v4003_v42 = vsel %vm4002_vm15, %v4001_v21, %v3996_v37 }
 0x390   : > { %v5662_v56 = vpop.permute.xlu0 %3888  ;;  %v4062_v34 = vsel %vm3974_vm11, %v4061_v30, %v4057_v54 }
 0x391   : > { %v4076_v25 = vrot.slane %v5662_v56, %v3993_v23 }
 0x395   : > { %v3883_v14 = vpop.permute.xlu0 %3882 }
 0x396   : > { %v4066_v55 = vrot.slane %v3883_v14, %v3979_v7 }
 0x398   : > { %v4067_v43 = vsel %vm3981_vm12, %v4066_v55, %v4062_v34 }
 0x39a   : > { %v3886_v3 = vpop.permute.xlu0 %3885 }
 0x39b   : > { %v4071_v32 = vrot.slane %v3886_v3, %v3986_v48 }
 0x39d   : > { %v4072_v4 = vsel %vm3988_vm13, %v4071_v32, %v4067_v43 }
 0x39e   : > { %v4077_v47 = vsel %vm3995_vm14, %v4076_v25, %v4072_v4 }
 0x3a0   : > { %v3892_v36 = vpop.permute.xlu0 %3891 }
 0x3a1   : > { %v4081_v62 = vrot.slane %v3892_v36, %v4000_v28 }
 0x3a3   : > { %v4082_v57 = vsel %vm4002_vm15, %v4081_v62, %v4077_v47 }
 0x3a4   : > { %v4083_v46 = vcombine.low %v4003_v42, %v4082_v57  ;;  %4111 = sbr.rel (!%p4601_p5) target bundleno = 966 (0x3c6), region = 52 }
 0x3a6   : > { %v4090_v51 = vrot.slane %v4083_v46, %v4827_v39 }
 0x3a8   : > { %v4097_v59 = vrot.slane %v4090_v51, %v4827_v39 }
 0x3aa   : > { %4103 = vst.msk [vmem:[%s286_s20] sm:$0x3] %vm4101_vm0, %v4097_v59 }
 0x3ab   : > { %s5770_s23 = smov (!%p4114_p11, %s4113_s23), 2 }
 0x3ac   : > { %s5706_s24 = sshll.u32 %s5770_s23, 4 }
 0x3ad   : > { %s4118_s25 = ssub.s32 32, %s5706_s24 }
 0x3ae   : > { %4119 = vsyncadd %s5701_s21, %s4118_s25  ;;  %p4238_p12 = scmp.ne.s32.totalorder %s5706_s24, 0  ;;  %s5715_s12 = scalar_lea.hbm %s5762_s7, %s4615_s16 }
 0x3af   : > { %s4124_s9 = sshll.u32 %s286_s20, 4  ;;  %s4519_s14 = smov [#allocation3]   ;;  %s4125_s9 = int_to_ptr.vmem [resolvable:$true] %s4124_s9 }
 0x3b0   : > { %s4453_s6 = scalar_lea.vmem %s4125_s9, %s5706_s24  ;;  %s4457_s15 = sshll.u32 %s4519_s14, 4  ;;  %s4458_s15 = int_to_ptr.vmem [resolvable:$false] %s4457_s15 }
 0x3b1   : > { %p4454_p13 = scmp.ne.s32.totalorder %s4125_s9, %s4453_s6  ;;  %s4459_s17 = scalar_lea.vmem %s4458_s15, 64 }
 0x3b2   : > { %p4460_p2 = scmp.lt.s32.totalorder %s4125_s9, %s4458_s15  ;;  %p4461_p3 = scmp.lt.s32.totalorder %s4459_s17, %s4453_s6 }
 0x3b3   : > { %p4455_p0 = pnand %p4454_p13, %p4238_p12 }
 0x3b4   : > { %p4462_p4 = por %p4461_p3, %p4460_p2 }
 0x3b5   : > { %p4456_p1 = pneg %p4455_p0 }
 0x3b7   : > { %p4463_p5 = pnand %p4462_p4, %p4456_p1 }
 0x3b9   : > { %4466 = shalt.err (!%p4463_p5)
}
 0x3ba   : > { %s4467_s16 = scalar_lea.hbm %s5715_s12, %s5706_s24  ;;  %s4471_s20 = scalar_lea.hbm %s5762_s7, 48 }
 0x3bb   : > { %p4468_p7 = scmp.ne.s32.totalorder %s5715_s12, %s4467_s16  ;;  %p4472_p10 = scmp.lt.u32.totalorder %s5715_s12, %s5762_s7 }
 0x3bc   : > { %p4473_p11 = scmp.lt.u32.totalorder %s4471_s20, %s4467_s16  ;;  %p4475_p0 = scmp.lt.u32.totalorder %s4467_s16, %s5715_s12 }
 0x3bd   : > { %p4469_p8 = pnand %p4468_p7, %p4238_p12 }
 0x3be   : > { %p4474_p13 = por %p4473_p11, %p4472_p10 }
 0x3bf   : > { %p4470_p9 = pneg %p4469_p8 }
 0x3c0   : > { %p4476_p1 = por %p4475_p0, %p4474_p13 }
 0x3c2   : > { %p4477_p2 = pnand %p4476_p1, %p4470_p9 }
 0x3c4   : > { %4480 = shalt.err (!%p4477_p2)
}
 0x3c5   : > { %4127 = dma.vmem_to_hbm [thread:$0]  (%p4238_p12), %s4125_s9, %s5706_s24, %s5715_s12, %s5701_s21  }
 0x3c6 PF: > { %p4390_p3 = scmp.ge.s32.totalorder %s4515_s29, 2  ;;  %s4136_s25 = sand.u32 1, %s4503_s26  }
 0x3c7   : > { %s4137_s30 = scalar_lea.sflag [#allocation4], %s4136_s25 }
 0x3c8   : > { %p4387_p4 = pnand %p4390_p3, %p4605_p6 }
 0x3ca   : > { %4498 = dma.done.wait (!%p4387_p4), %s4137_s30, 32  }
 0x3cb   : > { %4500 = vsyncadd (!%p4387_p4), %s4137_s30, 4294967264  ;;  %p19_p5 = scmp.ge.s32.totalorder %s4588_s8, 4   ;;  %s5765_s26 = smov %s4507_s27 }
 0x3cc   : > { %s5766_s27 = smov %s4511_s28  ;;  %s5767_s28 = smov %s4599_s11 }
 0x3cd   : > { %s5768_s29 = smov %s4588_s8  ;;  %21 = sbr.rel (!%p19_p5) target bundleno = 6 (0x6), region = 83 }
 0x3d4   :  { %4142 = vsyncpa [#allocation4], 1 }
 0x3d5   :  { %4144 = vsyncpa [#allocation4 + $0x1], 1 }

// kernel: tpu_custom_call.1
= control target key start
LH: loop header
LB: loop body
LE: loop exit
PB: predicated region body
PF: predicated region fallthrough
CT: control target
= control target key end

     0   :  { %s2450_s0 = inlined_call_operand.vmem [shape: bf16[320,32], index: 0, kind: input, shape index: {}]   ;;  %s2451_s1 = inlined_call_operand.vmem [shape: bf16[32,128], index: 1, kind: input, shape index: {}]   ;;  %s2452_s2 = inlined_call_operand.vmem [shape: f32[1,128], index: 2, kind: input, shape index: {}]   ;;  %s2453_s3 = inlined_call_operand.vmem [shape: bf16[128,128], index: 3, kind: input, shape index: {}]   ;;  %s2454_s4 = inlined_call_operand.vmem [shape: f32[1,128], index: 4, kind: input, shape index: {}]   ;;  %s2455_s5 = inlined_call_operand.vmem [shape: f32[1,128], index: 5, kind: input, shape index: {}]   ;;  %s2456_s6 = inlined_call_operand.<no memory space> [shape: f32[1,1], index: 6, kind: input, shape index: {}]   ;;  %s2457_s7 = inlined_call_operand.vmem [shape: f32[320,1], index: 7, kind: output, shape index: {}]  }
   0x1   :  { %v12_v0 = vstv %s2456_s6 }
   0x2   :  { %13 = vst [vmem:[#allocation2] sm:$0x1] %v12_v0 }
   0x3   :  { %s1998_s26 = smov 0   ;;  %s2000_s27 = smov 0  }
   0x4   :  { %s2002_s28 = smov 0  }
   0x5 LB: > { %s2011_s6 = sadd.s32 4294967295, %s1921_s28   ;;  %s2013_s29 = sadd.s32 1, %s1921_s28   ;;  %s1921_s28 = sphi %s2002_s28, %s2466_s28   ;;  %s1917_s27 = sphi %s2000_s27, %s2465_s27   ;;  %s1913_s26 = sphi %s1998_s26, %s2464_s26  }
   0x6   : > { %s175_s30 = ssub.s32 %s1921_s28, %s2013_s29  ;;  %s178_s8 = sadd.s32 1, %s1917_s27 }
   0x7   : > { %p176_p0 = scmp.eq.s32.totalorder %s175_s30, 0  ;;  %p188_p1 = scmp.ne.s32.totalorder %s1917_s27, %s1913_s26 }
   0x8   : > { %p189_p2 = scmp.eq.s32.totalorder %s2011_s6, 1  ;;  %p1541_p3 = scmp.ge.s32.totalorder %s1921_s28, 1 }
   0x9   : > { %s2021_s9 = scalar_select %p176_p0, %s1917_s27, %s178_s8  }
   0xa   : > { %p2023_p4 = por %p189_p2, %p188_p1  ;;  %p248_p5 = scmp.lt.s32.totalorder %s1921_s28, 3 }
   0xc   : > { %p249_p6 = pnand %p1541_p3, %p248_p5 }
   0xd   : > { %v1841_v1 = vld [vmem:[%s2451_s1] sm:$0xff] (!%p249_p6)   ;;  %s2031_s13 = sshll.u32 (!%p249_p6), %s2011_s6, 5  ;;  %v1842_v2 = vld [vmem:[%s2451_s1 + $0x8] sm:$0xff] (!%p249_p6)   ;;  %vm438_vm0 = vcmask (!%p249_p6), 261120   ;;  %v1861_v5 = vld [vmem:[%s2453_s3 + $0x10] sm:$0xff] (!%p249_p6)   ;;  %s280_s28 = sand.u32 (!%p249_p6), 1, %s1913_s26  }
   0xe   : > { %252 = sbr.rel (%p249_p6) target bundleno = 735 (0x2df), region = 48  ;;  %p288_p7 = scmp.lt.s32.totalorder (!%p249_p6), %s2031_s13, 39  ;;  %1653 = vmatprep.subr.bf16.mxu0 (!%p249_p6), %v1841_v1  ;;  %v1859_v3 = vld [vmem:[%s2453_s3] sm:$0xff] (!%p249_p6)   ;;  %v1860_v4 = vld [vmem:[%s2453_s3 + $0x8] sm:$0xff] (!%p249_p6)   ;;  %v1862_v9 = vld [vmem:[%s2453_s3 + $0x18] sm:$0xff] (!%p249_p6)   ;;  %vm1166_vm1 = vcmask (!%p249_p6), 7168  }
   0xf   : > { %1654 = vmatpush3.bf16.msra.mxu0 (!%p249_p6), %v1841_v1  ;;  %1737 = vmatprep.subr.bf16.mxu1 (!%p249_p6), %v1859_v3  ;;  %v1863_v12 = vld [vmem:[%s2453_s3 + $0x20] sm:$0xff] (!%p249_p6)   ;;  %v1864_v15 = vld [vmem:[%s2453_s3 + $0x28] sm:$0xff] (!%p249_p6)   ;;  %v1865_v16 = vld [vmem:[%s2453_s3 + $0x30] sm:$0xff] (!%p249_p6)   ;;  %s1542_s30 = sshll.u32 (!%p249_p6), %s280_s28, 8 }
  0x10   : > { %1655 = vmatprep.subr.bf16.mxu0 (!%p249_p6), %v1842_v2  ;;  %1745 = vmatpush3.bf16.msra.mxu1 (!%p249_p6), %v1859_v3  ;;  %v1866_v26 = vld [vmem:[%s2453_s3 + $0x38] sm:$0xff] (!%p249_p6)   ;;  %v2102_v27 = vld [vmem:[%s2452_s2] ss:$0 sm:$0xff] (!%p249_p6)  ;;  %s2215_s8 = scalar_lea.vmem (!%p249_p6), [#allocation3], %s1542_s30  }
  0x11   : > { %1738 = vmatprep.subr.bf16.mxu1 (!%p249_p6), %v1860_v4 }
  0x13   : > { %1656 = vmatpush3.bf16.msra.mxu0 (!%p249_p6), %v1842_v2 }
  0x14   : > { %1689 = vmatprep.subr.bf16.mxu0 (!%p249_p6), %v1859_v3  ;;  %1746 = vmatpush3.bf16.msra.mxu1 (!%p249_p6), %v1860_v4 }
  0x15   : > { %s289_s18 = scalar_select %p288_p7, %s2031_s13, 39  ;;  %1739 = vmatprep.subr.bf16.mxu1 %v1861_v5 }
  0x16   : > { %s1207_s26 = ssub.s32 (%p2023_p4), 40, %s2031_s13  ;;  %s1608_s11 = sshll.u32 (%p2023_p4), %s2011_s6, 8 }
  0x17   : > { %s1544_s21 = sshll.u32 %s289_s18, 2  ;;  %p1208_p8 = scmp.lt.s32.totalorder (%p2023_p4), %s1207_s26, 32 }
  0x18   : > { %s2047_s24 = scalar_lea.vmem %s2450_s0, %s1544_s21  ;;  %1747 = vmatpush3.bf16.msra.mxu1 %v1861_v5  ;;  %s2318_s15 = scalar_lea.vmem (%p2023_p4), %s2457_s7, %s1608_s11  }
  0x19   : > { %v1843_v6 = vld [vmem:[%s2047_s24] sm:$0xff]   ;;  %v1844_v7 = vld [vmem:[%s2047_s24 + $0x8] sm:$0xff]   ;;  %v1845_v8 = vld [vmem:[%s2047_s24 + $0x10] sm:$0xff]   ;;  %1740 = vmatprep.subr.bf16.mxu1 %v1862_v9 }
  0x1a   : > { %1657 = vmatprep.mubr.msk.bf16.mxu0 %vm438_vm0, %v1843_v6  ;;  %v1846_v10 = vld [vmem:[%s2047_s24 + $0x18] sm:$0xff]   ;;  %v1847_v11 = vld [vmem:[%s2047_s24 + $0x20] sm:$0xff]   ;;  %v1848_v13 = vld [vmem:[%s2047_s24 + $0x28] sm:$0xff]  }
  0x1b   : > { %1658 = vmatmul.mubr.msk.bf16.vlgmr.msra.gmra.mrb[0].mxu0 %vm438_vm0, %v1844_v7  ;;  %v1849_v14 = vld [vmem:[%s2047_s24 + $0x30] sm:$0xff]   ;;  %v1850_v17 = vld [vmem:[%s2047_s24 + $0x38] sm:$0xff]   ;;  %v1851_v18 = vld [vmem:[%s2047_s24 + $0x40] sm:$0xff]  }
  0x1c   : > { %1661 = vmatprep.mubr.msk.bf16.mxu0 %vm438_vm0, %v1845_v8  ;;  %1690 = vmatpush3.bf16.msra.mxu0 %v1859_v3  ;;  %v1852_v19 = vld [vmem:[%s2047_s24 + $0x48] sm:$0xff]   ;;  %v1853_v20 = vld [vmem:[%s2047_s24 + $0x50] sm:$0xff]   ;;  %v1854_v21 = vld [vmem:[%s2047_s24 + $0x58] sm:$0xff]  }
  0x1d   : > { %1691 = vmatprep.subr.bf16.mxu0 %v1860_v4  ;;  %1748 = vmatpush3.bf16.msra.mxu1 %v1862_v9  ;;  %v1855_v22 = vld [vmem:[%s2047_s24 + $0x60] sm:$0xff]   ;;  %v1856_v23 = vld [vmem:[%s2047_s24 + $0x68] sm:$0xff]   ;;  %v1857_v24 = vld [vmem:[%s2047_s24 + $0x70] sm:$0xff]  }
  0x1e   : > { %1741 = vmatprep.subr.bf16.mxu1 %v1863_v12  ;;  %v1858_v25 = vld [vmem:[%s2047_s24 + $0x78] sm:$0xff]  }
  0x20   : > { %1692 = vmatpush3.bf16.msra.mxu0 %v1860_v4 }
  0x21   : > { %1693 = vmatprep.subr.bf16.mxu0 %v1861_v5  ;;  %1749 = vmatpush3.bf16.msra.mxu1 %v1863_v12 }
  0x22   : > { %1742 = vmatprep.subr.bf16.mxu1 %v1864_v15 }
  0x23   : > { %1662 = vmatmul.mubr.msk.bf16.gmra.mrb[4].mxu0 %vm438_vm0, %v1846_v10 }
  0x24   : > { %1665 = vmatprep.mubr.msk.bf16.mxu0 %vm438_vm0, %v1847_v11  ;;  %1694 = vmatpush3.bf16.msra.mxu0 %v1861_v5 }
  0x25   : > { %1695 = vmatprep.subr.bf16.mxu0 %v1862_v9  ;;  %1750 = vmatpush3.bf16.msra.mxu1 %v1864_v15 }
  0x26   : > { %1743 = vmatprep.subr.bf16.mxu1 %v1865_v16 }
  0x28   : > { %1696 = vmatpush3.bf16.msra.mxu0 %v1862_v9 }
  0x29   : > { %1697 = vmatprep.subr.bf16.mxu0 %v1863_v12  ;;  %1751 = vmatpush3.bf16.msra.mxu1 %v1865_v16 }
  0x2a   : > { %1744 = vmatprep.subr.bf16.mxu1 %v1866_v26 }
  0x2b   : > { %1666 = vmatmul.mubr.msk.bf16.gmra.mrb[8].mxu0 %vm438_vm0, %v1848_v13 }
  0x2c   : > { %1669 = vmatprep.mubr.msk.bf16.mxu0 %vm438_vm0, %v1849_v14  ;;  %1698 = vmatpush3.bf16.msra.mxu0 %v1863_v12 }
  0x2d   : > { %1699 = vmatprep.subr.bf16.mxu0 %v1864_v15  ;;  %1752 = vmatpush3.bf16.msra.mxu1 %v1866_v26 }
  0x30   : > { %1700 = vmatpush3.bf16.msra.mxu0 %v1864_v15 }
  0x31   : > { %1701 = vmatprep.subr.bf16.mxu0 %v1865_v16 }
  0x33   : > { %1670 = vmatmul.mubr.msk.bf16.gmra.mrb[12].mxu0 %vm438_vm0, %v1850_v17 }
  0x34   : > { %1673 = vmatprep.mubr.msk.bf16.mxu0 %vm438_vm0, %v1851_v18  ;;  %1702 = vmatpush3.bf16.msra.mxu0 %v1865_v16 }
  0x35   : > { %1703 = vmatprep.subr.bf16.mxu0 %v1866_v26 }
  0x38   : > { %1704 = vmatpush3.bf16.msra.mxu0 %v1866_v26 }
  0x3b   : > { %1674 = vmatmul.mubr.msk.bf16.gmra.mrb[16].mxu0 %vm438_vm0, %v1852_v19 }
  0x3c   : > { %1677 = vmatprep.mubr.msk.bf16.mxu0 %vm438_vm0, %v1853_v20 }
  0x43   : > { %1678 = vmatmul.mubr.msk.bf16.gmra.mrb[20].mxu0 %vm438_vm0, %v1854_v21 }
  0x44   : > { %1681 = vmatprep.mubr.msk.bf16.mxu0 %vm438_vm0, %v1855_v22 }
  0x4b   : > { %1682 = vmatmul.mubr.msk.bf16.gmra.mrb[24].mxu0 %vm438_vm0, %v1856_v23 }
  0x4c   : > { %1685 = vmatprep.mubr.msk.bf16.mxu0 %vm438_vm0, %v1857_v24 }
  0x53   : > { %1686 = vmatmul.mubr.msk.bf16.gmra.mrb[28].mxu0 %vm438_vm0, %v1858_v25 }
  0xee   : > { %v1659_v28 = vpop.f32.mrb[0].mxu0 }
  0xef   : > { %v530_v29 = vadd.f32 %v1659_v28, %v2102_v27  ;;  %v521_v30 = vpop.f32.mrb[1].mxu0 }
  0xf0   : > { %v522_v31 = vadd.f32 %v2102_v27, %v521_v30  ;;  %v1660_v32 = vpop.f32.mrb[2].mxu0 }
  0xf1   : > { %v650_v33 = vmul.f32 0.1, %v530_v29  ;;  %v533_v34 = vadd.f32 %v1660_v32, %v2102_v27  ;;  %v524_v35 = vpop.f32.mrb[3].mxu0 }
  0xf2   : > { %v648_v36 = vmul.f32 0.1, %v522_v31  ;;  %v525_v37 = vadd.f32 %v2102_v27, %v524_v35 }
  0xf3   : > { %v651_v38 = vmul.f32 0.1, %v533_v34  ;;  %v682_v40 = vmax.f32 %v530_v29, %v650_v33 }
  0xf4   : > { %v649_v39 = vmul.f32 0.1, %v525_v37  ;;  %v680_v42 = vmax.f32 %v522_v31, %v648_v36 }
  0xf5   : > { %v683_v41 = vmax.f32 %v533_v34, %v651_v38 }
  0xf6   : > { %v681_v43 = vmax.f32 %v525_v37, %v649_v39  ;;  %v1663_v44 = vpop.f32.mrb[4].mxu0 }
  0xf7   : > { %v730_v45 = vpack.c.bf16 %v683_v41, %v682_v40  ;;  %v546_v46 = vadd.f32 %v1663_v44, %v2102_v27  ;;  %v537_v47 = vpop.f32.mrb[5].mxu0 }
  0xf8   : > { %v538_v48 = vadd.f32 %v2102_v27, %v537_v47  ;;  %v1664_v49 = vpop.f32.mrb[6].mxu0  ;;  %v729_v50 = vpack.c.bf16 %v681_v43, %v680_v42 }
  0xf9   : > { %v654_v51 = vmul.f32 0.1, %v546_v46  ;;  %v549_v52 = vadd.f32 %v1664_v49, %v2102_v27  ;;  %v540_v53 = vpop.f32.mrb[7].mxu0 }
  0xfa   : > { %v652_v54 = vmul.f32 0.1, %v538_v48  ;;  %v541_v55 = vadd.f32 %v2102_v27, %v540_v53  ;;  %1705 = vmatprep.mubr.bf16.mxu0 %v729_v50 }
  0xfb   : > { %v655_v56 = vmul.f32 0.1, %v549_v52  ;;  %1706 = vmatmul.mubr.bf16.vlgmr.msra.gmra.mrb[32].mxu0 %v730_v45  ;;  %v686_v58 = vmax.f32 %v546_v46, %v654_v51 }
  0xfc   : > { %v653_v57 = vmul.f32 0.1, %v541_v55  ;;  %v684_v61 = vmax.f32 %v538_v48, %v652_v54 }
  0xfd   : > { %v687_v59 = vmax.f32 %v549_v52, %v655_v56 }
  0xfe   : > { %v1667_v60 = vpop.f32.mrb[8].mxu0  ;;  %v685_v62 = vmax.f32 %v541_v55, %v653_v57 }
  0xff   : > { %v562_v63 = vadd.f32 %v1667_v60, %v2102_v27  ;;  %v553_v0 = vpop.f32.mrb[9].mxu0  ;;  %v732_v1 = vpack.c.bf16 %v687_v59, %v686_v58 }
 0x100   : > { %v554_v2 = vadd.f32 %v2102_v27, %v553_v0  ;;  %v1668_v3 = vpop.f32.mrb[10].mxu0  ;;  %v731_v4 = vpack.c.bf16 %v685_v62, %v684_v61 }
 0x101   : > { %v658_v5 = vmul.f32 0.1, %v562_v63  ;;  %v565_v6 = vadd.f32 %v1668_v3, %v2102_v27  ;;  %v556_v7 = vpop.f32.mrb[11].mxu0 }
 0x102   : > { %v656_v8 = vmul.f32 0.1, %v554_v2  ;;  %v557_v9 = vadd.f32 %v2102_v27, %v556_v7  ;;  %1709 = vmatprep.mubr.bf16.mxu1 %v731_v4 }
 0x103   : > { %v659_v10 = vmul.f32 0.1, %v565_v6  ;;  %1710 = vmatmul.mubr.bf16.vlgmr.msra.gmra.mrb[0].mxu1 %v732_v1  ;;  %v690_v12 = vmax.f32 %v562_v63, %v658_v5 }
 0x104   : > { %v657_v11 = vmul.f32 0.1, %v557_v9  ;;  %v688_v14 = vmax.f32 %v554_v2, %v656_v8 }
 0x105   : > { %v691_v13 = vmax.f32 %v565_v6, %v659_v10 }
 0x106   : > { %v689_v15 = vmax.f32 %v557_v9, %v657_v11  ;;  %v1671_v16 = vpop.f32.mrb[12].mxu0 }
 0x107   : > { %v578_v17 = vadd.f32 %v1671_v16, %v2102_v27  ;;  %v569_v18 = vpop.f32.mrb[13].mxu0  ;;  %v734_v19 = vpack.c.bf16 %v691_v13, %v690_v12 }
 0x108   : > { %v570_v20 = vadd.f32 %v2102_v27, %v569_v18  ;;  %v1672_v21 = vpop.f32.mrb[14].mxu0  ;;  %v733_v22 = vpack.c.bf16 %v689_v15, %v688_v14 }
 0x109   : > { %v662_v23 = vmul.f32 0.1, %v578_v17  ;;  %v581_v24 = vadd.f32 %v1672_v21, %v2102_v27  ;;  %v572_v25 = vpop.f32.mrb[15].mxu0 }
 0x10a   : > { %v660_v26 = vmul.f32 0.1, %v570_v20  ;;  %v573_v28 = vadd.f32 %v2102_v27, %v572_v25  ;;  %1713 = vmatprep.mubr.bf16.mxu1 %v733_v22 }
 0x10b   : > { %v663_v29 = vmul.f32 0.1, %v581_v24  ;;  %1714 = vmatmul.mubr.bf16.gmra.mrb[4].mxu1 %v734_v19  ;;  %v694_v31 = vmax.f32 %v578_v17, %v662_v23 }
 0x10c   : > { %v661_v30 = vmul.f32 0.1, %v573_v28  ;;  %v692_v33 = vmax.f32 %v570_v20, %v660_v26 }
 0x10d   : > { %v695_v32 = vmax.f32 %v581_v24, %v663_v29 }
 0x10e   : > { %v693_v34 = vmax.f32 %v573_v28, %v661_v30  ;;  %v1675_v35 = vpop.f32.mrb[16].mxu0 }
 0x10f   : > { %v594_v36 = vadd.f32 %v1675_v35, %v2102_v27  ;;  %v585_v37 = vpop.f32.mrb[17].mxu0  ;;  %v736_v38 = vpack.c.bf16 %v695_v32, %v694_v31 }
 0x110   : > { %v586_v39 = vadd.f32 %v2102_v27, %v585_v37  ;;  %v1676_v40 = vpop.f32.mrb[18].mxu0  ;;  %v735_v41 = vpack.c.bf16 %v693_v34, %v692_v33 }
 0x111   : > { %v666_v42 = vmul.f32 0.1, %v594_v36  ;;  %v597_v43 = vadd.f32 %v1676_v40, %v2102_v27  ;;  %v588_v44 = vpop.f32.mrb[19].mxu0 }
 0x112   : > { %v664_v45 = vmul.f32 0.1, %v586_v39  ;;  %v589_v46 = vadd.f32 %v2102_v27, %v588_v44  ;;  %1717 = vmatprep.mubr.bf16.mxu1 %v735_v41 }
 0x113   : > { %v667_v47 = vmul.f32 0.1, %v597_v43  ;;  %1718 = vmatmul.mubr.bf16.gmra.mrb[8].mxu1 %v736_v38  ;;  %v698_v49 = vmax.f32 %v594_v36, %v666_v42 }
 0x114   : > { %v665_v48 = vmul.f32 0.1, %v589_v46  ;;  %v696_v51 = vmax.f32 %v586_v39, %v664_v45 }
 0x115   : > { %v699_v50 = vmax.f32 %v597_v43, %v667_v47 }
 0x116   : > { %v697_v52 = vmax.f32 %v589_v46, %v665_v48  ;;  %v1679_v53 = vpop.f32.mrb[20].mxu0  ;;  %v2139_v46 = vld [vmem:[%s2454_s4] ss:$0 sm:$0xff] }
 0x117   : > { %v610_v54 = vadd.f32 %v1679_v53, %v2102_v27  ;;  %v601_v55 = vpop.f32.mrb[21].mxu0  ;;  %v738_v56 = vpack.c.bf16 %v699_v50, %v698_v49 }
 0x118   : > { %v602_v57 = vadd.f32 %v2102_v27, %v601_v55  ;;  %v1680_v58 = vpop.f32.mrb[22].mxu0  ;;  %v737_v59 = vpack.c.bf16 %v697_v52, %v696_v51 }
 0x119   : > { %v670_v60 = vmul.f32 0.1, %v610_v54  ;;  %v613_v61 = vadd.f32 %v1680_v58, %v2102_v27  ;;  %v604_v62 = vpop.f32.mrb[23].mxu0 }
 0x11a   : > { %v668_v63 = vmul.f32 0.1, %v602_v57  ;;  %v605_v0 = vadd.f32 %v2102_v27, %v604_v62  ;;  %1721 = vmatprep.mubr.bf16.mxu1 %v737_v59 }
 0x11b   : > { %v671_v1 = vmul.f32 0.1, %v613_v61  ;;  %1722 = vmatmul.mubr.bf16.gmra.mrb[12].mxu1 %v738_v56  ;;  %v702_v3 = vmax.f32 %v610_v54, %v670_v60  ;;  %v2148_v56 = vld [vmem:[%s2455_s5] ss:$0 sm:$0xff] }
 0x11c   : > { %v669_v2 = vmul.f32 0.1, %v605_v0  ;;  %v700_v5 = vmax.f32 %v602_v57, %v668_v63 }
 0x11d   : > { %v703_v4 = vmax.f32 %v613_v61, %v671_v1 }
 0x11e   : > { %v701_v6 = vmax.f32 %v605_v0, %v669_v2  ;;  %v1683_v7 = vpop.f32.mrb[24].mxu0 }
 0x11f   : > { %v626_v8 = vadd.f32 %v1683_v7, %v2102_v27  ;;  %v617_v9 = vpop.f32.mrb[25].mxu0  ;;  %v740_v10 = vpack.c.bf16 %v703_v4, %v702_v3 }
 0x120   : > { %v618_v11 = vadd.f32 %v2102_v27, %v617_v9  ;;  %v1684_v12 = vpop.f32.mrb[26].mxu0  ;;  %v739_v13 = vpack.c.bf16 %v701_v6, %v700_v5 }
 0x121   : > { %v674_v14 = vmul.f32 0.1, %v626_v8  ;;  %v629_v15 = vadd.f32 %v1684_v12, %v2102_v27  ;;  %v620_v16 = vpop.f32.mrb[27].mxu0 }
 0x122   : > { %v672_v17 = vmul.f32 0.1, %v618_v11  ;;  %v621_v18 = vadd.f32 %v2102_v27, %v620_v16  ;;  %1725 = vmatprep.mubr.bf16.mxu1 %v739_v13 }
 0x123   : > { %v675_v19 = vmul.f32 0.1, %v629_v15  ;;  %1726 = vmatmul.mubr.bf16.gmra.mrb[16].mxu1 %v740_v10  ;;  %v706_v21 = vmax.f32 %v626_v8, %v674_v14 }
 0x124   : > { %v673_v20 = vmul.f32 0.1, %v621_v18  ;;  %v704_v23 = vmax.f32 %v618_v11, %v672_v17 }
 0x125   : > { %v707_v22 = vmax.f32 %v629_v15, %v675_v19 }
 0x126   : > { %v705_v24 = vmax.f32 %v621_v18, %v673_v20  ;;  %v1687_v25 = vpop.f32.mrb[28].mxu0 }
 0x127   : > { %v642_v26 = vadd.f32 %v1687_v25, %v2102_v27  ;;  %v633_v28 = vpop.f32.mrb[29].mxu0  ;;  %v742_v29 = vpack.c.bf16 %v707_v22, %v706_v21 }
 0x128   : > { %v634_v30 = vadd.f32 %v2102_v27, %v633_v28  ;;  %v1688_v31 = vpop.f32.mrb[30].mxu0  ;;  %v741_v32 = vpack.c.bf16 %v705_v24, %v704_v23 }
 0x129   : > { %v678_v33 = vmul.f32 0.1, %v642_v26  ;;  %v645_v34 = vadd.f32 %v1688_v31, %v2102_v27  ;;  %v636_v35 = vpop.f32.mrb[31].mxu0 }
 0x12a   : > { %v676_v36 = vmul.f32 0.1, %v634_v30  ;;  %v637_v37 = vadd.f32 %v2102_v27, %v636_v35  ;;  %1729 = vmatprep.mubr.bf16.mxu1 %v741_v32 }
 0x12b   : > { %v679_v38 = vmul.f32 0.1, %v645_v34  ;;  %1730 = vmatmul.mubr.bf16.gmra.mrb[20].mxu1 %v742_v29  ;;  %v710_v40 = vmax.f32 %v642_v26, %v678_v33 }
 0x12c   : > { %v677_v39 = vmul.f32 0.1, %v637_v37  ;;  %v708_v42 = vmax.f32 %v634_v30, %v676_v36 }
 0x12d   : > { %v711_v41 = vmax.f32 %v645_v34, %v679_v38 }
 0x12e   : > { %v709_v43 = vmax.f32 %v637_v37, %v677_v39 }
 0x12f   : > { %v744_v44 = vpack.c.bf16 %v711_v41, %v710_v40 }
 0x130   : > { %v743_v45 = vpack.c.bf16 %v709_v43, %v708_v42 }
 0x132   : > { %1733 = vmatprep.mubr.bf16.mxu1 %v743_v45 }
 0x133   : > { %1734 = vmatmul.mubr.bf16.gmra.mrb[24].mxu1 %v744_v44 }
 0x1ce   : > { %v1707_v47 = vpop.f32.mrb[32].mxu0 }
 0x1cf   : > { %v842_v27 = vadd.f32 %v1707_v47, %v2139_v46  ;;  %v833_v48 = vpop.f32.mrb[33].mxu0 }
 0x1d0   : > { %v834_v49 = vadd.f32 %v2139_v46, %v833_v48  ;;  %v1708_v50 = vpop.f32.mrb[34].mxu0 }
 0x1d1   : > { %v962_v51 = vmul.f32 0.1, %v842_v27  ;;  %v845_v52 = vadd.f32 %v1708_v50, %v2139_v46  ;;  %v836_v53 = vpop.f32.mrb[35].mxu0 }
 0x1d2   : > { %v960_v54 = vmul.f32 0.1, %v834_v49  ;;  %v837_v55 = vadd.f32 %v2139_v46, %v836_v53 }
 0x1d3   : > { %v963_v57 = vmul.f32 0.1, %v845_v52  ;;  %v994_v58 = vmax.f32 %v842_v27, %v962_v51 }
 0x1d4   : > { %v961_v59 = vmul.f32 0.1, %v837_v55  ;;  %v992_v60 = vmax.f32 %v834_v49, %v960_v54 }
 0x1d5   : > { %v995_v61 = vmax.f32 %v845_v52, %v963_v57  ;;  %v1034_v62 = vmul.f32 %v2148_v56, %v994_v58 }
 0x1d6   : > { %v993_v63 = vmax.f32 %v837_v55, %v961_v59  ;;  %v1711_v0 = vpop.f32.mrb[0].mxu1  ;;  %v1032_v1 = vmul.f32 %v2148_v56, %v992_v60 }
 0x1d7   : > { %v858_v2 = vadd.f32 %v1711_v0, %v2139_v46  ;;  %v849_v3 = vpop.f32.mrb[1].mxu1  ;;  %1068 = vadd.xlane.f32.xlu1 %v1034_v62  ;;  %v1035_v9 = vmul.f32 %v2148_v56, %v995_v61 }
 0x1d8   : > { %v850_v4 = vadd.f32 %v2139_v46, %v849_v3  ;;  %v1712_v5 = vpop.f32.mrb[2].mxu1  ;;  %1064 = vadd.xlane.f32.xlu0 %v1032_v1  ;;  %v1033_v12 = vmul.f32 %v2148_v56, %v993_v63 }
 0x1d9   : > { %v966_v6 = vmul.f32 0.1, %v858_v2  ;;  %v861_v7 = vadd.f32 %v1712_v5, %v2139_v46  ;;  %v852_v8 = vpop.f32.mrb[3].mxu1 }
 0x1da   : > { %v964_v10 = vmul.f32 0.1, %v850_v4  ;;  %v853_v11 = vadd.f32 %v2139_v46, %v852_v8 }
 0x1db   : > { %v998_v13 = vmax.f32 %v858_v2, %v966_v6  ;;  %v967_v14 = vmul.f32 0.1, %v861_v7  ;;  %1070 = vadd.xlane.f32.xlu1 %v1035_v9 }
 0x1dc   : > { %v965_v15 = vmul.f32 0.1, %v853_v11  ;;  %1066 = vadd.xlane.f32.xlu0 %v1033_v12  ;;  %v996_v18 = vmax.f32 %v850_v4, %v964_v10 }
 0x1dd   : > { %v999_v16 = vmax.f32 %v861_v7, %v967_v14  ;;  %v1038_v17 = vmul.f32 %v2148_v56, %v998_v13 }
 0x1de   : > { %v1715_v19 = vpop.f32.mrb[4].mxu1  ;;  %v997_v20 = vmax.f32 %v853_v11, %v965_v15  ;;  %v1036_v32 = vmul.f32 %v2148_v56, %v996_v18 }
 0x1df   : > { %v874_v21 = vadd.f32 %v1715_v19, %v2139_v46  ;;  %v865_v22 = vpop.f32.mrb[5].mxu1  ;;  %v1039_v23 = vmul.f32 %v2148_v56, %v999_v16 }
 0x1e0   : > { %v866_v24 = vadd.f32 %v2139_v46, %v865_v22  ;;  %v1716_v25 = vpop.f32.mrb[6].mxu1  ;;  %1076 = vadd.xlane.f32.xlu0 %v1038_v17  ;;  %v1037_v35 = vmul.f32 %v2148_v56, %v997_v20 }
 0x1e1   : > { %v970_v26 = vmul.f32 0.1, %v874_v21  ;;  %v877_v28 = vadd.f32 %v1716_v25, %v2139_v46  ;;  %v868_v29 = vpop.f32.mrb[7].mxu1  ;;  %1078 = vadd.xlane.f32.xlu1 %v1039_v23 }
 0x1e2   : > { %v968_v30 = vmul.f32 0.1, %v866_v24  ;;  %v869_v31 = vadd.f32 %v2139_v46, %v868_v29 }
 0x1e3   : > { %v1002_v33 = vmax.f32 %v874_v21, %v970_v26  ;;  %v971_v34 = vmul.f32 0.1, %v877_v28 }
 0x1e4   : > { %v969_v36 = vmul.f32 0.1, %v869_v31  ;;  %1072 = vadd.xlane.f32.xlu0 %v1036_v32  ;;  %v1000_v39 = vmax.f32 %v866_v24, %v968_v30 }
 0x1e5   : > { %v1003_v37 = vmax.f32 %v877_v28, %v971_v34  ;;  %1074 = vadd.xlane.f32.xlu1 %v1037_v35  ;;  %v1042_v38 = vmul.f32 %v2148_v56, %v1002_v33 }
 0x1e6   : > { %v1719_v40 = vpop.f32.mrb[8].mxu1  ;;  %v1001_v41 = vmax.f32 %v869_v31, %v969_v36  ;;  %v1040_v52 = vmul.f32 %v2148_v56, %v1000_v39 }
 0x1e7   : > { %v890_v42 = vadd.f32 %v1719_v40, %v2139_v46  ;;  %v881_v43 = vpop.f32.mrb[9].mxu1  ;;  %v1043_v44 = vmul.f32 %v2148_v56, %v1003_v37 }
 0x1e8   : > { %v882_v45 = vadd.f32 %v2139_v46, %v881_v43  ;;  %v1720_v47 = vpop.f32.mrb[10].mxu1  ;;  %1084 = vadd.xlane.f32.xlu0 %v1042_v38  ;;  %v1041_v55 = vmul.f32 %v2148_v56, %v1001_v41 }
 0x1e9   : > { %v974_v27 = vmul.f32 0.1, %v890_v42  ;;  %v893_v48 = vadd.f32 %v1720_v47, %v2139_v46  ;;  %v884_v49 = vpop.f32.mrb[11].mxu1  ;;  %1086 = vadd.xlane.f32.xlu1 %v1043_v44 }
 0x1ea   : > { %v972_v50 = vmul.f32 0.1, %v882_v45  ;;  %v885_v51 = vadd.f32 %v2139_v46, %v884_v49 }
 0x1eb   : > { %v1006_v53 = vmax.f32 %v890_v42, %v974_v27  ;;  %v975_v54 = vmul.f32 0.1, %v893_v48 }
 0x1ec   : > { %v973_v57 = vmul.f32 0.1, %v885_v51  ;;  %1080 = vadd.xlane.f32.xlu0 %v1040_v52  ;;  %v1004_v60 = vmax.f32 %v882_v45, %v972_v50 }
 0x1ed   : > { %v1007_v58 = vmax.f32 %v893_v48, %v975_v54  ;;  %1082 = vadd.xlane.f32.xlu1 %v1041_v55  ;;  %v1046_v59 = vmul.f32 %v2148_v56, %v1006_v53 }
 0x1ee   : > { %v1723_v61 = vpop.f32.mrb[12].mxu1  ;;  %v1005_v62 = vmax.f32 %v885_v51, %v973_v57  ;;  %v1044_v9 = vmul.f32 %v2148_v56, %v1004_v60 }
 0x1ef   : > { %v906_v63 = vadd.f32 %v1723_v61, %v2139_v46  ;;  %v897_v0 = vpop.f32.mrb[13].mxu1  ;;  %v1047_v1 = vmul.f32 %v2148_v56, %v1007_v58 }
 0x1f0   : > { %v898_v2 = vadd.f32 %v2139_v46, %v897_v0  ;;  %v1724_v3 = vpop.f32.mrb[14].mxu1  ;;  %1092 = vadd.xlane.f32.xlu0 %v1046_v59  ;;  %v1045_v12 = vmul.f32 %v2148_v56, %v1005_v62 }
 0x1f1   : > { %v978_v4 = vmul.f32 0.1, %v906_v63  ;;  %v909_v5 = vadd.f32 %v1724_v3, %v2139_v46  ;;  %v900_v6 = vpop.f32.mrb[15].mxu1  ;;  %1094 = vadd.xlane.f32.xlu1 %v1047_v1 }
 0x1f2   : > { %v976_v7 = vmul.f32 0.1, %v898_v2  ;;  %v901_v8 = vadd.f32 %v2139_v46, %v900_v6 }
 0x1f3   : > { %v1010_v10 = vmax.f32 %v906_v63, %v978_v4  ;;  %v979_v11 = vmul.f32 0.1, %v909_v5 }
 0x1f4   : > { %v977_v13 = vmul.f32 0.1, %v901_v8  ;;  %1088 = vadd.xlane.f32.xlu0 %v1044_v9  ;;  %v1008_v16 = vmax.f32 %v898_v2, %v976_v7 }
 0x1f5   : > { %v1011_v14 = vmax.f32 %v909_v5, %v979_v11  ;;  %1090 = vadd.xlane.f32.xlu1 %v1045_v12  ;;  %v1050_v15 = vmul.f32 %v2148_v56, %v1010_v10 }
 0x1f6   : > { %v1727_v17 = vpop.f32.mrb[16].mxu1  ;;  %v1009_v18 = vmax.f32 %v901_v8, %v977_v13  ;;  %v1048_v30 = vmul.f32 %v2148_v56, %v1008_v16 }
 0x1f7   : > { %v922_v19 = vadd.f32 %v1727_v17, %v2139_v46  ;;  %v913_v20 = vpop.f32.mrb[17].mxu1  ;;  %v1051_v21 = vmul.f32 %v2148_v56, %v1011_v14 }
 0x1f8   : > { %v914_v22 = vadd.f32 %v2139_v46, %v913_v20  ;;  %v1728_v23 = vpop.f32.mrb[18].mxu1  ;;  %1100 = vadd.xlane.f32.xlu0 %v1050_v15  ;;  %v1049_v33 = vmul.f32 %v2148_v56, %v1009_v18  ;;  %v2211_v18 = vld [vmem:[#allocation2] ss:$0 sm:$0xff] }
 0x1f9   : > { %v982_v24 = vmul.f32 0.1, %v922_v19  ;;  %v925_v25 = vadd.f32 %v1728_v23, %v2139_v46  ;;  %v916_v26 = vpop.f32.mrb[19].mxu1  ;;  %1102 = vadd.xlane.f32.xlu1 %v1051_v21 }
 0x1fa   : > { %v980_v28 = vmul.f32 0.1, %v914_v22  ;;  %v917_v29 = vadd.f32 %v2139_v46, %v916_v26 }
 0x1fb   : > { %v1014_v31 = vmax.f32 %v922_v19, %v982_v24  ;;  %v983_v32 = vmul.f32 0.1, %v925_v25 }
 0x1fc   : > { %v981_v34 = vmul.f32 0.1, %v917_v29  ;;  %1096 = vadd.xlane.f32.xlu0 %v1048_v30  ;;  %v1012_v37 = vmax.f32 %v914_v22, %v980_v28 }
 0x1fd   : > { %v1015_v35 = vmax.f32 %v925_v25, %v983_v32  ;;  %1098 = vadd.xlane.f32.xlu1 %v1049_v33  ;;  %v1054_v36 = vmul.f32 %v2148_v56, %v1014_v31 }
 0x1fe   : > { %v1731_v38 = vpop.f32.mrb[20].mxu1  ;;  %v1013_v39 = vmax.f32 %v917_v29, %v981_v34  ;;  %v1052_v50 = vmul.f32 %v2148_v56, %v1012_v37 }
 0x1ff   : > { %v938_v40 = vadd.f32 %v1731_v38, %v2139_v46  ;;  %v929_v41 = vpop.f32.mrb[21].mxu1  ;;  %v1055_v42 = vmul.f32 %v2148_v56, %v1015_v35 }
 0x200   : > { %v930_v43 = vadd.f32 %v2139_v46, %v929_v41  ;;  %v1732_v44 = vpop.f32.mrb[22].mxu1  ;;  %1108 = vadd.xlane.f32.xlu0 %v1054_v36  ;;  %v1053_v53 = vmul.f32 %v2148_v56, %v1013_v39 }
 0x201   : > { %v986_v45 = vmul.f32 0.1, %v938_v40  ;;  %v941_v47 = vadd.f32 %v1732_v44, %v2139_v46  ;;  %v932_v27 = vpop.f32.mrb[23].mxu1  ;;  %1110 = vadd.xlane.f32.xlu1 %v1055_v42 }
 0x202   : > { %v984_v48 = vmul.f32 0.1, %v930_v43  ;;  %v933_v49 = vadd.f32 %v2139_v46, %v932_v27 }
 0x203   : > { %v1018_v51 = vmax.f32 %v938_v40, %v986_v45  ;;  %v987_v52 = vmul.f32 0.1, %v941_v47 }
 0x204   : > { %v985_v54 = vmul.f32 0.1, %v933_v49  ;;  %1104 = vadd.xlane.f32.xlu0 %v1052_v50  ;;  %v1016_v58 = vmax.f32 %v930_v43, %v984_v48 }
 0x205   : > { %v1019_v55 = vmax.f32 %v941_v47, %v987_v52  ;;  %1106 = vadd.xlane.f32.xlu1 %v1053_v53  ;;  %v1058_v57 = vmul.f32 %v2148_v56, %v1018_v51 }
 0x206   : > { %v1735_v59 = vpop.f32.mrb[24].mxu1  ;;  %v1017_v60 = vmax.f32 %v933_v49, %v985_v54  ;;  %v1056_v7 = vmul.f32 %v2148_v56, %v1016_v58 }
 0x207   : > { %v954_v61 = vadd.f32 %v1735_v59, %v2139_v46  ;;  %v945_v62 = vpop.f32.mrb[25].mxu1  ;;  %v1059_v63 = vmul.f32 %v2148_v56, %v1019_v55 }
 0x208   : > { %v946_v0 = vadd.f32 %v2139_v46, %v945_v62  ;;  %v1736_v1 = vpop.f32.mrb[26].mxu1  ;;  %1116 = vadd.xlane.f32.xlu0 %v1058_v57  ;;  %v1057_v8 = vmul.f32 %v2148_v56, %v1017_v60 }
 0x209   : > { %v957_v2 = vadd.f32 %v1736_v1, %v2139_v46  ;;  %v948_v3 = vpop.f32.mrb[27].mxu1  ;;  %1118 = vadd.xlane.f32.xlu1 %v1059_v63  ;;  %v990_v4 = vmul.f32 0.1, %v954_v61 }
 0x20a   : > { %v988_v5 = vmul.f32 0.1, %v946_v0  ;;  %v949_v6 = vadd.f32 %v2139_v46, %v948_v3 }
 0x20b   : > { %v991_v10 = vmul.f32 0.1, %v957_v2  ;;  %v1022_v12 = vmax.f32 %v954_v61, %v990_v4 }
 0x20c   : > { %v1020_v9 = vmax.f32 %v946_v0, %v988_v5  ;;  %v989_v11 = vmul.f32 0.1, %v949_v6  ;;  %1112 = vadd.xlane.f32.xlu0 %v1056_v7 }
 0x20d   : > { %1114 = vadd.xlane.f32.xlu1 %v1057_v8  ;;  %v1023_v15 = vmax.f32 %v957_v2, %v991_v10  ;;  %v1062_v46 = vmul.f32 %v2148_v56, %v1022_v12 }
 0x20e   : > { %v1021_v13 = vmax.f32 %v949_v6, %v989_v11  ;;  %v1060_v14 = vmul.f32 %v2148_v56, %v1020_v9 }
 0x20f   : > { %v1063_v17 = vmul.f32 %v2148_v56, %v1023_v15 }
 0x210   : > { %1120 = vadd.xlane.f32.xlu0 %v1060_v14  ;;  %v1061_v16 = vmul.f32 %v2148_v56, %v1021_v13 }
 0x212   : > { %1122 = vadd.xlane.f32.xlu1 %v1061_v16 }
 0x214   : > { %1124 = vadd.xlane.f32.xlu0 %v1062_v46 }
 0x216   : > { %1126 = vadd.xlane.f32.xlu1 %v1063_v17 }
 0x264   : > { %v1069_v19 = vpop.xlane.xlu1 %1068 }
 0x265   : > { %v1136_v20 = vadd.f32 %v2211_v18, %v1069_v19  ;;  %v1065_v21 = vpop.xlane.xlu0 %1064 }
 0x266   : > { %v1134_v22 = vadd.f32 %v2211_v18, %v1065_v21 }
 0x267   : > { %1169 = vst.msk [vmem:[%s2215_s8 + $0x10] sm:$0xff] %vm1166_vm1, %v1136_v20 }
 0x268   : > { %1167 = vst.msk [vmem:[%s2215_s8] sm:$0xff] %vm1166_vm1, %v1134_v22  ;;  %v1071_v56 = vpop.xlane.xlu1 %1070 }
 0x269   : > { %v1137_v23 = vadd.f32 %v2211_v18, %v1071_v56  ;;  %v1067_v24 = vpop.xlane.xlu0 %1066 }
 0x26a   : > { %v1135_v25 = vadd.f32 %v2211_v18, %v1067_v24 }
 0x26b   : > { %1170 = vst.msk [vmem:[%s2215_s8 + $0x18] sm:$0xff] %vm1166_vm1, %v1137_v23 }
 0x26c   : > { %1168 = vst.msk [vmem:[%s2215_s8 + $0x8] sm:$0xff] %vm1166_vm1, %v1135_v25 }
 0x26d   : > { %v1077_v26 = vpop.xlane.xlu0 %1076 }
 0x26e   : > { %v1140_v28 = vadd.f32 %v2211_v18, %v1077_v26  ;;  %v1079_v29 = vpop.xlane.xlu1 %1078 }
 0x26f   : > { %v1141_v30 = vadd.f32 %v2211_v18, %v1079_v29 }
 0x270   : > { %1173 = vst.msk [vmem:[%s2215_s8 + $0x30] sm:$0xff] %vm1166_vm1, %v1140_v28 }
 0x271   : > { %1174 = vst.msk [vmem:[%s2215_s8 + $0x38] sm:$0xff] %vm1166_vm1, %v1141_v30  ;;  %v1073_v31 = vpop.xlane.xlu0 %1072 }
 0x272   : > { %v1138_v32 = vadd.f32 %v2211_v18, %v1073_v31  ;;  %v1075_v33 = vpop.xlane.xlu1 %1074 }
 0x273   : > { %v1139_v34 = vadd.f32 %v2211_v18, %v1075_v33 }
 0x274   : > { %1171 = vst.msk [vmem:[%s2215_s8 + $0x20] sm:$0xff] %vm1166_vm1, %v1138_v32 }
 0x275   : > { %1172 = vst.msk [vmem:[%s2215_s8 + $0x28] sm:$0xff] %vm1166_vm1, %v1139_v34  ;;  %v1085_v35 = vpop.xlane.xlu0 %1084 }
 0x276   : > { %v1144_v36 = vadd.f32 %v2211_v18, %v1085_v35  ;;  %v1087_v37 = vpop.xlane.xlu1 %1086 }
 0x277   : > { %v1145_v38 = vadd.f32 %v2211_v18, %v1087_v37 }
 0x278   : > { %1177 = vst.msk [vmem:[%s2215_s8 + $0x50] sm:$0xff] %vm1166_vm1, %v1144_v36 }
 0x279   : > { %1178 = vst.msk [vmem:[%s2215_s8 + $0x58] sm:$0xff] %vm1166_vm1, %v1145_v38  ;;  %v1081_v39 = vpop.xlane.xlu0 %1080 }
 0x27a   : > { %v1142_v40 = vadd.f32 %v2211_v18, %v1081_v39  ;;  %v1083_v41 = vpop.xlane.xlu1 %1082 }
 0x27b   : > { %v1143_v42 = vadd.f32 %v2211_v18, %v1083_v41 }
 0x27c   : > { %1175 = vst.msk [vmem:[%s2215_s8 + $0x40] sm:$0xff] %vm1166_vm1, %v1142_v40 }
 0x27d   : > { %1176 = vst.msk [vmem:[%s2215_s8 + $0x48] sm:$0xff] %vm1166_vm1, %v1143_v42  ;;  %v1093_v43 = vpop.xlane.xlu0 %1092 }
 0x27e   : > { %v1148_v44 = vadd.f32 %v2211_v18, %v1093_v43  ;;  %v1095_v45 = vpop.xlane.xlu1 %1094 }
 0x27f   : > { %v1149_v47 = vadd.f32 %v2211_v18, %v1095_v45 }
 0x280   : > { %1181 = vst.msk [vmem:[%s2215_s8 + $0x70] sm:$0xff] %vm1166_vm1, %v1148_v44 }
 0x281   : > { %1182 = vst.msk [vmem:[%s2215_s8 + $0x78] sm:$0xff] %vm1166_vm1, %v1149_v47  ;;  %v1089_v27 = vpop.xlane.xlu0 %1088 }
 0x282   : > { %v1146_v48 = vadd.f32 %v2211_v18, %v1089_v27  ;;  %v1091_v49 = vpop.xlane.xlu1 %1090 }
 0x283   : > { %v1147_v50 = vadd.f32 %v2211_v18, %v1091_v49 }
 0x284   : > { %1179 = vst.msk [vmem:[%s2215_s8 + $0x60] sm:$0xff] %vm1166_vm1, %v1146_v48 }
 0x285   : > { %1180 = vst.msk [vmem:[%s2215_s8 + $0x68] sm:$0xff] %vm1166_vm1, %v1147_v50  ;;  %v1101_v51 = vpop.xlane.xlu0 %1100 }
 0x286   : > { %v1152_v52 = vadd.f32 %v2211_v18, %v1101_v51  ;;  %v1103_v53 = vpop.xlane.xlu1 %1102 }
 0x287   : > { %v1153_v54 = vadd.f32 %v2211_v18, %v1103_v53 }
 0x288   : > { %1185 = vst.msk [vmem:[%s2215_s8 + $0x90] sm:$0xff] %vm1166_vm1, %v1152_v52 }
 0x289   : > { %1186 = vst.msk [vmem:[%s2215_s8 + $0x98] sm:$0xff] %vm1166_vm1, %v1153_v54  ;;  %v1097_v55 = vpop.xlane.xlu0 %1096 }
 0x28a   : > { %v1150_v57 = vadd.f32 %v2211_v18, %v1097_v55  ;;  %v1099_v58 = vpop.xlane.xlu1 %1098 }
 0x28b   : > { %v1151_v59 = vadd.f32 %v2211_v18, %v1099_v58 }
 0x28c   : > { %1183 = vst.msk [vmem:[%s2215_s8 + $0x80] sm:$0xff] %vm1166_vm1, %v1150_v57 }
 0x28d   : > { %1184 = vst.msk [vmem:[%s2215_s8 + $0x88] sm:$0xff] %vm1166_vm1, %v1151_v59  ;;  %v1109_v60 = vpop.xlane.xlu0 %1108 }
 0x28e   : > { %v1156_v61 = vadd.f32 %v2211_v18, %v1109_v60  ;;  %v1111_v62 = vpop.xlane.xlu1 %1110 }
 0x28f   : > { %v1157_v63 = vadd.f32 %v2211_v18, %v1111_v62 }
 0x290   : > { %1189 = vst.msk [vmem:[%s2215_s8 + $0xb0] sm:$0xff] %vm1166_vm1, %v1156_v61 }
 0x291   : > { %1190 = vst.msk [vmem:[%s2215_s8 + $0xb8] sm:$0xff] %vm1166_vm1, %v1157_v63  ;;  %v1105_v0 = vpop.xlane.xlu0 %1104 }
 0x292   : > { %v1154_v1 = vadd.f32 %v2211_v18, %v1105_v0  ;;  %v1107_v2 = vpop.xlane.xlu1 %1106 }
 0x293   : > { %v1155_v3 = vadd.f32 %v2211_v18, %v1107_v2 }
 0x294   : > { %1187 = vst.msk [vmem:[%s2215_s8 + $0xa0] sm:$0xff] %vm1166_vm1, %v1154_v1 }
 0x295   : > { %1188 = vst.msk [vmem:[%s2215_s8 + $0xa8] sm:$0xff] %vm1166_vm1, %v1155_v3  ;;  %v1117_v4 = vpop.xlane.xlu0 %1116 }
 0x296   : > { %v1160_v5 = vadd.f32 %v2211_v18, %v1117_v4  ;;  %v1119_v6 = vpop.xlane.xlu1 %1118 }
 0x297   : > { %v1161_v7 = vadd.f32 %v2211_v18, %v1119_v6 }
 0x298   : > { %1193 = vst.msk [vmem:[%s2215_s8 + $0xd0] sm:$0xff] %vm1166_vm1, %v1160_v5 }
 0x299   : > { %1194 = vst.msk [vmem:[%s2215_s8 + $0xd8] sm:$0xff] %vm1166_vm1, %v1161_v7  ;;  %v1113_v8 = vpop.xlane.xlu0 %1112 }
 0x29a   : > { %v1158_v9 = vadd.f32 %v2211_v18, %v1113_v8  ;;  %v1115_v10 = vpop.xlane.xlu1 %1114 }
 0x29b   : > { %v1159_v11 = vadd.f32 %v2211_v18, %v1115_v10 }
 0x29c   : > { %1191 = vst.msk [vmem:[%s2215_s8 + $0xc0] sm:$0xff] %vm1166_vm1, %v1158_v9 }
 0x29d   : > { %1192 = vst.msk [vmem:[%s2215_s8 + $0xc8] sm:$0xff] %vm1166_vm1, %v1159_v11  ;;  %v1121_v12 = vpop.xlane.xlu0 %1120 }
 0x29e   : > { %v1162_v13 = vadd.f32 %v2211_v18, %v1121_v12 }
 0x29f   : > { %v1123_v14 = vpop.xlane.xlu1 %1122 }
 0x2a0   : > { %1195 = vst.msk [vmem:[%s2215_s8 + $0xe0] sm:$0xff] %vm1166_vm1, %v1162_v13  ;;  %v1163_v15 = vadd.f32 %v2211_v18, %v1123_v14  ;;  %1205 = sbr.rel (!%p2023_p4) target bundleno = 735 (0x2df), region = 52 }
 0x2a1   : > { %v1125_v16 = vpop.xlane.xlu0 %1124 }
 0x2a2   : > { %1196 = vst.msk [vmem:[%s2215_s8 + $0xe8] sm:$0xff] %vm1166_vm1, %v1163_v15  ;;  %v1164_v46 = vadd.f32 %v2211_v18, %v1125_v16 }
 0x2a3   : > { %v1127_v17 = vpop.xlane.xlu1 %1126 }
 0x2a4   : > { %1197 = vst.msk [vmem:[%s2215_s8 + $0xf0] sm:$0xff] %vm1166_vm1, %v1164_v46  ;;  %v1165_v19 = vadd.f32 %v2211_v18, %v1127_v17 }
 0x2a6   : > { %1198 = vst.msk [vmem:[%s2215_s8 + $0xf8] sm:$0xff] %vm1166_vm1, %v1165_v19 }
 0x2a7   : > { %s2468_s26 = smov (!%p1208_p8, %s1207_s26), 32 }
 0x2a8   : > { %s1593_s16 = sshll.u32 %s2468_s26, 7 }
 0x2a9   : > { %p1596_p9 = scmp.eq.s32.totalorder %s1593_s16, 0 }
 0x2aa   : > { %s2324_s17 = sshrl.u32 (!%p1596_p9), %s2468_s26, 5 }
 0x2ab   : > { %1216 = sbr.rel (%p1596_p9) target bundleno = 735 (0x2df), region = 56  ;;  %p1597_p10 = scmp.le.s32.totalorder (!%p1596_p9), %s2324_s17, 0 }
 0x2b2   : > { %1494 = sbr.rel (%p1597_p10) target bundleno = 714 (0x2ca), region = 132  ;;  %s2459_s6 = smov (!%p1597_p10), %s2318_s15 }
 0x2b3   : > { %s2460_s10 = smov (!%p1597_p10), %s2215_s8  ;;  %s2333_s13 = smov (!%p1597_p10), 0  }
 0x2b4   : > { %s2335_s18 = smov (!%p1597_p10), 0  }
 0x2b9 LB: >> { %v1340_v18 = vld [vmem:[%s1929_s10] sm:$0xff]  ;;  %v1342_v20 = vld [vmem:[%s1929_s10 + $0x8] sm:$0xff]  ;;  %v1344_v21 = vld [vmem:[%s1929_s10 + $0x10] sm:$0xff]  ;;  %s1404_s19 = sadd.s32 1, %s1933_s13  ;;  %s1334_s18 = sadd.s32 1, %s1937_s18   ;;  %s1937_s18 = sphi %s2335_s18, %s1334_s18   ;;  %s1933_s13 = sphi %s2333_s13, %s2463_s13   ;;  %s1929_s10 = sphi %s2460_s10, %s2462_s10   ;;  %s1925_s6 = sphi %s2459_s6, %s2461_s6  }
 0x2ba   : >> { %1341 = vst [vmem:[%s1925_s6] sm:$0xff] %v1340_v18  ;;  %1343 = vst [vmem:[%s1925_s6 + $0x8] sm:$0xff] %v1342_v20  ;;  %v1346_v22 = vld [vmem:[%s1929_s10 + $0x18] sm:$0xff]  ;;  %v1348_v56 = vld [vmem:[%s1929_s10 + $0x20] sm:$0xff]  ;;  %p1405_p11 = scmp.ge.s32.totalorder %s1404_s19, %s2324_s17  ;;  %p1333_p12 = scmp.ge.s32.totalorder %s1334_s18, %s2324_s17 }
 0x2bb   : >> { %1345 = vst [vmem:[%s1925_s6 + $0x10] sm:$0xff] %v1344_v21  ;;  %v1350_v23 = vld [vmem:[%s1929_s10 + $0x28] sm:$0xff]  ;;  %1347 = vst [vmem:[%s1925_s6 + $0x18] sm:$0xff] %v1346_v22  ;;  %v1352_v24 = vld [vmem:[%s1929_s10 + $0x30] sm:$0xff] }
 0x2bc   : >> { %1349 = vst [vmem:[%s1925_s6 + $0x20] sm:$0xff] %v1348_v56  ;;  %1351 = vst [vmem:[%s1925_s6 + $0x28] sm:$0xff] %v1350_v23  ;;  %v1354_v25 = vld [vmem:[%s1929_s10 + $0x38] sm:$0xff]  ;;  %v1356_v26 = vld [vmem:[%s1929_s10 + $0x40] sm:$0xff]  ;;  %s2470_s19 = smov (%p1405_p11, %s1404_s19), 0 }
 0x2bd   : >> { %1353 = vst [vmem:[%s1925_s6 + $0x30] sm:$0xff] %v1352_v24  ;;  %1355 = vst [vmem:[%s1925_s6 + $0x38] sm:$0xff] %v1354_v25  ;;  %v1358_v28 = vld [vmem:[%s1929_s10 + $0x48] sm:$0xff]  ;;  %v1360_v29 = vld [vmem:[%s1929_s10 + $0x50] sm:$0xff]  ;;  %s1598_s20 = sshll.u32 %s2470_s19, 8  ;;  %s2463_s13 = smov %s2470_s19 }
 0x2be   : >> { %1357 = vst [vmem:[%s1925_s6 + $0x40] sm:$0xff] %v1356_v26  ;;  %v1362_v30 = vld [vmem:[%s1929_s10 + $0x58] sm:$0xff]  ;;  %1359 = vst [vmem:[%s1925_s6 + $0x48] sm:$0xff] %v1358_v28  ;;  %v1364_v31 = vld [vmem:[%s1929_s10 + $0x60] sm:$0xff]  ;;  %s2391_s21 = scalar_lea.vmem %s2215_s8, %s1598_s20 [#allocation3]   ;;  %s1410_s22 = scalar_lea.vmem %s2318_s15, %s1598_s20  }
 0x2bf   : >> { %1361 = vst [vmem:[%s1925_s6 + $0x50] sm:$0xff] %v1360_v29  ;;  %1363 = vst [vmem:[%s1925_s6 + $0x58] sm:$0xff] %v1362_v30  ;;  %v1366_v32 = vld [vmem:[%s1929_s10 + $0x68] sm:$0xff]  ;;  %v1368_v33 = vld [vmem:[%s1929_s10 + $0x70] sm:$0xff] }
 0x2c0   : >> { %1365 = vst [vmem:[%s1925_s6 + $0x60] sm:$0xff] %v1364_v31  ;;  %1367 = vst [vmem:[%s1925_s6 + $0x68] sm:$0xff] %v1366_v32  ;;  %v1370_v34 = vld [vmem:[%s1929_s10 + $0x78] sm:$0xff]  ;;  %v1372_v35 = vld [vmem:[%s1929_s10 + $0x80] sm:$0xff] }
 0x2c1   : >> { %1369 = vst [vmem:[%s1925_s6 + $0x70] sm:$0xff] %v1368_v33  ;;  %v1374_v36 = vld [vmem:[%s1929_s10 + $0x88] sm:$0xff]  ;;  %1371 = vst [vmem:[%s1925_s6 + $0x78] sm:$0xff] %v1370_v34  ;;  %v1376_v37 = vld [vmem:[%s1929_s10 + $0x90] sm:$0xff] }
 0x2c2   : >> { %1373 = vst [vmem:[%s1925_s6 + $0x80] sm:$0xff] %v1372_v35  ;;  %1375 = vst [vmem:[%s1925_s6 + $0x88] sm:$0xff] %v1374_v36  ;;  %v1378_v38 = vld [vmem:[%s1929_s10 + $0x98] sm:$0xff]  ;;  %v1380_v39 = vld [vmem:[%s1929_s10 + $0xa0] sm:$0xff] }
 0x2c3   : >> { %1377 = vst [vmem:[%s1925_s6 + $0x90] sm:$0xff] %v1376_v37  ;;  %1379 = vst [vmem:[%s1925_s6 + $0x98] sm:$0xff] %v1378_v38  ;;  %v1382_v40 = vld [vmem:[%s1929_s10 + $0xa8] sm:$0xff]  ;;  %v1384_v41 = vld [vmem:[%s1929_s10 + $0xb0] sm:$0xff]  ;;  %1336 = sbr.rel (!%p1333_p12) target bundleno = 697 (0x2b9), region = 138 }
 0x2c4   : >> { %1381 = vst [vmem:[%s1925_s6 + $0xa0] sm:$0xff] %v1380_v39  ;;  %v1386_v42 = vld [vmem:[%s1929_s10 + $0xb8] sm:$0xff]  ;;  %1383 = vst [vmem:[%s1925_s6 + $0xa8] sm:$0xff] %v1382_v40  ;;  %v1388_v43 = vld [vmem:[%s1929_s10 + $0xc0] sm:$0xff] }
 0x2c5   : >> { %1385 = vst [vmem:[%s1925_s6 + $0xb0] sm:$0xff] %v1384_v41  ;;  %1387 = vst [vmem:[%s1925_s6 + $0xb8] sm:$0xff] %v1386_v42  ;;  %v1390_v44 = vld [vmem:[%s1929_s10 + $0xc8] sm:$0xff]  ;;  %v1392_v45 = vld [vmem:[%s1929_s10 + $0xd0] sm:$0xff] }
 0x2c6   : >> { %1389 = vst [vmem:[%s1925_s6 + $0xc0] sm:$0xff] %v1388_v43  ;;  %1391 = vst [vmem:[%s1925_s6 + $0xc8] sm:$0xff] %v1390_v44  ;;  %v1394_v47 = vld [vmem:[%s1929_s10 + $0xd8] sm:$0xff]  ;;  %v1396_v27 = vld [vmem:[%s1929_s10 + $0xe0] sm:$0xff] }
 0x2c7   : >> { %1393 = vst [vmem:[%s1925_s6 + $0xd0] sm:$0xff] %v1392_v45  ;;  %v1398_v48 = vld [vmem:[%s1929_s10 + $0xe8] sm:$0xff]  ;;  %1395 = vst [vmem:[%s1925_s6 + $0xd8] sm:$0xff] %v1394_v47  ;;  %v1400_v49 = vld [vmem:[%s1929_s10 + $0xf0] sm:$0xff] }
 0x2c8   : >> { %1397 = vst [vmem:[%s1925_s6 + $0xe0] sm:$0xff] %v1396_v27  ;;  %1399 = vst [vmem:[%s1925_s6 + $0xe8] sm:$0xff] %v1398_v48  ;;  %v1402_v50 = vld [vmem:[%s1929_s10 + $0xf8] sm:$0xff]  ;;  %s2462_s10 = smov %s2391_s21 }
 0x2c9   : >> { %1401 = vst [vmem:[%s1925_s6 + $0xf0] sm:$0xff] %v1400_v49  ;;  %1403 = vst [vmem:[%s1925_s6 + $0xf8] sm:$0xff] %v1402_v50  ;;  %s2461_s6 = smov %s1410_s22 }
 0x2ca PF: > { %s2432_s23 = sand.u32 31, %s2468_s26   ;;  %s1609_s24 = sshll.u32 %s2324_s17, 8 }
 0x2cb   : > { %s1415_s25 = scalar_lea.vmem %s2215_s8, %s1609_s24 [#allocation3]   ;;  %s1417_s28 = scalar_lea.vmem %s2318_s15, %s1609_s24  }
 0x2cc   : > { %p1603_p13 = scmp.le.s32.totalorder %s2432_s23, 0 }
 0x2cd   : > { %s1939_s30 = smov (!%p1603_p13), %s1417_s28   ;;  %s1943_s11 = smov (!%p1603_p13), %s1415_s25  }
 0x2ce   : > { %1508 = sbr.rel (%p1603_p13) target bundleno = 735 (0x2df), region = 143  ;;  %s1947_s12 = smov (!%p1603_p13), 0  }
 0x2cf   : > { %s1951_s14 = smov (!%p1603_p13), 0  }
 0x2d5 LB: >> { %v1427_v51 = vld [vmem:[%s1945_s11] sm:$0xff]  ;;  %s1429_s26 = sadd.s32 1, %s1949_s12  ;;  %s1421_s14 = sadd.s32 1, %s1953_s14   ;;  %s1953_s14 = sphi %s1951_s14, %s1421_s14   ;;  %s1949_s12 = sphi %s1947_s12, %s1948_s12   ;;  %s1945_s11 = sphi %s1943_s11, %s1434_s11   ;;  %s1941_s30 = sphi %s1939_s30, %s1435_s30  }
 0x2d6   : >> { %1428 = vst [vmem:[%s1941_s30] sm:$0xff] %v1427_v51  ;;  %p1430_p0 = scmp.ge.s32.totalorder %s1429_s26, %s2432_s23  ;;  %p1420_p1 = scmp.ge.s32.totalorder %s1421_s14, %s2432_s23 }
 0x2d8   : >> { %s2472_s26 = smov (%p1430_p0, %s1429_s26), 0  ;;  %1423 = sbr.rel (!%p1420_p1) target bundleno = 725 (0x2d5), region = 149 }
 0x2d9   : >> { %s1604_s8 = sshll.u32 %s2472_s26, 3  ;;  %s1948_s12 = smov %s2472_s26  }
 0x2da   : >> { %s1434_s11 = scalar_lea.vmem %s1415_s25, %s1604_s8 [#allocation3]   ;;  %s1435_s30 = scalar_lea.vmem %s1417_s28, %s1604_s8  }
 0x2df PF: > { %p16_p2 = scmp.ge.s32.totalorder %s2013_s29, 4   ;;  %s2464_s26 = smov %s1917_s27 }
 0x2e0   : > { %s2465_s27 = smov %s2021_s9  ;;  %s2466_s28 = smov %s2013_s29 }
 0x2e1   :  { %18 = sbr.rel (!%p16_p2) target bundleno = 5 (0x5), region = 160 }

</bundles_post_ra>
